<compile_context>
chip_gen: v6e
topology: v6e:2x2x1
jax: 0.10.0
libtpu: 0.0.40
codegen_flags: <defaults>
</compile_context>

<pallas_src>
import functools
import math

import jax
import jax.numpy as jnp
from jax.experimental import pallas as pl
from jax.experimental.pallas import tpu as pltpu

# ----------------------------- config ---------------------------------------
VOCAB      = 64
HIDDEN     = 32
NUM_HEADS  = 4
HEAD_DIM   = HIDDEN // NUM_HEADS
FFN        = 64
NUM_LAYERS = 2
MAX_POS    = 16
OUT_DIM    = 32      # params['out_dim'] with add_linear=True
SEQ        = 8
BATCH      = 2
NULL_IDX   = 0
LN_EPS     = 1e-12
NUM_ENC    = 2       # context encoder + candidate encoder


def _ln(x, g, b):
    """LayerNorm over the last (hidden) dim; g/b broadcast as (1, H)."""
    mu = jnp.mean(x, axis=-1, keepdims=True)
    var = jnp.mean(jnp.square(x - mu), axis=-1, keepdims=True)
    return (x - mu) * jax.lax.rsqrt(var + LN_EPS) * g + b


# ------------------- Pallas kernel: fused BERT-style encoder ------------------
def _encoder_kernel(ids_ref, mask_ref, word_emb_ref, pos_type_ref,
                    emb_ln_g_ref, emb_ln_b_ref,
                    wqkv_ref, bqkv_ref, wo_ref, bo_ref,
                    ln1_g_ref, ln1_b_ref,
                    wi_ref, bi_ref, wf_ref, bf_ref,
                    ln2_g_ref, ln2_b_ref,
                    w_pool_ref, b_pool_ref, w_add_ref, b_add_ref,
                    emb_ref, x_ref):
    f32 = jnp.float32
    BS = BATCH * SEQ

    # ---- embeddings: one-hot(token ids) @ word_emb (MXU) + pos/type, then LN --
    ids = ids_ref[...]                                              # (BS, 1) i32
    onehot = (jax.lax.broadcasted_iota(jnp.int32, (BS, VOCAB), 1) == ids
              ).astype(f32)                                         # (BS, VOCAB)
    x = jnp.dot(onehot, word_emb_ref[...], preferred_element_type=f32)
    x = x + pos_type_ref[...]                                       # (BS, H)
    x_ref[...] = _ln(x, emb_ln_g_ref[...], emb_ln_b_ref[...])

    # additive key-padding attention bias, shared by all layers / heads
    bias = ((1.0 - mask_ref[...]) * -10000.0)[:, None, :]           # (B, 1, S)
    scale = 1.0 / math.sqrt(HEAD_DIM)

    def layer_body(l, carry):
        x = x_ref[...]                                              # (BS, H)

        # fused QKV projection: one matmul, 3H output lanes
        qkv = jnp.dot(x, wqkv_ref[l], preferred_element_type=f32) + bqkv_ref[l]

        # multi-head self-attention (static loop over heads, batched over B)
        head_outs = []
        for h in range(NUM_HEADS):
            q = qkv[:, h * HEAD_DIM:(h + 1) * HEAD_DIM].reshape(BATCH, SEQ, HEAD_DIM)
            k = qkv[:, HIDDEN + h * HEAD_DIM:HIDDEN + (h + 1) * HEAD_DIM
                    ].reshape(BATCH, SEQ, HEAD_DIM)
            v = qkv[:, 2 * HIDDEN + h * HEAD_DIM:2 * HIDDEN + (h + 1) * HEAD_DIM
                    ].reshape(BATCH, SEQ, HEAD_DIM)
            s = jnp.einsum('bqd,bkd->bqk', q, k,
                           preferred_element_type=f32) * scale + bias   # (B,S,S)
            p = jax.nn.softmax(s, axis=-1)
            o = jnp.einsum('bqk,bkd->bqd', p, v,
                           preferred_element_type=f32)                  # (B,S,HD)
            head_outs.append(o.reshape(BS, HEAD_DIM))
        ctx = jnp.concatenate(head_outs, axis=-1)                       # (BS, H)

        attn_out = jnp.dot(ctx, wo_ref[l], preferred_element_type=f32) + bo_ref[l]
        x = _ln(attn_out + x, ln1_g_ref[l], ln1_b_ref[l])

        # feed-forward
        # TODO(synk): HF BERT uses erf-gelu; tanh approximation used for safe lowering.
        hf = jnp.dot(x, wi_ref[l], preferred_element_type=f32) + bi_ref[l]
        hf = jax.nn.gelu(hf, approximate=True)
        ffn_out = jnp.dot(hf, wf_ref[l], preferred_element_type=f32) + bf_ref[l]
        x_ref[...] = _ln(ffn_out + x, ln2_g_ref[l], ln2_b_ref[l])
        return carry

    jax.lax.fori_loop(0, NUM_LAYERS, layer_body, 0, unroll=True)

    # CLS pooling -> tanh pooler -> additional_linear
    # TODO(synk): dropout before additional_linear is identity in eval mode.
    cls = x_ref[...].reshape(BATCH, SEQ, HIDDEN)[:, 0, :]               # (B, H)
    pooled = jnp.tanh(
        jnp.dot(cls, w_pool_ref[...], preferred_element_type=f32) + b_pool_ref[...])
    emb_ref[...] = (jnp.dot(pooled, w_add_ref[...], preferred_element_type=f32)
                    + b_add_ref[...])                                   # (B, OUT_DIM)


def encoder_pallas(p, ids, maskf, pos_type):
    """Run both encoders (ctxt, cand) in one pallas_call; returns (2, B, OUT_DIM)."""
    L, H = NUM_LAYERS, HIDDEN

    def enc_spec(*dims):
        # Leading encoder dim (size 1 per grid step) is squeezed away.
        return pl.BlockSpec((None,) + dims, lambda e, _d=dims: (e,) + (0,) * len(_d))

    grid_spec = pltpu.PrefetchScalarGridSpec(
        num_scalar_prefetch=0,
        grid=(NUM_ENC,),
        in_specs=[
            enc_spec(BATCH * SEQ, 1),               # token ids
            enc_spec(BATCH, SEQ),                   # float mask
            enc_spec(VOCAB, H),                     # word embedding table
            enc_spec(BATCH * SEQ, H),               # pos + token-type embedding slab
            enc_spec(1, H), enc_spec(1, H),         # embedding LN gamma/beta
            enc_spec(L, H, 3 * H), enc_spec(L, 1, 3 * H),   # fused QKV
            enc_spec(L, H, H), enc_spec(L, 1, H),           # attn output proj
            enc_spec(L, 1, H), enc_spec(L, 1, H),           # LN1
            enc_spec(L, H, FFN), enc_spec(L, 1, FFN),       # FFN in
            enc_spec(L, FFN, H), enc_spec(L, 1, H),         # FFN out
            enc_spec(L, 1, H), enc_spec(L, 1, H),           # LN2
            enc_spec(H, H), enc_spec(1, H),                 # pooler
            enc_spec(H, OUT_DIM), enc_spec(1, OUT_DIM),     # additional_linear
        ],
        out_specs=enc_spec(BATCH, OUT_DIM),
        scratch_shapes=[pltpu.VMEM((BATCH * SEQ, HIDDEN), jnp.float32)],
    )
    return pl.pallas_call(
        _encoder_kernel,
        out_shape=jax.ShapeDtypeStruct((NUM_ENC, BATCH, OUT_DIM), jnp.float32),
        grid_spec=grid_spec,
        compiler_params=pltpu.CompilerParams(dimension_semantics=("parallel",)),
    )(ids, maskf, p["word_emb"], pos_type, p["emb_ln_g"], p["emb_ln_b"],
      p["wqkv"], p["bqkv"], p["wo"], p["bo"], p["ln1_g"], p["ln1_b"],
      p["wi"], p["bi"], p["wf"], p["bf"], p["ln2_g"], p["ln2_b"],
      p["w_pool"], p["b_pool"], p["w_add"], p["b_add"])


# ------------------ Pallas kernel: score matmul + cross-entropy --------------
def _score_loss_kernel(emb_ref, scores_ref, loss_ref):
    c = emb_ref[0]                                       # (bs, D) context
    d = emb_ref[1]                                       # (bs, D) candidates
    # scores = c @ d.T  (contract on last dims; no explicit transpose)
    scores = jax.lax.dot_general(c, d, (((1,), (1,)), ((), ())),
                                 preferred_element_type=jnp.float32)
    scores_ref[...] = scores
    # cross_entropy(scores, arange(bs), reduction='mean')
    m = jnp.max(scores, axis=-1, keepdims=True)
    lse = jnp.log(jnp.sum(jnp.exp(scores - m), axis=-1, keepdims=True)) + m
    row = jax.lax.broadcasted_iota(jnp.int32, scores.shape, 0)
    col = jax.lax.broadcasted_iota(jnp.int32, scores.shape, 1)
    diag = jnp.sum(jnp.where(row == col, scores, 0.0), axis=-1, keepdims=True)
    loss_ref[...] = jnp.mean(lse - diag).reshape(1, 1)


def score_and_loss_pallas(embs):
    _, bs, D = embs.shape
    scores, loss = pl.pallas_call(
        _score_loss_kernel,
        out_shape=(jax.ShapeDtypeStruct((bs, bs), jnp.float32),
                   jax.ShapeDtypeStruct((1, 1), jnp.float32)),
        grid=(1,),
        in_specs=[pl.BlockSpec((NUM_ENC, bs, D), lambda i: (0, 0, 0))],
        out_specs=(pl.BlockSpec((bs, bs), lambda i: (0, 0)),
                   pl.BlockSpec((1, 1), lambda i: (0, 0))),
    )(embs)
    return loss[0, 0], scores


# ------------------------------ forward wrapper -------------------------------
def biencoder_ranker_forward(params, context_input, cand_input):
    """BiEncoderRanker.forward(context_input, cand_input) with label_input=None."""
    # to_bert_input for both encoders (stacked: [ctxt, cand])
    tok = jnp.stack([context_input, cand_input], axis=0)            # (2, B, S) i32
    mask = tok != NULL_IDX
    maskf = mask.astype(jnp.float32)                                # (2, B, S)
    ids = (tok * mask.astype(tok.dtype)).reshape(NUM_ENC, BATCH * SEQ, 1)

    # positional + token-type(0) embedding slab per encoder: (2, B*S, H)
    pos_type = (params["pos_emb"][:, :SEQ, :][:, None, :, :]
                + params["type_emb"][:, 0, :][:, None, None, :])
    pos_type = jnp.broadcast_to(
        pos_type, (NUM_ENC, BATCH, SEQ, HIDDEN)).reshape(NUM_ENC, BATCH * SEQ, HIDDEN)

    embs = encoder_pallas(params, ids, maskf, pos_type)             # (2, B, OUT_DIM)
    loss, scores = score_and_loss_pallas(embs)
    return loss, scores


# ------------------------------- params --------------------------------------
def init_params(key):
    """Two independently-initialized tiny BERT encoders, stacked on a leading
    encoder axis of size 2 and a layer axis of size NUM_LAYERS."""
    keys = iter(jax.random.split(key, 16))

    def nrm(shape):
        return jax.random.normal(next(keys), shape, jnp.float32) * 0.02

    E, L, H = NUM_ENC, NUM_LAYERS, HIDDEN
    ones = lambda s: jnp.ones(s, jnp.float32)
    zeros = lambda s: jnp.zeros(s, jnp.float32)
    return {
        "word_emb": nrm((E, VOCAB, H)),
        "pos_emb": nrm((E, MAX_POS, H)),
        "type_emb": nrm((E, 2, H)),
        "emb_ln_g": ones((E, 1, H)), "emb_ln_b": zeros((E, 1, H)),
        "wqkv": nrm((E, L, H, 3 * H)), "bqkv": zeros((E, L, 1, 3 * H)),
        "wo": nrm((E, L, H, H)), "bo": zeros((E, L, 1, H)),
        "ln1_g": ones((E, L, 1, H)), "ln1_b": zeros((E, L, 1, H)),
        "wi": nrm((E, L, H, FFN)), "bi": zeros((E, L, 1, FFN)),
        "wf": nrm((E, L, FFN, H)), "bf": zeros((E, L, 1, H)),
        "ln2_g": ones((E, L, 1, H)), "ln2_b": zeros((E, L, 1, H)),
        "w_pool": nrm((E, H, H)), "b_pool": zeros((E, 1, H)),
        "w_add": nrm((E, H, OUT_DIM)), "b_add": zeros((E, 1, OUT_DIM)),
    }


# -------------------------------- main ----------------------------------------
if __name__ == "__main__":
    root = jax.random.PRNGKey(0)
    k_params, k_ctxt_in, k_cand_in = jax.random.split(root, 3)

    params = init_params(k_params)

    context_input = jax.random.randint(k_ctxt_in, (BATCH, SEQ), 1, VOCAB, dtype=jnp.int32)
    cand_input = jax.random.randint(k_cand_in, (BATCH, SEQ), 1, VOCAB, dtype=jnp.int32)
    # introduce padding tokens (NULL_IDX = 0) to exercise to_bert_input masking
    context_input = context_input.at[:, -2:].set(0)
    cand_input = cand_input.at[:, -1:].set(0)

    fwd = jax.jit(biencoder_ranker_forward)
    loss, scores = fwd(params, context_input, cand_input)
    jax.block_until_ready((loss, scores))

    assert scores.shape == (BATCH, BATCH) and loss.shape == ()
    assert bool(jnp.isfinite(loss)) and bool(jnp.all(jnp.isfinite(scores)))
    print("KERNEL_OK")
</pallas_src>

<mosaic_0001>
module attributes {stable_mosaic.version = 11 : i64} {
  func.func @_score_loss_kernel(%arg0: i32, %arg1: memref<2x2x32xf32, #tpu.memory_space<vmem>>, %arg2: memref<2x2xf32, #tpu.memory_space<vmem>>, %arg3: memref<1x1xf32, #tpu.memory_space<vmem>>) attributes {dimension_semantics = [#tpu.dimension_semantics<arbitrary>], iteration_bounds = array<i64: 1>, scalar_prefetch = 0 : i64, scratch_operands = 0 : i64, tpu.core_type = #tpu.core_type<tc>, window_params = [{pipeline_mode = #tpu.pipeline_mode<synchronous>, transform_indices = @transform_0, window_bounds = array<i64: 2, 2, 32>}, {pipeline_mode = #tpu.pipeline_mode<synchronous>, transform_indices = @transform_1, window_bounds = array<i64: 2, 2>}, {pipeline_mode = #tpu.pipeline_mode<synchronous>, transform_indices = @transform_2, window_bounds = array<i64: 1, 1>}]} {
    %c0 = arith.constant 0 : index
    %c0_0 = arith.constant 0 : index
    %c0_1 = arith.constant 0 : index
    %0 = vector.load %arg1[%c0, %c0_0, %c0_1] : memref<2x2x32xf32, #tpu.memory_space<vmem>>, vector<1x2x32xf32>
    %1 = vector.shape_cast %0 : vector<1x2x32xf32> to vector<2x32xf32>
    %c1 = arith.constant 1 : index
    %c0_2 = arith.constant 0 : index
    %c0_3 = arith.constant 0 : index
    %2 = vector.load %arg1[%c1, %c0_2, %c0_3] : memref<2x2x32xf32, #tpu.memory_space<vmem>>, vector<1x2x32xf32>
    %3 = vector.shape_cast %2 : vector<1x2x32xf32> to vector<2x32xf32>
    %cst = arith.constant dense<0.000000e+00> : vector<2x2xf32>
    %4 = tpu.matmul %1, %3, %cst {dimension_numbers = #tpu.dot_dimension_numbers<[1], [1], [0], [0], [0, 0, 1, 0], [], []>} : vector<2x32xf32>, vector<2x32xf32>, vector<2x2xf32> -> vector<2x2xf32>
    %c0_4 = arith.constant 0 : index
    %c0_5 = arith.constant 0 : index
    %5 = vector.load %arg2[%c0_4, %c0_5] : memref<2x2xf32, #tpu.memory_space<vmem>>, vector<2x2xf32>
    tpu.vector_store %arg2[%c0_4, %c0_5], %4 {strides = array<i32>} : memref<2x2xf32, #tpu.memory_space<vmem>>, vector<2x2xf32>,
    %cst_6 = arith.constant dense<0xFF800000> : vector<2xf32>
    %6 = vector.multi_reduction <maximumf>, %4, %cst_6 [1] : vector<2x2xf32> to vector<2xf32>
    %7 = vector.shape_cast %6 : vector<2xf32> to vector<2x1xf32>
    %8 = vector.broadcast %7 : vector<2x1xf32> to vector<2x2xf32>
    %9 = arith.subf %4, %8 : vector<2x2xf32>
    %10 = math.exp %9 : vector<2x2xf32>
    %cst_7 = arith.constant dense<0.000000e+00> : vector<2xf32>
    %11 = vector.multi_reduction <add>, %10, %cst_7 [1] : vector<2x2xf32> to vector<2xf32>
    %12 = vector.shape_cast %11 : vector<2xf32> to vector<2x1xf32>
    %13 = math.log %12 : vector<2x1xf32>
    %14 = arith.addf %13, %7 : vector<2x1xf32>
    %15 = tpu.iota {dimensions = array<i32: 0>} : vector<2x2xi32>
    %16 = tpu.iota {dimensions = array<i32: 1>} : vector<2x2xi32>
    %17 = arith.cmpi eq, %15, %16 : vector<2x2xi32>
    %cst_8 = arith.constant 0.000000e+00 : f32
    %18 = vector.broadcast %cst_8 : f32 to vector<2x2xf32>
    %19 = arith.select %17, %4, %18 : vector<2x2xi1>, vector<2x2xf32>
    %cst_9 = arith.constant dense<0.000000e+00> : vector<2xf32>
    %20 = vector.multi_reduction <add>, %19, %cst_9 [1] : vector<2x2xf32> to vector<2xf32>
    %21 = vector.shape_cast %20 : vector<2xf32> to vector<2x1xf32>
    %22 = arith.subf %14, %21 : vector<2x1xf32>
    %23 = vector.shape_cast %22 : vector<2x1xf32> to vector<1x2x1xf32>
    %cst_10 = arith.constant dense<0.000000e+00> : vector<1xf32>
    %24 = vector.multi_reduction <add>, %23, %cst_10 [1, 2] : vector<1x2x1xf32> to vector<1xf32>
    %25 = vector.shape_cast %24 : vector<1xf32> to vector<1x1x1xf32>
    %26 = vector.extract %25[0, 0, 0] : f32 from vector<1x1x1xf32>
    %cst_11 = arith.constant 2.000000e+00 : f32
    %27 = arith.divf %26, %cst_11 : f32
    %28 = vector.broadcast %27 : f32 to vector<1x1xf32>
    %c0_12 = arith.constant 0 : index
    %c0_13 = arith.constant 0 : index
    %29 = vector.load %arg3[%c0_12, %c0_13] : memref<1x1xf32, #tpu.memory_space<vmem>>, vector<1x1xf32>
    tpu.vector_store %arg3[%c0_12, %c0_13], %28 {strides = array<i32>} : memref<1x1xf32, #tpu.memory_space<vmem>>, vector<1x1xf32>,
    return
  }
  func.func @transform_0(%arg0: i32) -> (i32, i32, i32) {
    %c0_i32 = arith.constant 0 : i32
    %c0_i32_0 = arith.constant 0 : i32
    %c0_i32_1 = arith.constant 0 : i32
    %c0_i32_2 = arith.constant 0 : i32
    return %c0_i32, %c0_i32_0, %c0_i32_1 : i32, i32, i32
  }
  func.func @transform_1(%arg0: i32) -> (i32, i32) {
    %c0_i32 = arith.constant 0 : i32
    %c0_i32_0 = arith.constant 0 : i32
    %c0_i32_1 = arith.constant 0 : i32
    return %c0_i32, %c0_i32_0 : i32, i32
  }
  func.func @transform_2(%arg0: i32) -> (i32, i32) {
    %c0_i32 = arith.constant 0 : i32
    %c0_i32_0 = arith.constant 0 : i32
    %c0_i32_1 = arith.constant 0 : i32
    return %c0_i32, %c0_i32_0 : i32, i32
  }
}

module attributes {stable_mosaic.version = 11 : i64} {
  func.func @_encoder_kernel(%arg0: i32, %arg1: memref<1x16x1xi32, #tpu.memory_space<vmem>>, %arg2: memref<1x2x8xf32, #tpu.memory_space<vmem>>, %arg3: memref<1x64x32xf32, #tpu.memory_space<vmem>>, %arg4: memref<1x16x32xf32, #tpu.memory_space<vmem>>, %arg5: memref<1x1x32xf32, #tpu.memory_space<vmem>>, %arg6: memref<1x1x32xf32, #tpu.memory_space<vmem>>, %arg7: memref<1x2x32x96xf32, #tpu.memory_space<vmem>>, %arg8: memref<1x2x1x96xf32, #tpu.memory_space<vmem>>, %arg9: memref<1x2x32x32xf32, #tpu.memory_space<vmem>>, %arg10: memref<1x2x1x32xf32, #tpu.memory_space<vmem>>, %arg11: memref<1x2x1x32xf32, #tpu.memory_space<vmem>>, %arg12: memref<1x2x1x32xf32, #tpu.memory_space<vmem>>, %arg13: memref<1x2x32x64xf32, #tpu.memory_space<vmem>>, %arg14: memref<1x2x1x64xf32, #tpu.memory_space<vmem>>, %arg15: memref<1x2x64x32xf32, #tpu.memory_space<vmem>>, %arg16: memref<1x2x1x32xf32, #tpu.memory_space<vmem>>, %arg17: memref<1x2x1x32xf32, #tpu.memory_space<vmem>>, %arg18: memref<1x2x1x32xf32, #tpu.memory_space<vmem>>, %arg19: memref<1x32x32xf32, #tpu.memory_space<vmem>>, %arg20: memref<1x1x32xf32, #tpu.memory_space<vmem>>, %arg21: memref<1x32x32xf32, #tpu.memory_space<vmem>>, %arg22: memref<1x1x32xf32, #tpu.memory_space<vmem>>, %arg23: memref<1x2x32xf32, #tpu.memory_space<vmem>>, %arg24: memref<16x32xf32, #tpu.memory_space<vmem>>) attributes {dimension_semantics = [#tpu.dimension_semantics<parallel>], iteration_bounds = array<i64: 2>, scalar_prefetch = 0 : i64, scratch_operands = 1 : i64, tpu.core_type = #tpu.core_type<tc>, window_params = [{transform_indices = @transform_0, window_bounds = array<i64: 1, 16, 1>}, {transform_indices = @transform_1, window_bounds = array<i64: 1, 2, 8>}, {transform_indices = @transform_2, window_bounds = array<i64: 1, 64, 32>}, {transform_indices = @transform_3, window_bounds = array<i64: 1, 16, 32>}, {transform_indices = @transform_4, window_bounds = array<i64: 1, 1, 32>}, {transform_indices = @transform_5, window_bounds = array<i64: 1, 1, 32>}, {transform_indices = @transform_6, window_bounds = array<i64: 1, 2, 32, 96>}, {transform_indices = @transform_7, window_bounds = array<i64: 1, 2, 1, 96>}, {transform_indices = @transform_8, window_bounds = array<i64: 1, 2, 32, 32>}, {transform_indices = @transform_9, window_bounds = array<i64: 1, 2, 1, 32>}, {transform_indices = @transform_10, window_bounds = array<i64: 1, 2, 1, 32>}, {transform_indices = @transform_11, window_bounds = array<i64: 1, 2, 1, 32>}, {transform_indices = @transform_12, window_bounds = array<i64: 1, 2, 32, 64>}, {transform_indices = @transform_13, window_bounds = array<i64: 1, 2, 1, 64>}, {transform_indices = @transform_14, window_bounds = array<i64: 1, 2, 64, 32>}, {transform_indices = @transform_15, window_bounds = array<i64: 1, 2, 1, 32>}, {transform_indices = @transform_16, window_bounds = array<i64: 1, 2, 1, 32>}, {transform_indices = @transform_17, window_bounds = array<i64: 1, 2, 1, 32>}, {transform_indices = @transform_18, window_bounds = array<i64: 1, 32, 32>}, {transform_indices = @transform_19, window_bounds = array<i64: 1, 1, 32>}, {transform_indices = @transform_20, window_bounds = array<i64: 1, 32, 32>}, {transform_indices = @transform_21, window_bounds = array<i64: 1, 1, 32>}, {transform_indices = @transform_22, window_bounds = array<i64: 1, 2, 32>}]} {
    %c0 = arith.constant 0 : index
    %c0_0 = arith.constant 0 : index
    %c0_1 = arith.constant 0 : index
    %0 = vector.load %arg1[%c0, %c0_0, %c0_1] : memref<1x16x1xi32, #tpu.memory_space<vmem>>, vector<1x16x1xi32>
    %1 = vector.shape_cast %0 : vector<1x16x1xi32> to vector<16x1xi32>
    %2 = tpu.iota {dimensions = array<i32: 1>} : vector<16x64xi32>
    %3 = vector.broadcast %1 : vector<16x1xi32> to vector<16x64xi32>
    %4 = arith.cmpi eq, %2, %3 : vector<16x64xi32>
    %5 = arith.extui %4 : vector<16x64xi1> to vector<16x64xi32>
    %6 = arith.sitofp %5 : vector<16x64xi32> to vector<16x64xf32>
    %c0_2 = arith.constant 0 : index
    %c0_3 = arith.constant 0 : index
    %c0_4 = arith.constant 0 : index
    %7 = vector.load %arg3[%c0_2, %c0_3, %c0_4] : memref<1x64x32xf32, #tpu.memory_space<vmem>>, vector<1x64x32xf32>
    %8 = vector.shape_cast %7 : vector<1x64x32xf32> to vector<64x32xf32>
    %cst = arith.constant dense<0.000000e+00> : vector<16x32xf32>
    %9 = tpu.matmul %6, %8, %cst {dimension_numbers = #tpu.dot_dimension_numbers<[1], [0], [0], [1], [0, 0, 1, 1], [], []>} : vector<16x64xf32>, vector<64x32xf32>, vector<16x32xf32> -> vector<16x32xf32>
    %c0_5 = arith.constant 0 : index
    %c0_6 = arith.constant 0 : index
    %c0_7 = arith.constant 0 : index
    %10 = vector.load %arg4[%c0_5, %c0_6, %c0_7] : memref<1x16x32xf32, #tpu.memory_space<vmem>>, vector<1x16x32xf32>
    %11 = vector.shape_cast %10 : vector<1x16x32xf32> to vector<16x32xf32>
    %12 = arith.addf %9, %11 : vector<16x32xf32>
    %c0_8 = arith.constant 0 : index
    %c0_9 = arith.constant 0 : index
    %c0_10 = arith.constant 0 : index
    %13 = vector.load %arg5[%c0_8, %c0_9, %c0_10] : memref<1x1x32xf32, #tpu.memory_space<vmem>>, vector<1x1x32xf32>
    %14 = vector.shape_cast %13 : vector<1x1x32xf32> to vector<1x32xf32>
    %c0_11 = arith.constant 0 : index
    %c0_12 = arith.constant 0 : index
    %c0_13 = arith.constant 0 : index
    %15 = vector.load %arg6[%c0_11, %c0_12, %c0_13] : memref<1x1x32xf32, #tpu.memory_space<vmem>>, vector<1x1x32xf32>
    %16 = vector.shape_cast %15 : vector<1x1x32xf32> to vector<1x32xf32>
    %cst_14 = arith.constant dense<0.000000e+00> : vector<16xf32>
    %17 = vector.multi_reduction <add>, %12, %cst_14 [1] : vector<16x32xf32> to vector<16xf32>
    %18 = vector.shape_cast %17 : vector<16xf32> to vector<16x1xf32>
    %cst_15 = arith.constant 3.200000e+01 : f32
    %19 = vector.broadcast %cst_15 : f32 to vector<16x1xf32>
    %20 = arith.divf %18, %19 : vector<16x1xf32>
    %21 = vector.broadcast %20 : vector<16x1xf32> to vector<16x32xf32>
    %22 = arith.subf %12, %21 : vector<16x32xf32>
    %23 = arith.mulf %22, %22 : vector<16x32xf32>
    %cst_16 = arith.constant dense<0.000000e+00> : vector<16xf32>
    %24 = vector.multi_reduction <add>, %23, %cst_16 [1] : vector<16x32xf32> to vector<16xf32>
    %25 = vector.shape_cast %24 : vector<16xf32> to vector<16x1xf32>
    %cst_17 = arith.constant 3.200000e+01 : f32
    %26 = vector.broadcast %cst_17 : f32 to vector<16x1xf32>
    %27 = arith.divf %25, %26 : vector<16x1xf32>
    %28 = vector.broadcast %20 : vector<16x1xf32> to vector<16x32xf32>
    %29 = arith.subf %12, %28 : vector<16x32xf32>
    %cst_18 = arith.constant 9.99999996E-13 : f32
    %30 = vector.broadcast %cst_18 : f32 to vector<16x1xf32>
    %31 = arith.addf %27, %30 : vector<16x1xf32>
    %32 = math.rsqrt %31 : vector<16x1xf32>
    %33 = vector.broadcast %32 : vector<16x1xf32> to vector<16x32xf32>
    %34 = arith.mulf %29, %33 : vector<16x32xf32>
    %35 = vector.broadcast %14 : vector<1x32xf32> to vector<16x32xf32>
    %36 = arith.mulf %34, %35 : vector<16x32xf32>
    %37 = vector.broadcast %16 : vector<1x32xf32> to vector<16x32xf32>
    %38 = arith.addf %36, %37 : vector<16x32xf32>
    %c0_19 = arith.constant 0 : index
    %c0_20 = arith.constant 0 : index
    %39 = vector.load %arg24[%c0_19, %c0_20] : memref<16x32xf32, #tpu.memory_space<vmem>>, vector<16x32xf32>
    tpu.vector_store %arg24[%c0_19, %c0_20], %38 {strides = array<i32>} : memref<16x32xf32, #tpu.memory_space<vmem>>, vector<16x32xf32>,
    %c0_21 = arith.constant 0 : index
    %c0_22 = arith.constant 0 : index
    %c0_23 = arith.constant 0 : index
    %40 = vector.load %arg2[%c0_21, %c0_22, %c0_23] : memref<1x2x8xf32, #tpu.memory_space<vmem>>, vector<1x2x8xf32>
    %41 = vector.shape_cast %40 : vector<1x2x8xf32> to vector<2x8xf32>
    %cst_24 = arith.constant 1.000000e+00 : f32
    %42 = vector.broadcast %cst_24 : f32 to vector<2x8xf32>
    %43 = arith.subf %42, %41 : vector<2x8xf32>
    %cst_25 = arith.constant -1.000000e+04 : f32
    %44 = vector.broadcast %cst_25 : f32 to vector<2x8xf32>
    %45 = arith.mulf %43, %44 : vector<2x8xf32>
    %46 = vector.shape_cast %45 : vector<2x8xf32> to vector<2x1x8xf32>
    %c0_i32 = arith.constant 0 : i32
    %c0_26 = arith.constant 0 : index
    %c0_27 = arith.constant 0 : index
    %47 = vector.load %arg24[%c0_26, %c0_27] : memref<16x32xf32, #tpu.memory_space<vmem>>, vector<16x32xf32>
    %c0_28 = arith.constant 0 : index
    %48 = arith.index_cast %c0_i32 : i32 to index
    %c0_29 = arith.constant 0 : index
    %c0_30 = arith.constant 0 : index
    %49 = vector.load %arg7[%c0_28, %48, %c0_29, %c0_30] : memref<1x2x32x96xf32, #tpu.memory_space<vmem>>, vector<1x1x32x96xf32>
    %50 = vector.shape_cast %49 : vector<1x1x32x96xf32> to vector<32x96xf32>
    %cst_31 = arith.constant dense<0.000000e+00> : vector<16x96xf32>
    %51 = tpu.matmul %47, %50, %cst_31 {dimension_numbers = #tpu.dot_dimension_numbers<[1], [0], [0], [1], [0, 0, 1, 1], [], []>} : vector<16x32xf32>, vector<32x96xf32>, vector<16x96xf32> -> vector<16x96xf32>
    %c0_32 = arith.constant 0 : index
    %52 = arith.index_cast %c0_i32 : i32 to index
    %c0_33 = arith.constant 0 : index
    %c0_34 = arith.constant 0 : index
    %53 = vector.load %arg8[%c0_32, %52, %c0_33, %c0_34] : memref<1x2x1x96xf32, #tpu.memory_space<vmem>>, vector<1x1x1x96xf32>
    %54 = vector.shape_cast %53 : vector<1x1x1x96xf32> to vector<1x96xf32>
    %55 = vector.broadcast %54 : vector<1x96xf32> to vector<16x96xf32>
    %56 = arith.addf %51, %55 : vector<16x96xf32>
    %57 = vector.extract_strided_slice %56 {offsets = [0, 0], sizes = [16, 8], strides = [1, 1]} : vector<16x96xf32> to vector<16x8xf32>
    %58 = vector.shape_cast %57 : vector<16x8xf32> to vector<2x8x8xf32>
    %59 = vector.extract_strided_slice %56 {offsets = [0, 32], sizes = [16, 8], strides = [1, 1]} : vector<16x96xf32> to vector<16x8xf32>
    %60 = vector.shape_cast %59 : vector<16x8xf32> to vector<2x8x8xf32>
    %61 = vector.extract_strided_slice %56 {offsets = [0, 64], sizes = [16, 8], strides = [1, 1]} : vector<16x96xf32> to vector<16x8xf32>
    %62 = vector.shape_cast %61 : vector<16x8xf32> to vector<2x8x8xf32>
    "tpu.trace_start"() <{level = 10 : i32, message = "bqd,bkd->bqk"}> : () -> ()
    %cst_35 = arith.constant dense<0.000000e+00> : vector<2x8x8xf32>
    %63 = tpu.matmul %58, %60, %cst_35 {dimension_numbers = #tpu.dot_dimension_numbers<[2], [2], [1], [1], [0, 0, 0, 1, 1, 1], [0], [0]>} : vector<2x8x8xf32>, vector<2x8x8xf32>, vector<2x8x8xf32> -> vector<2x8x8xf32>
    "tpu.trace_stop"() : () -> ()
    %cst_36 = arith.constant 0.353553385 : f32
    %64 = vector.broadcast %cst_36 : f32 to vector<2x8x8xf32>
    %65 = arith.mulf %63, %64 : vector<2x8x8xf32>
    %66 = vector.broadcast %46 : vector<2x1x8xf32> to vector<2x8x8xf32>
    %67 = arith.addf %65, %66 : vector<2x8x8xf32>
    %cst_37 = arith.constant dense<0xFF800000> : vector<2x8xf32>
    %68 = vector.multi_reduction <maximumf>, %67, %cst_37 [2] : vector<2x8x8xf32> to vector<2x8xf32>
    %cst_38 = arith.constant 0xFF800000 : f32
    %69 = vector.broadcast %cst_38 : f32 to vector<2x8xf32>
    %70 = arith.maximumf %69, %68 : vector<2x8xf32>
    %71 = vector.shape_cast %70 : vector<2x8xf32> to vector<2x8x1xf32>
    %72 = vector.broadcast %71 : vector<2x8x1xf32> to vector<2x8x8xf32>
    %73 = arith.subf %67, %72 : vector<2x8x8xf32>
    %74 = math.exp %73 : vector<2x8x8xf32>
    %cst_39 = arith.constant dense<0.000000e+00> : vector<2x8xf32>
    %75 = vector.multi_reduction <add>, %74, %cst_39 [2] : vector<2x8x8xf32> to vector<2x8xf32>
    %76 = vector.shape_cast %75 : vector<2x8xf32> to vector<2x8x1xf32>
    %77 = vector.broadcast %76 : vector<2x8x1xf32> to vector<2x8x8xf32>
    %78 = arith.divf %74, %77 : vector<2x8x8xf32>
    "tpu.trace_start"() <{level = 10 : i32, message = "bqk,bkd->bqd"}> : () -> ()
    %cst_40 = arith.constant dense<0.000000e+00> : vector<2x8x8xf32>
    %79 = tpu.matmul %78, %62, %cst_40 {dimension_numbers = #tpu.dot_dimension_numbers<[2], [1], [1], [2], [0, 0, 0, 1, 1, 2], [0], [0]>} : vector<2x8x8xf32>, vector<2x8x8xf32>, vector<2x8x8xf32> -> vector<2x8x8xf32>
    "tpu.trace_stop"() : () -> ()
    %80 = vector.shape_cast %79 : vector<2x8x8xf32> to vector<16x8xf32>
    %81 = vector.extract_strided_slice %56 {offsets = [0, 8], sizes = [16, 8], strides = [1, 1]} : vector<16x96xf32> to vector<16x8xf32>
    %82 = vector.shape_cast %81 : vector<16x8xf32> to vector<2x8x8xf32>
    %83 = vector.extract_strided_slice %56 {offsets = [0, 40], sizes = [16, 8], strides = [1, 1]} : vector<16x96xf32> to vector<16x8xf32>
    %84 = vector.shape_cast %83 : vector<16x8xf32> to vector<2x8x8xf32>
    %85 = vector.extract_strided_slice %56 {offsets = [0, 72], sizes = [16, 8], strides = [1, 1]} : vector<16x96xf32> to vector<16x8xf32>
    %86 = vector.shape_cast %85 : vector<16x8xf32> to vector<2x8x8xf32>
    "tpu.trace_start"() <{level = 10 : i32, message = "bqd,bkd->bqk"}> : () -> ()
    %cst_41 = arith.constant dense<0.000000e+00> : vector<2x8x8xf32>
    %87 = tpu.matmul %82, %84, %cst_41 {dimension_numbers = #tpu.dot_dimension_numbers<[2], [2], [1], [1], [0, 0, 0, 1, 1, 1], [0], [0]>} : vector<2x8x8xf32>, vector<2x8x8xf32>, vector<2x8x8xf32> -> vector<2x8x8xf32>
    "tpu.trace_stop"() : () -> ()
    %cst_42 = arith.constant 0.353553385 : f32
    %88 = vector.broadcast %cst_42 : f32 to vector<2x8x8xf32>
    %89 = arith.mulf %87, %88 : vector<2x8x8xf32>
    %90 = vector.broadcast %46 : vector<2x1x8xf32> to vector<2x8x8xf32>
    %91 = arith.addf %89, %90 : vector<2x8x8xf32>
    %cst_43 = arith.constant dense<0xFF800000> : vector<2x8xf32>
    %92 = vector.multi_reduction <maximumf>, %91, %cst_43 [2] : vector<2x8x8xf32> to vector<2x8xf32>
    %cst_44 = arith.constant 0xFF800000 : f32
    %93 = vector.broadcast %cst_44 : f32 to vector<2x8xf32>
    %94 = arith.maximumf %93, %92 : vector<2x8xf32>
    %95 = vector.shape_cast %94 : vector<2x8xf32> to vector<2x8x1xf32>
    %96 = vector.broadcast %95 : vector<2x8x1xf32> to vector<2x8x8xf32>
    %97 = arith.subf %91, %96 : vector<2x8x8xf32>
    %98 = math.exp %97 : vector<2x8x8xf32>
    %cst_45 = arith.constant dense<0.000000e+00> : vector<2x8xf32>
    %99 = vector.multi_reduction <add>, %98, %cst_45 [2] : vector<2x8x8xf32> to vector<2x8xf32>
    %100 = vector.shape_cast %99 : vector<2x8xf32> to vector<2x8x1xf32>
    %101 = vector.broadcast %100 : vector<2x8x1xf32> to vector<2x8x8xf32>
    %102 = arith.divf %98, %101 : vector<2x8x8xf32>
    "tpu.trace_start"() <{level = 10 : i32, message = "bqk,bkd->bqd"}> : () -> ()
    %cst_46 = arith.constant dense<0.000000e+00> : vector<2x8x8xf32>
    %103 = tpu.matmul %102, %86, %cst_46 {dimension_numbers = #tpu.dot_dimension_numbers<[2], [1], [1], [2], [0, 0, 0, 1, 1, 2], [0], [0]>} : vector<2x8x8xf32>, vector<2x8x8xf32>, vector<2x8x8xf32> -> vector<2x8x8xf32>
    "tpu.trace_stop"() : () -> ()
    %104 = vector.shape_cast %103 : vector<2x8x8xf32> to vector<16x8xf32>
    %105 = vector.extract_strided_slice %56 {offsets = [0, 16], sizes = [16, 8], strides = [1, 1]} : vector<16x96xf32> to vector<16x8xf32>
    %106 = vector.shape_cast %105 : vector<16x8xf32> to vector<2x8x8xf32>
    %107 = vector.extract_strided_slice %56 {offsets = [0, 48], sizes = [16, 8], strides = [1, 1]} : vector<16x96xf32> to vector<16x8xf32>
    %108 = vector.shape_cast %107 : vector<16x8xf32> to vector<2x8x8xf32>
    %109 = vector.extract_strided_slice %56 {offsets = [0, 80], sizes = [16, 8], strides = [1, 1]} : vector<16x96xf32> to vector<16x8xf32>
    %110 = vector.shape_cast %109 : vector<16x8xf32> to vector<2x8x8xf32>
    "tpu.trace_start"() <{level = 10 : i32, message = "bqd,bkd->bqk"}> : () -> ()
    %cst_47 = arith.constant dense<0.000000e+00> : vector<2x8x8xf32>
    %111 = tpu.matmul %106, %108, %cst_47 {dimension_numbers = #tpu.dot_dimension_numbers<[2], [2], [1], [1], [0, 0, 0, 1, 1, 1], [0], [0]>} : vector<2x8x8xf32>, vector<2x8x8xf32>, vector<2x8x8xf32> -> vector<2x8x8xf32>
    "tpu.trace_stop"() : () -> ()
    %cst_48 = arith.constant 0.353553385 : f32
    %112 = vector.broadcast %cst_48 : f32 to vector<2x8x8xf32>
    %113 = arith.mulf %111, %112 : vector<2x8x8xf32>
    %114 = vector.broadcast %46 : vector<2x1x8xf32> to vector<2x8x8xf32>
    %115 = arith.addf %113, %114 : vector<2x8x8xf32>
    %cst_49 = arith.constant dense<0xFF800000> : vector<2x8xf32>
    %116 = vector.multi_reduction <maximumf>, %115, %cst_49 [2] : vector<2x8x8xf32> to vector<2x8xf32>
    %cst_50 = arith.constant 0xFF800000 : f32
    %117 = vector.broadcast %cst_50 : f32 to vector<2x8xf32>
    %118 = arith.maximumf %117, %116 : vector<2x8xf32>
    %119 = vector.shape_cast %118 : vector<2x8xf32> to vector<2x8x1xf32>
    %120 = vector.broadcast %119 : vector<2x8x1xf32> to vector<2x8x8xf32>
    %121 = arith.subf %115, %120 : vector<2x8x8xf32>
    %122 = math.exp %121 : vector<2x8x8xf32>
    %cst_51 = arith.constant dense<0.000000e+00> : vector<2x8xf32>
    %123 = vector.multi_reduction <add>, %122, %cst_51 [2] : vector<2x8x8xf32> to vector<2x8xf32>
    %124 = vector.shape_cast %123 : vector<2x8xf32> to vector<2x8x1xf32>
    %125 = vector.broadcast %124 : vector<2x8x1xf32> to vector<2x8x8xf32>
    %126 = arith.divf %122, %125 : vector<2x8x8xf32>
    "tpu.trace_start"() <{level = 10 : i32, message = "bqk,bkd->bqd"}> : () -> ()
    %cst_52 = arith.constant dense<0.000000e+00> : vector<2x8x8xf32>
    %127 = tpu.matmul %126, %110, %cst_52 {dimension_numbers = #tpu.dot_dimension_numbers<[2], [1], [1], [2], [0, 0, 0, 1, 1, 2], [0], [0]>} : vector<2x8x8xf32>, vector<2x8x8xf32>, vector<2x8x8xf32> -> vector<2x8x8xf32>
    "tpu.trace_stop"() : () -> ()
    %128 = vector.shape_cast %127 : vector<2x8x8xf32> to vector<16x8xf32>
    %129 = vector.extract_strided_slice %56 {offsets = [0, 24], sizes = [16, 8], strides = [1, 1]} : vector<16x96xf32> to vector<16x8xf32>
    %130 = vector.shape_cast %129 : vector<16x8xf32> to vector<2x8x8xf32>
    %131 = vector.extract_strided_slice %56 {offsets = [0, 56], sizes = [16, 8], strides = [1, 1]} : vector<16x96xf32> to vector<16x8xf32>
    %132 = vector.shape_cast %131 : vector<16x8xf32> to vector<2x8x8xf32>
    %133 = vector.extract_strided_slice %56 {offsets = [0, 88], sizes = [16, 8], strides = [1, 1]} : vector<16x96xf32> to vector<16x8xf32>
    %134 = vector.shape_cast %133 : vector<16x8xf32> to vector<2x8x8xf32>
    "tpu.trace_start"() <{level = 10 : i32, message = "bqd,bkd->bqk"}> : () -> ()
    %cst_53 = arith.constant dense<0.000000e+00> : vector<2x8x8xf32>
    %135 = tpu.matmul %130, %132, %cst_53 {dimension_numbers = #tpu.dot_dimension_numbers<[2], [2], [1], [1], [0, 0, 0, 1, 1, 1], [0], [0]>} : vector<2x8x8xf32>, vector<2x8x8xf32>, vector<2x8x8xf32> -> vector<2x8x8xf32>
    "tpu.trace_stop"() : () -> ()
    %cst_54 = arith.constant 0.353553385 : f32
    %136 = vector.broadcast %cst_54 : f32 to vector<2x8x8xf32>
    %137 = arith.mulf %135, %136 : vector<2x8x8xf32>
    %138 = vector.broadcast %46 : vector<2x1x8xf32> to vector<2x8x8xf32>
    %139 = arith.addf %137, %138 : vector<2x8x8xf32>
    %cst_55 = arith.constant dense<0xFF800000> : vector<2x8xf32>
    %140 = vector.multi_reduction <maximumf>, %139, %cst_55 [2] : vector<2x8x8xf32> to vector<2x8xf32>
    %cst_56 = arith.constant 0xFF800000 : f32
    %141 = vector.broadcast %cst_56 : f32 to vector<2x8xf32>
    %142 = arith.maximumf %141, %140 : vector<2x8xf32>
    %143 = vector.shape_cast %142 : vector<2x8xf32> to vector<2x8x1xf32>
    %144 = vector.broadcast %143 : vector<2x8x1xf32> to vector<2x8x8xf32>
    %145 = arith.subf %139, %144 : vector<2x8x8xf32>
    %146 = math.exp %145 : vector<2x8x8xf32>
    %cst_57 = arith.constant dense<0.000000e+00> : vector<2x8xf32>
    %147 = vector.multi_reduction <add>, %146, %cst_57 [2] : vector<2x8x8xf32> to vector<2x8xf32>
    %148 = vector.shape_cast %147 : vector<2x8xf32> to vector<2x8x1xf32>
    %149 = vector.broadcast %148 : vector<2x8x1xf32> to vector<2x8x8xf32>
    %150 = arith.divf %146, %149 : vector<2x8x8xf32>
    "tpu.trace_start"() <{level = 10 : i32, message = "bqk,bkd->bqd"}> : () -> ()
    %cst_58 = arith.constant dense<0.000000e+00> : vector<2x8x8xf32>
    %151 = tpu.matmul %150, %134, %cst_58 {dimension_numbers = #tpu.dot_dimension_numbers<[2], [1], [1], [2], [0, 0, 0, 1, 1, 2], [0], [0]>} : vector<2x8x8xf32>, vector<2x8x8xf32>, vector<2x8x8xf32> -> vector<2x8x8xf32>
    "tpu.trace_stop"() : () -> ()
    %152 = vector.shape_cast %151 : vector<2x8x8xf32> to vector<16x8xf32>
    %153 = tpu.concatenate %80, %104, %128, %152 in 1 : vector<16x8xf32>, vector<16x8xf32>, vector<16x8xf32>, vector<16x8xf32> -> vector<16x32xf32>
    %c0_59 = arith.constant 0 : index
    %154 = arith.index_cast %c0_i32 : i32 to index
    %c0_60 = arith.constant 0 : index
    %c0_61 = arith.constant 0 : index
    %155 = vector.load %arg9[%c0_59, %154, %c0_60, %c0_61] : memref<1x2x32x32xf32, #tpu.memory_space<vmem>>, vector<1x1x32x32xf32>
    %156 = vector.shape_cast %155 : vector<1x1x32x32xf32> to vector<32x32xf32>
    %cst_62 = arith.constant dense<0.000000e+00> : vector<16x32xf32>
    %157 = tpu.matmul %153, %156, %cst_62 {dimension_numbers = #tpu.dot_dimension_numbers<[1], [0], [0], [1], [0, 0, 1, 1], [], []>} : vector<16x32xf32>, vector<32x32xf32>, vector<16x32xf32> -> vector<16x32xf32>
    %c0_63 = arith.constant 0 : index
    %158 = arith.index_cast %c0_i32 : i32 to index
    %c0_64 = arith.constant 0 : index
    %c0_65 = arith.constant 0 : index
    %159 = vector.load %arg10[%c0_63, %158, %c0_64, %c0_65] : memref<1x2x1x32xf32, #tpu.memory_space<vmem>>, vector<1x1x1x32xf32>
    %160 = vector.shape_cast %159 : vector<1x1x1x32xf32> to vector<1x32xf32>
    %161 = vector.broadcast %160 : vector<1x32xf32> to vector<16x32xf32>
    %162 = arith.addf %157, %161 : vector<16x32xf32>
    %163 = arith.addf %162, %47 : vector<16x32xf32>
    %c0_66 = arith.constant 0 : index
    %164 = arith.index_cast %c0_i32 : i32 to index
    %c0_67 = arith.constant 0 : index
    %c0_68 = arith.constant 0 : index
    %165 = vector.load %arg11[%c0_66, %164, %c0_67, %c0_68] : memref<1x2x1x32xf32, #tpu.memory_space<vmem>>, vector<1x1x1x32xf32>
    %166 = vector.shape_cast %165 : vector<1x1x1x32xf32> to vector<1x32xf32>
    %c0_69 = arith.constant 0 : index
    %167 = arith.index_cast %c0_i32 : i32 to index
    %c0_70 = arith.constant 0 : index
    %c0_71 = arith.constant 0 : index
    %168 = vector.load %arg12[%c0_69, %167, %c0_70, %c0_71] : memref<1x2x1x32xf32, #tpu.memory_space<vmem>>, vector<1x1x1x32xf32>
    %169 = vector.shape_cast %168 : vector<1x1x1x32xf32> to vector<1x32xf32>
    %cst_72 = arith.constant dense<0.000000e+00> : vector<16xf32>
    %170 = vector.multi_reduction <add>, %163, %cst_72 [1] : vector<16x32xf32> to vector<16xf32>
    %171 = vector.shape_cast %170 : vector<16xf32> to vector<16x1xf32>
    %cst_73 = arith.constant 3.200000e+01 : f32
    %172 = vector.broadcast %cst_73 : f32 to vector<16x1xf32>
    %173 = arith.divf %171, %172 : vector<16x1xf32>
    %174 = vector.broadcast %173 : vector<16x1xf32> to vector<16x32xf32>
    %175 = arith.subf %163, %174 : vector<16x32xf32>
    %176 = arith.mulf %175, %175 : vector<16x32xf32>
    %cst_74 = arith.constant dense<0.000000e+00> : vector<16xf32>
    %177 = vector.multi_reduction <add>, %176, %cst_74 [1] : vector<16x32xf32> to vector<16xf32>
    %178 = vector.shape_cast %177 : vector<16xf32> to vector<16x1xf32>
    %cst_75 = arith.constant 3.200000e+01 : f32
    %179 = vector.broadcast %cst_75 : f32 to vector<16x1xf32>
    %180 = arith.divf %178, %179 : vector<16x1xf32>
    %181 = vector.broadcast %173 : vector<16x1xf32> to vector<16x32xf32>
    %182 = arith.subf %163, %181 : vector<16x32xf32>
    %cst_76 = arith.constant 9.99999996E-13 : f32
    %183 = vector.broadcast %cst_76 : f32 to vector<16x1xf32>
    %184 = arith.addf %180, %183 : vector<16x1xf32>
    %185 = math.rsqrt %184 : vector<16x1xf32>
    %186 = vector.broadcast %185 : vector<16x1xf32> to vector<16x32xf32>
    %187 = arith.mulf %182, %186 : vector<16x32xf32>
    %188 = vector.broadcast %166 : vector<1x32xf32> to vector<16x32xf32>
    %189 = arith.mulf %187, %188 : vector<16x32xf32>
    %190 = vector.broadcast %169 : vector<1x32xf32> to vector<16x32xf32>
    %191 = arith.addf %189, %190 : vector<16x32xf32>
    %c0_77 = arith.constant 0 : index
    %192 = arith.index_cast %c0_i32 : i32 to index
    %c0_78 = arith.constant 0 : index
    %c0_79 = arith.constant 0 : index
    %193 = vector.load %arg13[%c0_77, %192, %c0_78, %c0_79] : memref<1x2x32x64xf32, #tpu.memory_space<vmem>>, vector<1x1x32x64xf32>
    %194 = vector.shape_cast %193 : vector<1x1x32x64xf32> to vector<32x64xf32>
    %cst_80 = arith.constant dense<0.000000e+00> : vector<16x64xf32>
    %195 = tpu.matmul %191, %194, %cst_80 {dimension_numbers = #tpu.dot_dimension_numbers<[1], [0], [0], [1], [0, 0, 1, 1], [], []>} : vector<16x32xf32>, vector<32x64xf32>, vector<16x64xf32> -> vector<16x64xf32>
    %c0_81 = arith.constant 0 : index
    %196 = arith.index_cast %c0_i32 : i32 to index
    %c0_82 = arith.constant 0 : index
    %c0_83 = arith.constant 0 : index
    %197 = vector.load %arg14[%c0_81, %196, %c0_82, %c0_83] : memref<1x2x1x64xf32, #tpu.memory_space<vmem>>, vector<1x1x1x64xf32>
    %198 = vector.shape_cast %197 : vector<1x1x1x64xf32> to vector<1x64xf32>
    %199 = vector.broadcast %198 : vector<1x64xf32> to vector<16x64xf32>
    %200 = arith.addf %195, %199 : vector<16x64xf32>
    %201 = arith.mulf %200, %200 : vector<16x64xf32>
    %202 = arith.mulf %200, %201 : vector<16x64xf32>
    %cst_84 = arith.constant 4.471500e-02 : f32
    %203 = vector.broadcast %cst_84 : f32 to vector<16x64xf32>
    %204 = arith.mulf %203, %202 : vector<16x64xf32>
    %205 = arith.addf %200, %204 : vector<16x64xf32>
    %cst_85 = arith.constant 0.797884583 : f32
    %206 = vector.broadcast %cst_85 : f32 to vector<16x64xf32>
    %207 = arith.mulf %206, %205 : vector<16x64xf32>
    %208 = math.tanh %207 : vector<16x64xf32>
    %cst_86 = arith.constant 1.000000e+00 : f32
    %209 = vector.broadcast %cst_86 : f32 to vector<16x64xf32>
    %210 = arith.addf %209, %208 : vector<16x64xf32>
    %cst_87 = arith.constant 5.000000e-01 : f32
    %211 = vector.broadcast %cst_87 : f32 to vector<16x64xf32>
    %212 = arith.mulf %211, %210 : vector<16x64xf32>
    %213 = arith.mulf %200, %212 : vector<16x64xf32>
    %c0_88 = arith.constant 0 : index
    %214 = arith.index_cast %c0_i32 : i32 to index
    %c0_89 = arith.constant 0 : index
    %c0_90 = arith.constant 0 : index
    %215 = vector.load %arg15[%c0_88, %214, %c0_89, %c0_90] : memref<1x2x64x32xf32, #tpu.memory_space<vmem>>, vector<1x1x64x32xf32>
    %216 = vector.shape_cast %215 : vector<1x1x64x32xf32> to vector<64x32xf32>
    %cst_91 = arith.constant dense<0.000000e+00> : vector<16x32xf32>
    %217 = tpu.matmul %213, %216, %cst_91 {dimension_numbers = #tpu.dot_dimension_numbers<[1], [0], [0], [1], [0, 0, 1, 1], [], []>} : vector<16x64xf32>, vector<64x32xf32>, vector<16x32xf32> -> vector<16x32xf32>
    %c0_92 = arith.constant 0 : index
    %218 = arith.index_cast %c0_i32 : i32 to index
    %c0_93 = arith.constant 0 : index
    %c0_94 = arith.constant 0 : index
    %219 = vector.load %arg16[%c0_92, %218, %c0_93, %c0_94] : memref<1x2x1x32xf32, #tpu.memory_space<vmem>>, vector<1x1x1x32xf32>
    %220 = vector.shape_cast %219 : vector<1x1x1x32xf32> to vector<1x32xf32>
    %221 = vector.broadcast %220 : vector<1x32xf32> to vector<16x32xf32>
    %222 = arith.addf %217, %221 : vector<16x32xf32>
    %223 = arith.addf %222, %191 : vector<16x32xf32>
    %c0_95 = arith.constant 0 : index
    %224 = arith.index_cast %c0_i32 : i32 to index
    %c0_96 = arith.constant 0 : index
    %c0_97 = arith.constant 0 : index
    %225 = vector.load %arg17[%c0_95, %224, %c0_96, %c0_97] : memref<1x2x1x32xf32, #tpu.memory_space<vmem>>, vector<1x1x1x32xf32>
    %226 = vector.shape_cast %225 : vector<1x1x1x32xf32> to vector<1x32xf32>
    %c0_98 = arith.constant 0 : index
    %227 = arith.index_cast %c0_i32 : i32 to index
    %c0_99 = arith.constant 0 : index
    %c0_100 = arith.constant 0 : index
    %228 = vector.load %arg18[%c0_98, %227, %c0_99, %c0_100] : memref<1x2x1x32xf32, #tpu.memory_space<vmem>>, vector<1x1x1x32xf32>
    %229 = vector.shape_cast %228 : vector<1x1x1x32xf32> to vector<1x32xf32>
    %cst_101 = arith.constant dense<0.000000e+00> : vector<16xf32>
    %230 = vector.multi_reduction <add>, %223, %cst_101 [1] : vector<16x32xf32> to vector<16xf32>
    %231 = vector.shape_cast %230 : vector<16xf32> to vector<16x1xf32>
    %cst_102 = arith.constant 3.200000e+01 : f32
    %232 = vector.broadcast %cst_102 : f32 to vector<16x1xf32>
    %233 = arith.divf %231, %232 : vector<16x1xf32>
    %234 = vector.broadcast %233 : vector<16x1xf32> to vector<16x32xf32>
    %235 = arith.subf %223, %234 : vector<16x32xf32>
    %236 = arith.mulf %235, %235 : vector<16x32xf32>
    %cst_103 = arith.constant dense<0.000000e+00> : vector<16xf32>
    %237 = vector.multi_reduction <add>, %236, %cst_103 [1] : vector<16x32xf32> to vector<16xf32>
    %238 = vector.shape_cast %237 : vector<16xf32> to vector<16x1xf32>
    %cst_104 = arith.constant 3.200000e+01 : f32
    %239 = vector.broadcast %cst_104 : f32 to vector<16x1xf32>
    %240 = arith.divf %238, %239 : vector<16x1xf32>
    %241 = vector.broadcast %233 : vector<16x1xf32> to vector<16x32xf32>
    %242 = arith.subf %223, %241 : vector<16x32xf32>
    %cst_105 = arith.constant 9.99999996E-13 : f32
    %243 = vector.broadcast %cst_105 : f32 to vector<16x1xf32>
    %244 = arith.addf %240, %243 : vector<16x1xf32>
    %245 = math.rsqrt %244 : vector<16x1xf32>
    %246 = vector.broadcast %245 : vector<16x1xf32> to vector<16x32xf32>
    %247 = arith.mulf %242, %246 : vector<16x32xf32>
    %248 = vector.broadcast %226 : vector<1x32xf32> to vector<16x32xf32>
    %249 = arith.mulf %247, %248 : vector<16x32xf32>
    %250 = vector.broadcast %229 : vector<1x32xf32> to vector<16x32xf32>
    %251 = arith.addf %249, %250 : vector<16x32xf32>
    %c0_106 = arith.constant 0 : index
    %c0_107 = arith.constant 0 : index
    %252 = vector.load %arg24[%c0_106, %c0_107] : memref<16x32xf32, #tpu.memory_space<vmem>>, vector<16x32xf32>
    tpu.vector_store %arg24[%c0_106, %c0_107], %251 {strides = array<i32>} : memref<16x32xf32, #tpu.memory_space<vmem>>, vector<16x32xf32>,
    %c1_i32 = arith.constant 1 : i32
    %c0_108 = arith.constant 0 : index
    %c0_109 = arith.constant 0 : index
    %253 = vector.load %arg24[%c0_108, %c0_109] : memref<16x32xf32, #tpu.memory_space<vmem>>, vector<16x32xf32>
    %c0_110 = arith.constant 0 : index
    %254 = arith.index_cast %c1_i32 : i32 to index
    %c0_111 = arith.constant 0 : index
    %c0_112 = arith.constant 0 : index
    %255 = vector.load %arg7[%c0_110, %254, %c0_111, %c0_112] : memref<1x2x32x96xf32, #tpu.memory_space<vmem>>, vector<1x1x32x96xf32>
    %256 = vector.shape_cast %255 : vector<1x1x32x96xf32> to vector<32x96xf32>
    %cst_113 = arith.constant dense<0.000000e+00> : vector<16x96xf32>
    %257 = tpu.matmul %253, %256, %cst_113 {dimension_numbers = #tpu.dot_dimension_numbers<[1], [0], [0], [1], [0, 0, 1, 1], [], []>} : vector<16x32xf32>, vector<32x96xf32>, vector<16x96xf32> -> vector<16x96xf32>
    %c0_114 = arith.constant 0 : index
    %258 = arith.index_cast %c1_i32 : i32 to index
    %c0_115 = arith.constant 0 : index
    %c0_116 = arith.constant 0 : index
    %259 = vector.load %arg8[%c0_114, %258, %c0_115, %c0_116] : memref<1x2x1x96xf32, #tpu.memory_space<vmem>>, vector<1x1x1x96xf32>
    %260 = vector.shape_cast %259 : vector<1x1x1x96xf32> to vector<1x96xf32>
    %261 = vector.broadcast %260 : vector<1x96xf32> to vector<16x96xf32>
    %262 = arith.addf %257, %261 : vector<16x96xf32>
    %263 = vector.extract_strided_slice %262 {offsets = [0, 0], sizes = [16, 8], strides = [1, 1]} : vector<16x96xf32> to vector<16x8xf32>
    %264 = vector.shape_cast %263 : vector<16x8xf32> to vector<2x8x8xf32>
    %265 = vector.extract_strided_slice %262 {offsets = [0, 32], sizes = [16, 8], strides = [1, 1]} : vector<16x96xf32> to vector<16x8xf32>
    %266 = vector.shape_cast %265 : vector<16x8xf32> to vector<2x8x8xf32>
    %267 = vector.extract_strided_slice %262 {offsets = [0, 64], sizes = [16, 8], strides = [1, 1]} : vector<16x96xf32> to vector<16x8xf32>
    %268 = vector.shape_cast %267 : vector<16x8xf32> to vector<2x8x8xf32>
    "tpu.trace_start"() <{level = 10 : i32, message = "bqd,bkd->bqk"}> : () -> ()
    %cst_117 = arith.constant dense<0.000000e+00> : vector<2x8x8xf32>
    %269 = tpu.matmul %264, %266, %cst_117 {dimension_numbers = #tpu.dot_dimension_numbers<[2], [2], [1], [1], [0, 0, 0, 1, 1, 1], [0], [0]>} : vector<2x8x8xf32>, vector<2x8x8xf32>, vector<2x8x8xf32> -> vector<2x8x8xf32>
    "tpu.trace_stop"() : () -> ()
    %cst_118 = arith.constant 0.353553385 : f32
    %270 = vector.broadcast %cst_118 : f32 to vector<2x8x8xf32>
    %271 = arith.mulf %269, %270 : vector<2x8x8xf32>
    %272 = vector.broadcast %46 : vector<2x1x8xf32> to vector<2x8x8xf32>
    %273 = arith.addf %271, %272 : vector<2x8x8xf32>
    %cst_119 = arith.constant dense<0xFF800000> : vector<2x8xf32>
    %274 = vector.multi_reduction <maximumf>, %273, %cst_119 [2] : vector<2x8x8xf32> to vector<2x8xf32>
    %cst_120 = arith.constant 0xFF800000 : f32
    %275 = vector.broadcast %cst_120 : f32 to vector<2x8xf32>
    %276 = arith.maximumf %275, %274 : vector<2x8xf32>
    %277 = vector.shape_cast %276 : vector<2x8xf32> to vector<2x8x1xf32>
    %278 = vector.broadcast %277 : vector<2x8x1xf32> to vector<2x8x8xf32>
    %279 = arith.subf %273, %278 : vector<2x8x8xf32>
    %280 = math.exp %279 : vector<2x8x8xf32>
    %cst_121 = arith.constant dense<0.000000e+00> : vector<2x8xf32>
    %281 = vector.multi_reduction <add>, %280, %cst_121 [2] : vector<2x8x8xf32> to vector<2x8xf32>
    %282 = vector.shape_cast %281 : vector<2x8xf32> to vector<2x8x1xf32>
    %283 = vector.broadcast %282 : vector<2x8x1xf32> to vector<2x8x8xf32>
    %284 = arith.divf %280, %283 : vector<2x8x8xf32>
    "tpu.trace_start"() <{level = 10 : i32, message = "bqk,bkd->bqd"}> : () -> ()
    %cst_122 = arith.constant dense<0.000000e+00> : vector<2x8x8xf32>
    %285 = tpu.matmul %284, %268, %cst_122 {dimension_numbers = #tpu.dot_dimension_numbers<[2], [1], [1], [2], [0, 0, 0, 1, 1, 2], [0], [0]>} : vector<2x8x8xf32>, vector<2x8x8xf32>, vector<2x8x8xf32> -> vector<2x8x8xf32>
    "tpu.trace_stop"() : () -> ()
    %286 = vector.shape_cast %285 : vector<2x8x8xf32> to vector<16x8xf32>
    %287 = vector.extract_strided_slice %262 {offsets = [0, 8], sizes = [16, 8], strides = [1, 1]} : vector<16x96xf32> to vector<16x8xf32>
    %288 = vector.shape_cast %287 : vector<16x8xf32> to vector<2x8x8xf32>
    %289 = vector.extract_strided_slice %262 {offsets = [0, 40], sizes = [16, 8], strides = [1, 1]} : vector<16x96xf32> to vector<16x8xf32>
    %290 = vector.shape_cast %289 : vector<16x8xf32> to vector<2x8x8xf32>
    %291 = vector.extract_strided_slice %262 {offsets = [0, 72], sizes = [16, 8], strides = [1, 1]} : vector<16x96xf32> to vector<16x8xf32>
    %292 = vector.shape_cast %291 : vector<16x8xf32> to vector<2x8x8xf32>
    "tpu.trace_start"() <{level = 10 : i32, message = "bqd,bkd->bqk"}> : () -> ()
    %cst_123 = arith.constant dense<0.000000e+00> : vector<2x8x8xf32>
    %293 = tpu.matmul %288, %290, %cst_123 {dimension_numbers = #tpu.dot_dimension_numbers<[2], [2], [1], [1], [0, 0, 0, 1, 1, 1], [0], [0]>} : vector<2x8x8xf32>, vector<2x8x8xf32>, vector<2x8x8xf32> -> vector<2x8x8xf32>
    "tpu.trace_stop"() : () -> ()
    %cst_124 = arith.constant 0.353553385 : f32
    %294 = vector.broadcast %cst_124 : f32 to vector<2x8x8xf32>
    %295 = arith.mulf %293, %294 : vector<2x8x8xf32>
    %296 = vector.broadcast %46 : vector<2x1x8xf32> to vector<2x8x8xf32>
    %297 = arith.addf %295, %296 : vector<2x8x8xf32>
    %cst_125 = arith.constant dense<0xFF800000> : vector<2x8xf32>
    %298 = vector.multi_reduction <maximumf>, %297, %cst_125 [2] : vector<2x8x8xf32> to vector<2x8xf32>
    %cst_126 = arith.constant 0xFF800000 : f32
    %299 = vector.broadcast %cst_126 : f32 to vector<2x8xf32>
    %300 = arith.maximumf %299, %298 : vector<2x8xf32>
    %301 = vector.shape_cast %300 : vector<2x8xf32> to vector<2x8x1xf32>
    %302 = vector.broadcast %301 : vector<2x8x1xf32> to vector<2x8x8xf32>
    %303 = arith.subf %297, %302 : vector<2x8x8xf32>
    %304 = math.exp %303 : vector<2x8x8xf32>
    %cst_127 = arith.constant dense<0.000000e+00> : vector<2x8xf32>
    %305 = vector.multi_reduction <add>, %304, %cst_127 [2] : vector<2x8x8xf32> to vector<2x8xf32>
    %306 = vector.shape_cast %305 : vector<2x8xf32> to vector<2x8x1xf32>
    %307 = vector.broadcast %306 : vector<2x8x1xf32> to vector<2x8x8xf32>
    %308 = arith.divf %304, %307 : vector<2x8x8xf32>
    "tpu.trace_start"() <{level = 10 : i32, message = "bqk,bkd->bqd"}> : () -> ()
    %cst_128 = arith.constant dense<0.000000e+00> : vector<2x8x8xf32>
    %309 = tpu.matmul %308, %292, %cst_128 {dimension_numbers = #tpu.dot_dimension_numbers<[2], [1], [1], [2], [0, 0, 0, 1, 1, 2], [0], [0]>} : vector<2x8x8xf32>, vector<2x8x8xf32>, vector<2x8x8xf32> -> vector<2x8x8xf32>
    "tpu.trace_stop"() : () -> ()
    %310 = vector.shape_cast %309 : vector<2x8x8xf32> to vector<16x8xf32>
    %311 = vector.extract_strided_slice %262 {offsets = [0, 16], sizes = [16, 8], strides = [1, 1]} : vector<16x96xf32> to vector<16x8xf32>
    %312 = vector.shape_cast %311 : vector<16x8xf32> to vector<2x8x8xf32>
    %313 = vector.extract_strided_slice %262 {offsets = [0, 48], sizes = [16, 8], strides = [1, 1]} : vector<16x96xf32> to vector<16x8xf32>
    %314 = vector.shape_cast %313 : vector<16x8xf32> to vector<2x8x8xf32>
    %315 = vector.extract_strided_slice %262 {offsets = [0, 80], sizes = [16, 8], strides = [1, 1]} : vector<16x96xf32> to vector<16x8xf32>
    %316 = vector.shape_cast %315 : vector<16x8xf32> to vector<2x8x8xf32>
    "tpu.trace_start"() <{level = 10 : i32, message = "bqd,bkd->bqk"}> : () -> ()
    %cst_129 = arith.constant dense<0.000000e+00> : vector<2x8x8xf32>
    %317 = tpu.matmul %312, %314, %cst_129 {dimension_numbers = #tpu.dot_dimension_numbers<[2], [2], [1], [1], [0, 0, 0, 1, 1, 1], [0], [0]>} : vector<2x8x8xf32>, vector<2x8x8xf32>, vector<2x8x8xf32> -> vector<2x8x8xf32>
    "tpu.trace_stop"() : () -> ()
    %cst_130 = arith.constant 0.353553385 : f32
    %318 = vector.broadcast %cst_130 : f32 to vector<2x8x8xf32>
    %319 = arith.mulf %317, %318 : vector<2x8x8xf32>
    %320 = vector.broadcast %46 : vector<2x1x8xf32> to vector<2x8x8xf32>
    %321 = arith.addf %319, %320 : vector<2x8x8xf32>
    %cst_131 = arith.constant dense<0xFF800000> : vector<2x8xf32>
    %322 = vector.multi_reduction <maximumf>, %321, %cst_131 [2] : vector<2x8x8xf32> to vector<2x8xf32>
    %cst_132 = arith.constant 0xFF800000 : f32
    %323 = vector.broadcast %cst_132 : f32 to vector<2x8xf32>
    %324 = arith.maximumf %323, %322 : vector<2x8xf32>
    %325 = vector.shape_cast %324 : vector<2x8xf32> to vector<2x8x1xf32>
    %326 = vector.broadcast %325 : vector<2x8x1xf32> to vector<2x8x8xf32>
    %327 = arith.subf %321, %326 : vector<2x8x8xf32>
    %328 = math.exp %327 : vector<2x8x8xf32>
    %cst_133 = arith.constant dense<0.000000e+00> : vector<2x8xf32>
    %329 = vector.multi_reduction <add>, %328, %cst_133 [2] : vector<2x8x8xf32> to vector<2x8xf32>
    %330 = vector.shape_cast %329 : vector<2x8xf32> to vector<2x8x1xf32>
    %331 = vector.broadcast %330 : vector<2x8x1xf32> to vector<2x8x8xf32>
    %332 = arith.divf %328, %331 : vector<2x8x8xf32>
    "tpu.trace_start"() <{level = 10 : i32, message = "bqk,bkd->bqd"}> : () -> ()
    %cst_134 = arith.constant dense<0.000000e+00> : vector<2x8x8xf32>
    %333 = tpu.matmul %332, %316, %cst_134 {dimension_numbers = #tpu.dot_dimension_numbers<[2], [1], [1], [2], [0, 0, 0, 1, 1, 2], [0], [0]>} : vector<2x8x8xf32>, vector<2x8x8xf32>, vector<2x8x8xf32> -> vector<2x8x8xf32>
    "tpu.trace_stop"() : () -> ()
    %334 = vector.shape_cast %333 : vector<2x8x8xf32> to vector<16x8xf32>
    %335 = vector.extract_strided_slice %262 {offsets = [0, 24], sizes = [16, 8], strides = [1, 1]} : vector<16x96xf32> to vector<16x8xf32>
    %336 = vector.shape_cast %335 : vector<16x8xf32> to vector<2x8x8xf32>
    %337 = vector.extract_strided_slice %262 {offsets = [0, 56], sizes = [16, 8], strides = [1, 1]} : vector<16x96xf32> to vector<16x8xf32>
    %338 = vector.shape_cast %337 : vector<16x8xf32> to vector<2x8x8xf32>
    %339 = vector.extract_strided_slice %262 {offsets = [0, 88], sizes = [16, 8], strides = [1, 1]} : vector<16x96xf32> to vector<16x8xf32>
    %340 = vector.shape_cast %339 : vector<16x8xf32> to vector<2x8x8xf32>
    "tpu.trace_start"() <{level = 10 : i32, message = "bqd,bkd->bqk"}> : () -> ()
    %cst_135 = arith.constant dense<0.000000e+00> : vector<2x8x8xf32>
    %341 = tpu.matmul %336, %338, %cst_135 {dimension_numbers = #tpu.dot_dimension_numbers<[2], [2], [1], [1], [0, 0, 0, 1, 1, 1], [0], [0]>} : vector<2x8x8xf32>, vector<2x8x8xf32>, vector<2x8x8xf32> -> vector<2x8x8xf32>
    "tpu.trace_stop"() : () -> ()
    %cst_136 = arith.constant 0.353553385 : f32
    %342 = vector.broadcast %cst_136 : f32 to vector<2x8x8xf32>
    %343 = arith.mulf %341, %342 : vector<2x8x8xf32>
    %344 = vector.broadcast %46 : vector<2x1x8xf32> to vector<2x8x8xf32>
    %345 = arith.addf %343, %344 : vector<2x8x8xf32>
    %cst_137 = arith.constant dense<0xFF800000> : vector<2x8xf32>
    %346 = vector.multi_reduction <maximumf>, %345, %cst_137 [2] : vector<2x8x8xf32> to vector<2x8xf32>
    %cst_138 = arith.constant 0xFF800000 : f32
    %347 = vector.broadcast %cst_138 : f32 to vector<2x8xf32>
    %348 = arith.maximumf %347, %346 : vector<2x8xf32>
    %349 = vector.shape_cast %348 : vector<2x8xf32> to vector<2x8x1xf32>
    %350 = vector.broadcast %349 : vector<2x8x1xf32> to vector<2x8x8xf32>
    %351 = arith.subf %345, %350 : vector<2x8x8xf32>
    %352 = math.exp %351 : vector<2x8x8xf32>
    %cst_139 = arith.constant dense<0.000000e+00> : vector<2x8xf32>
    %353 = vector.multi_reduction <add>, %352, %cst_139 [2] : vector<2x8x8xf32> to vector<2x8xf32>
    %354 = vector.shape_cast %353 : vector<2x8xf32> to vector<2x8x1xf32>
    %355 = vector.broadcast %354 : vector<2x8x1xf32> to vector<2x8x8xf32>
    %356 = arith.divf %352, %355 : vector<2x8x8xf32>
    "tpu.trace_start"() <{level = 10 : i32, message = "bqk,bkd->bqd"}> : () -> ()
    %cst_140 = arith.constant dense<0.000000e+00> : vector<2x8x8xf32>
    %357 = tpu.matmul %356, %340, %cst_140 {dimension_numbers = #tpu.dot_dimension_numbers<[2], [1], [1], [2], [0, 0, 0, 1, 1, 2], [0], [0]>} : vector<2x8x8xf32>, vector<2x8x8xf32>, vector<2x8x8xf32> -> vector<2x8x8xf32>
    "tpu.trace_stop"() : () -> ()
    %358 = vector.shape_cast %357 : vector<2x8x8xf32> to vector<16x8xf32>
    %359 = tpu.concatenate %286, %310, %334, %358 in 1 : vector<16x8xf32>, vector<16x8xf32>, vector<16x8xf32>, vector<16x8xf32> -> vector<16x32xf32>
    %c0_141 = arith.constant 0 : index
    %360 = arith.index_cast %c1_i32 : i32 to index
    %c0_142 = arith.constant 0 : index
    %c0_143 = arith.constant 0 : index
    %361 = vector.load %arg9[%c0_141, %360, %c0_142, %c0_143] : memref<1x2x32x32xf32, #tpu.memory_space<vmem>>, vector<1x1x32x32xf32>
    %362 = vector.shape_cast %361 : vector<1x1x32x32xf32> to vector<32x32xf32>
    %cst_144 = arith.constant dense<0.000000e+00> : vector<16x32xf32>
    %363 = tpu.matmul %359, %362, %cst_144 {dimension_numbers = #tpu.dot_dimension_numbers<[1], [0], [0], [1], [0, 0, 1, 1], [], []>} : vector<16x32xf32>, vector<32x32xf32>, vector<16x32xf32> -> vector<16x32xf32>
    %c0_145 = arith.constant 0 : index
    %364 = arith.index_cast %c1_i32 : i32 to index
    %c0_146 = arith.constant 0 : index
    %c0_147 = arith.constant 0 : index
    %365 = vector.load %arg10[%c0_145, %364, %c0_146, %c0_147] : memref<1x2x1x32xf32, #tpu.memory_space<vmem>>, vector<1x1x1x32xf32>
    %366 = vector.shape_cast %365 : vector<1x1x1x32xf32> to vector<1x32xf32>
    %367 = vector.broadcast %366 : vector<1x32xf32> to vector<16x32xf32>
    %368 = arith.addf %363, %367 : vector<16x32xf32>
    %369 = arith.addf %368, %253 : vector<16x32xf32>
    %c0_148 = arith.constant 0 : index
    %370 = arith.index_cast %c1_i32 : i32 to index
    %c0_149 = arith.constant 0 : index
    %c0_150 = arith.constant 0 : index
    %371 = vector.load %arg11[%c0_148, %370, %c0_149, %c0_150] : memref<1x2x1x32xf32, #tpu.memory_space<vmem>>, vector<1x1x1x32xf32>
    %372 = vector.shape_cast %371 : vector<1x1x1x32xf32> to vector<1x32xf32>
    %c0_151 = arith.constant 0 : index
    %373 = arith.index_cast %c1_i32 : i32 to index
    %c0_152 = arith.constant 0 : index
    %c0_153 = arith.constant 0 : index
    %374 = vector.load %arg12[%c0_151, %373, %c0_152, %c0_153] : memref<1x2x1x32xf32, #tpu.memory_space<vmem>>, vector<1x1x1x32xf32>
    %375 = vector.shape_cast %374 : vector<1x1x1x32xf32> to vector<1x32xf32>
    %cst_154 = arith.constant dense<0.000000e+00> : vector<16xf32>
    %376 = vector.multi_reduction <add>, %369, %cst_154 [1] : vector<16x32xf32> to vector<16xf32>
    %377 = vector.shape_cast %376 : vector<16xf32> to vector<16x1xf32>
    %cst_155 = arith.constant 3.200000e+01 : f32
    %378 = vector.broadcast %cst_155 : f32 to vector<16x1xf32>
    %379 = arith.divf %377, %378 : vector<16x1xf32>
    %380 = vector.broadcast %379 : vector<16x1xf32> to vector<16x32xf32>
    %381 = arith.subf %369, %380 : vector<16x32xf32>
    %382 = arith.mulf %381, %381 : vector<16x32xf32>
    %cst_156 = arith.constant dense<0.000000e+00> : vector<16xf32>
    %383 = vector.multi_reduction <add>, %382, %cst_156 [1] : vector<16x32xf32> to vector<16xf32>
    %384 = vector.shape_cast %383 : vector<16xf32> to vector<16x1xf32>
    %cst_157 = arith.constant 3.200000e+01 : f32
    %385 = vector.broadcast %cst_157 : f32 to vector<16x1xf32>
    %386 = arith.divf %384, %385 : vector<16x1xf32>
    %387 = vector.broadcast %379 : vector<16x1xf32> to vector<16x32xf32>
    %388 = arith.subf %369, %387 : vector<16x32xf32>
    %cst_158 = arith.constant 9.99999996E-13 : f32
    %389 = vector.broadcast %cst_158 : f32 to vector<16x1xf32>
    %390 = arith.addf %386, %389 : vector<16x1xf32>
    %391 = math.rsqrt %390 : vector<16x1xf32>
    %392 = vector.broadcast %391 : vector<16x1xf32> to vector<16x32xf32>
    %393 = arith.mulf %388, %392 : vector<16x32xf32>
    %394 = vector.broadcast %372 : vector<1x32xf32> to vector<16x32xf32>
    %395 = arith.mulf %393, %394 : vector<16x32xf32>
    %396 = vector.broadcast %375 : vector<1x32xf32> to vector<16x32xf32>
    %397 = arith.addf %395, %396 : vector<16x32xf32>
    %c0_159 = arith.constant 0 : index
    %398 = arith.index_cast %c1_i32 : i32 to index
    %c0_160 = arith.constant 0 : index
    %c0_161 = arith.constant 0 : index
    %399 = vector.load %arg13[%c0_159, %398, %c0_160, %c0_161] : memref<1x2x32x64xf32, #tpu.memory_space<vmem>>, vector<1x1x32x64xf32>
    %400 = vector.shape_cast %399 : vector<1x1x32x64xf32> to vector<32x64xf32>
    %cst_162 = arith.constant dense<0.000000e+00> : vector<16x64xf32>
    %401 = tpu.matmul %397, %400, %cst_162 {dimension_numbers = #tpu.dot_dimension_numbers<[1], [0], [0], [1], [0, 0, 1, 1], [], []>} : vector<16x32xf32>, vector<32x64xf32>, vector<16x64xf32> -> vector<16x64xf32>
    %c0_163 = arith.constant 0 : index
    %402 = arith.index_cast %c1_i32 : i32 to index
    %c0_164 = arith.constant 0 : index
    %c0_165 = arith.constant 0 : index
    %403 = vector.load %arg14[%c0_163, %402, %c0_164, %c0_165] : memref<1x2x1x64xf32, #tpu.memory_space<vmem>>, vector<1x1x1x64xf32>
    %404 = vector.shape_cast %403 : vector<1x1x1x64xf32> to vector<1x64xf32>
    %405 = vector.broadcast %404 : vector<1x64xf32> to vector<16x64xf32>
    %406 = arith.addf %401, %405 : vector<16x64xf32>
    %407 = arith.mulf %406, %406 : vector<16x64xf32>
    %408 = arith.mulf %406, %407 : vector<16x64xf32>
    %cst_166 = arith.constant 4.471500e-02 : f32
    %409 = vector.broadcast %cst_166 : f32 to vector<16x64xf32>
    %410 = arith.mulf %409, %408 : vector<16x64xf32>
    %411 = arith.addf %406, %410 : vector<16x64xf32>
    %cst_167 = arith.constant 0.797884583 : f32
    %412 = vector.broadcast %cst_167 : f32 to vector<16x64xf32>
    %413 = arith.mulf %412, %411 : vector<16x64xf32>
    %414 = math.tanh %413 : vector<16x64xf32>
    %cst_168 = arith.constant 1.000000e+00 : f32
    %415 = vector.broadcast %cst_168 : f32 to vector<16x64xf32>
    %416 = arith.addf %415, %414 : vector<16x64xf32>
    %cst_169 = arith.constant 5.000000e-01 : f32
    %417 = vector.broadcast %cst_169 : f32 to vector<16x64xf32>
    %418 = arith.mulf %417, %416 : vector<16x64xf32>
    %419 = arith.mulf %406, %418 : vector<16x64xf32>
    %c0_170 = arith.constant 0 : index
    %420 = arith.index_cast %c1_i32 : i32 to index
    %c0_171 = arith.constant 0 : index
    %c0_172 = arith.constant 0 : index
    %421 = vector.load %arg15[%c0_170, %420, %c0_171, %c0_172] : memref<1x2x64x32xf32, #tpu.memory_space<vmem>>, vector<1x1x64x32xf32>
    %422 = vector.shape_cast %421 : vector<1x1x64x32xf32> to vector<64x32xf32>
    %cst_173 = arith.constant dense<0.000000e+00> : vector<16x32xf32>
    %423 = tpu.matmul %419, %422, %cst_173 {dimension_numbers = #tpu.dot_dimension_numbers<[1], [0], [0], [1], [0, 0, 1, 1], [], []>} : vector<16x64xf32>, vector<64x32xf32>, vector<16x32xf32> -> vector<16x32xf32>
    %c0_174 = arith.constant 0 : index
    %424 = arith.index_cast %c1_i32 : i32 to index
    %c0_175 = arith.constant 0 : index
    %c0_176 = arith.constant 0 : index
    %425 = vector.load %arg16[%c0_174, %424, %c0_175, %c0_176] : memref<1x2x1x32xf32, #tpu.memory_space<vmem>>, vector<1x1x1x32xf32>
    %426 = vector.shape_cast %425 : vector<1x1x1x32xf32> to vector<1x32xf32>
    %427 = vector.broadcast %426 : vector<1x32xf32> to vector<16x32xf32>
    %428 = arith.addf %423, %427 : vector<16x32xf32>
    %429 = arith.addf %428, %397 : vector<16x32xf32>
    %c0_177 = arith.constant 0 : index
    %430 = arith.index_cast %c1_i32 : i32 to index
    %c0_178 = arith.constant 0 : index
    %c0_179 = arith.constant 0 : index
    %431 = vector.load %arg17[%c0_177, %430, %c0_178, %c0_179] : memref<1x2x1x32xf32, #tpu.memory_space<vmem>>, vector<1x1x1x32xf32>
    %432 = vector.shape_cast %431 : vector<1x1x1x32xf32> to vector<1x32xf32>
    %c0_180 = arith.constant 0 : index
    %433 = arith.index_cast %c1_i32 : i32 to index
    %c0_181 = arith.constant 0 : index
    %c0_182 = arith.constant 0 : index
    %434 = vector.load %arg18[%c0_180, %433, %c0_181, %c0_182] : memref<1x2x1x32xf32, #tpu.memory_space<vmem>>, vector<1x1x1x32xf32>
    %435 = vector.shape_cast %434 : vector<1x1x1x32xf32> to vector<1x32xf32>
    %cst_183 = arith.constant dense<0.000000e+00> : vector<16xf32>
    %436 = vector.multi_reduction <add>, %429, %cst_183 [1] : vector<16x32xf32> to vector<16xf32>
    %437 = vector.shape_cast %436 : vector<16xf32> to vector<16x1xf32>
    %cst_184 = arith.constant 3.200000e+01 : f32
    %438 = vector.broadcast %cst_184 : f32 to vector<16x1xf32>
    %439 = arith.divf %437, %438 : vector<16x1xf32>
    %440 = vector.broadcast %439 : vector<16x1xf32> to vector<16x32xf32>
    %441 = arith.subf %429, %440 : vector<16x32xf32>
    %442 = arith.mulf %441, %441 : vector<16x32xf32>
    %cst_185 = arith.constant dense<0.000000e+00> : vector<16xf32>
    %443 = vector.multi_reduction <add>, %442, %cst_185 [1] : vector<16x32xf32> to vector<16xf32>
    %444 = vector.shape_cast %443 : vector<16xf32> to vector<16x1xf32>
    %cst_186 = arith.constant 3.200000e+01 : f32
    %445 = vector.broadcast %cst_186 : f32 to vector<16x1xf32>
    %446 = arith.divf %444, %445 : vector<16x1xf32>
    %447 = vector.broadcast %439 : vector<16x1xf32> to vector<16x32xf32>
    %448 = arith.subf %429, %447 : vector<16x32xf32>
    %cst_187 = arith.constant 9.99999996E-13 : f32
    %449 = vector.broadcast %cst_187 : f32 to vector<16x1xf32>
    %450 = arith.addf %446, %449 : vector<16x1xf32>
    %451 = math.rsqrt %450 : vector<16x1xf32>
    %452 = vector.broadcast %451 : vector<16x1xf32> to vector<16x32xf32>
    %453 = arith.mulf %448, %452 : vector<16x32xf32>
    %454 = vector.broadcast %432 : vector<1x32xf32> to vector<16x32xf32>
    %455 = arith.mulf %453, %454 : vector<16x32xf32>
    %456 = vector.broadcast %435 : vector<1x32xf32> to vector<16x32xf32>
    %457 = arith.addf %455, %456 : vector<16x32xf32>
    %c0_188 = arith.constant 0 : index
    %c0_189 = arith.constant 0 : index
    %458 = vector.load %arg24[%c0_188, %c0_189] : memref<16x32xf32, #tpu.memory_space<vmem>>, vector<16x32xf32>
    tpu.vector_store %arg24[%c0_188, %c0_189], %457 {strides = array<i32>} : memref<16x32xf32, #tpu.memory_space<vmem>>, vector<16x32xf32>,
    %c2_i32 = arith.constant 2 : i32
    %c0_190 = arith.constant 0 : index
    %c0_191 = arith.constant 0 : index
    %459 = vector.load %arg24[%c0_190, %c0_191] : memref<16x32xf32, #tpu.memory_space<vmem>>, vector<16x32xf32>
    %460 = vector.shape_cast %459 : vector<16x32xf32> to vector<2x8x32xf32>
    %461 = vector.extract_strided_slice %460 {offsets = [0, 0, 0], sizes = [2, 1, 32], strides = [1, 1, 1]} : vector<2x8x32xf32> to vector<2x1x32xf32>
    %462 = vector.shape_cast %461 : vector<2x1x32xf32> to vector<2x32xf32>
    %c0_192 = arith.constant 0 : index
    %c0_193 = arith.constant 0 : index
    %c0_194 = arith.constant 0 : index
    %463 = vector.load %arg19[%c0_192, %c0_193, %c0_194] : memref<1x32x32xf32, #tpu.memory_space<vmem>>, vector<1x32x32xf32>
    %464 = vector.shape_cast %463 : vector<1x32x32xf32> to vector<32x32xf32>
    %cst_195 = arith.constant dense<0.000000e+00> : vector<2x32xf32>
    %465 = tpu.matmul %462, %464, %cst_195 {dimension_numbers = #tpu.dot_dimension_numbers<[1], [0], [0], [1], [0, 0, 1, 1], [], []>} : vector<2x32xf32>, vector<32x32xf32>, vector<2x32xf32> -> vector<2x32xf32>
    %c0_196 = arith.constant 0 : index
    %c0_197 = arith.constant 0 : index
    %c0_198 = arith.constant 0 : index
    %466 = vector.load %arg20[%c0_196, %c0_197, %c0_198] : memref<1x1x32xf32, #tpu.memory_space<vmem>>, vector<1x1x32xf32>
    %467 = vector.shape_cast %466 : vector<1x1x32xf32> to vector<1x32xf32>
    %468 = vector.broadcast %467 : vector<1x32xf32> to vector<2x32xf32>
    %469 = arith.addf %465, %468 : vector<2x32xf32>
    %470 = math.tanh %469 : vector<2x32xf32>
    %c0_199 = arith.constant 0 : index
    %c0_200 = arith.constant 0 : index
    %c0_201 = arith.constant 0 : index
    %471 = vector.load %arg21[%c0_199, %c0_200, %c0_201] : memref<1x32x32xf32, #tpu.memory_space<vmem>>, vector<1x32x32xf32>
    %472 = vector.shape_cast %471 : vector<1x32x32xf32> to vector<32x32xf32>
    %cst_202 = arith.constant dense<0.000000e+00> : vector<2x32xf32>
    %473 = tpu.matmul %470, %472, %cst_202 {dimension_numbers = #tpu.dot_dimension_numbers<[1], [0], [0], [1], [0, 0, 1, 1], [], []>} : vector<2x32xf32>, vector<32x32xf32>, vector<2x32xf32> -> vector<2x32xf32>
    %c0_203 = arith.constant 0 : index
    %c0_204 = arith.constant 0 : index
    %c0_205 = arith.constant 0 : index
    %474 = vector.load %arg22[%c0_203, %c0_204, %c0_205] : memref<1x1x32xf32, #tpu.memory_space<vmem>>, vector<1x1x32xf32>
    %475 = vector.shape_cast %474 : vector<1x1x32xf32> to vector<1x32xf32>
    %476 = vector.broadcast %475 : vector<1x32xf32> to vector<2x32xf32>
    %477 = arith.addf %473, %476 : vector<2x32xf32>
    %c0_206 = arith.constant 0 : index
    %c0_207 = arith.constant 0 : index
    %c0_208 = arith.constant 0 : index
    %478 = vector.load %arg23[%c0_206, %c0_207, %c0_208] : memref<1x2x32xf32, #tpu.memory_space<vmem>>, vector<1x2x32xf32>
    %479 = vector.shape_cast %478 : vector<1x2x32xf32> to vector<2x32xf32>
    %480 = vector.shape_cast %477 : vector<2x32xf32> to vector<1x2x32xf32>
    tpu.vector_store %arg23[%c0_206, %c0_207, %c0_208], %480 {strides = array<i32>} : memref<1x2x32xf32, #tpu.memory_space<vmem>>, vector<1x2x32xf32>,
    return
  }
  func.func @transform_0(%arg0: i32) -> (i32, i32, i32) {
    %c0_i32 = arith.constant 0 : i32
    %c0_i32_0 = arith.constant 0 : i32
    %c0_i32_1 = arith.constant 0 : i32
    return %arg0, %c0_i32, %c0_i32_0 : i32, i32, i32
  }
  func.func @transform_1(%arg0: i32) -> (i32, i32, i32) {
    %c0_i32 = arith.constant 0 : i32
    %c0_i32_0 = arith.constant 0 : i32
    %c0_i32_1 = arith.constant 0 : i32
    return %arg0, %c0_i32, %c0_i32_0 : i32, i32, i32
  }
  func.func @transform_2(%arg0: i32) -> (i32, i32, i32) {
    %c0_i32 = arith.constant 0 : i32
    %c0_i32_0 = arith.constant 0 : i32
    %c0_i32_1 = arith.constant 0 : i32
    return %arg0, %c0_i32, %c0_i32_0 : i32, i32, i32
  }
  func.func @transform_3(%arg0: i32) -> (i32, i32, i32) {
    %c0_i32 = arith.constant 0 : i32
    %c0_i32_0 = arith.constant 0 : i32
    %c0_i32_1 = arith.constant 0 : i32
    return %arg0, %c0_i32, %c0_i32_0 : i32, i32, i32
  }
  func.func @transform_4(%arg0: i32) -> (i32, i32, i32) {
    %c0_i32 = arith.constant 0 : i32
    %c0_i32_0 = arith.constant 0 : i32
    %c0_i32_1 = arith.constant 0 : i32
    return %arg0, %c0_i32, %c0_i32_0 : i32, i32, i32
  }
  func.func @transform_5(%arg0: i32) -> (i32, i32, i32) {
    %c0_i32 = arith.constant 0 : i32
    %c0_i32_0 = arith.constant 0 : i32
    %c0_i32_1 = arith.constant 0 : i32
    return %arg0, %c0_i32, %c0_i32_0 : i32, i32, i32
  }
  func.func @transform_6(%arg0: i32) -> (i32, i32, i32, i32) {
    %c0_i32 = arith.constant 0 : i32
    %c0_i32_0 = arith.constant 0 : i32
    %c0_i32_1 = arith.constant 0 : i32
    %c0_i32_2 = arith.constant 0 : i32
    return %arg0, %c0_i32, %c0_i32_0, %c0_i32_1 : i32, i32, i32, i32
  }
  func.func @transform_7(%arg0: i32) -> (i32, i32, i32, i32) {
    %c0_i32 = arith.constant 0 : i32
    %c0_i32_0 = arith.constant 0 : i32
    %c0_i32_1 = arith.constant 0 : i32
    %c0_i32_2 = arith.constant 0 : i32
    return %arg0, %c0_i32, %c0_i32_0, %c0_i32_1 : i32, i32, i32, i32
  }
  func.func @transform_8(%arg0: i32) -> (i32, i32, i32, i32) {
    %c0_i32 = arith.constant 0 : i32
    %c0_i32_0 = arith.constant 0 : i32
    %c0_i32_1 = arith.constant 0 : i32
    %c0_i32_2 = arith.constant 0 : i32
    return %arg0, %c0_i32, %c0_i32_0, %c0_i32_1 : i32, i32, i32, i32
  }
  func.func @transform_9(%arg0: i32) -> (i32, i32, i32, i32) {
    %c0_i32 = arith.constant 0 : i32
    %c0_i32_0 = arith.constant 0 : i32
    %c0_i32_1 = arith.constant 0 : i32
    %c0_i32_2 = arith.constant 0 : i32
    return %arg0, %c0_i32, %c0_i32_0, %c0_i32_1 : i32, i32, i32, i32
  }
  func.func @transform_10(%arg0: i32) -> (i32, i32, i32, i32) {
    %c0_i32 = arith.constant 0 : i32
    %c0_i32_0 = arith.constant 0 : i32
    %c0_i32_1 = arith.constant 0 : i32
    %c0_i32_2 = arith.constant 0 : i32
    return %arg0, %c0_i32, %c0_i32_0, %c0_i32_1 : i32, i32, i32, i32
  }
  func.func @transform_11(%arg0: i32) -> (i32, i32, i32, i32) {
    %c0_i32 = arith.constant 0 : i32
    %c0_i32_0 = arith.constant 0 : i32
    %c0_i32_1 = arith.constant 0 : i32
    %c0_i32_2 = arith.constant 0 : i32
    return %arg0, %c0_i32, %c0_i32_0, %c0_i32_1 : i32, i32, i32, i32
  }
  func.func @transform_12(%arg0: i32) -> (i32, i32, i32, i32) {
    %c0_i32 = arith.constant 0 : i32
    %c0_i32_0 = arith.constant 0 : i32
    %c0_i32_1 = arith.constant 0 : i32
    %c0_i32_2 = arith.constant 0 : i32
    return %arg0, %c0_i32, %c0_i32_0, %c0_i32_1 : i32, i32, i32, i32
  }
  func.func @transform_13(%arg0: i32) -> (i32, i32, i32, i32) {
    %c0_i32 = arith.constant 0 : i32
    %c0_i32_0 = arith.constant 0 : i32
    %c0_i32_1 = arith.constant 0 : i32
    %c0_i32_2 = arith.constant 0 : i32
    return %arg0, %c0_i32, %c0_i32_0, %c0_i32_1 : i32, i32, i32, i32
  }
  func.func @transform_14(%arg0: i32) -> (i32, i32, i32, i32) {
    %c0_i32 = arith.constant 0 : i32
    %c0_i32_0 = arith.constant 0 : i32
    %c0_i32_1 = arith.constant 0 : i32
    %c0_i32_2 = arith.constant 0 : i32
    return %arg0, %c0_i32, %c0_i32_0, %c0_i32_1 : i32, i32, i32, i32
  }
  func.func @transform_15(%arg0: i32) -> (i32, i32, i32, i32) {
    %c0_i32 = arith.constant 0 : i32
    %c0_i32_0 = arith.constant 0 : i32
    %c0_i32_1 = arith.constant 0 : i32
    %c0_i32_2 = arith.constant 0 : i32
    return %arg0, %c0_i32, %c0_i32_0, %c0_i32_1 : i32, i32, i32, i32
  }
  func.func @transform_16(%arg0: i32) -> (i32, i32, i32, i32) {
    %c0_i32 = arith.constant 0 : i32
    %c0_i32_0 = arith.constant 0 : i32
    %c0_i32_1 = arith.constant 0 : i32
    %c0_i32_2 = arith.constant 0 : i32
    return %arg0, %c0_i32, %c0_i32_0, %c0_i32_1 : i32, i32, i32, i32
  }
  func.func @transform_17(%arg0: i32) -> (i32, i32, i32, i32) {
    %c0_i32 = arith.constant 0 : i32
    %c0_i32_0 = arith.constant 0 : i32
    %c0_i32_1 = arith.constant 0 : i32
    %c0_i32_2 = arith.constant 0 : i32
    return %arg0, %c0_i32, %c0_i32_0, %c0_i32_1 : i32, i32, i32, i32
  }
  func.func @transform_18(%arg0: i32) -> (i32, i32, i32) {
    %c0_i32 = arith.constant 0 : i32
    %c0_i32_0 = arith.constant 0 : i32
    %c0_i32_1 = arith.constant 0 : i32
    return %arg0, %c0_i32, %c0_i32_0 : i32, i32, i32
  }
  func.func @transform_19(%arg0: i32) -> (i32, i32, i32) {
    %c0_i32 = arith.constant 0 : i32
    %c0_i32_0 = arith.constant 0 : i32
    %c0_i32_1 = arith.constant 0 : i32
    return %arg0, %c0_i32, %c0_i32_0 : i32, i32, i32
  }
  func.func @transform_20(%arg0: i32) -> (i32, i32, i32) {
    %c0_i32 = arith.constant 0 : i32
    %c0_i32_0 = arith.constant 0 : i32
    %c0_i32_1 = arith.constant 0 : i32
    return %arg0, %c0_i32, %c0_i32_0 : i32, i32, i32
  }
  func.func @transform_21(%arg0: i32) -> (i32, i32, i32) {
    %c0_i32 = arith.constant 0 : i32
    %c0_i32_0 = arith.constant 0 : i32
    %c0_i32_1 = arith.constant 0 : i32
    return %arg0, %c0_i32, %c0_i32_0 : i32, i32, i32
  }
  func.func @transform_22(%arg0: i32) -> (i32, i32, i32) {
    %c0_i32 = arith.constant 0 : i32
    %c0_i32_0 = arith.constant 0 : i32
    %c0_i32_1 = arith.constant 0 : i32
    return %arg0, %c0_i32, %c0_i32_0 : i32, i32, i32
  }
}

</mosaic_0001>

<bundles_post_ra>
// kernel: biencoder_ranker_forward.3
= control target key start
LH: loop header
LB: loop body
LE: loop exit
PB: predicated region body
PF: predicated region fallthrough
CT: control target
= control target key end

     0   :  { %8 = vsyncpa [#allocation3], 0  ;;  %vm15_vm0 = vcmask 261120   ;;  %v225_v1 = vmov 0.0   ;;  %vm226_vm1 = vmmov 0   ;;  %s256_s0 = inlined_call_operand.vmem [shape: f32[2,2,32], index: 0, kind: input, shape index: {}]   ;;  %s257_s1 = inlined_call_operand.hbm [shape: f32[2,2], index: 1, kind: output, shape index: {0}]   ;;  %s258_s2 = inlined_call_operand.hbm [shape: f32[1,1], index: 2, kind: output, shape index: {1}]  }
   0x1   :  { %v161_v0 = vld [vmem:[%s256_s0 + $0x2] sm:$0x3]  ;;  %166 = vmatprep.subr.mxu0 %v225_v1  ;;  %168 = vmatprep.mubr.msk.f32.mxu0 %vm226_vm1, %v225_v1 }
   0x2   :  { %9 = vsyncpa [#allocation5], 0  ;;  %167 = vmatpush3.xpose.msk.msra.mxu0 %vm15_vm0, %v161_v0  ;;  %v12_v2 = vld [vmem:[%s256_s0] sm:$0x3]  ;;  %v106_v3 = vlaneseq  ;;  %vm92_vm2 = vcmask 9216   ;;  %vm116_vm4 = vcmask 1024  }
   0x3   :  { %s227_s0 = smov [#allocation2]  }
   0x4   :  { %v107_v4 = vshrl.u32 %v106_v3, 7  ;;  %v109_v5 = vand.u32 127, %v106_v3  ;;  %s139_s13 = sshll.u32 %s227_s0, 4  ;;  %s140_s13 = int_to_ptr.vmem [resolvable:$true] %s139_s13 }
   0x5   :  { %169 = vmatmul.mubr.msk.f32.vlgmr.msra.gmra.mxu0 %vm15_vm0, %v12_v2  ;;  %s181_s14 = scalar_lea.vmem %s140_s13, 32  ;;  %p186_p1 = scmp.lt.s32.totalorder %s140_s13, %s140_s13 }
   0x6   :  { %vm110_vm3 = vcmp.eq.s32.totalorder %v107_v4, %v109_v5  ;;  %p182_p0 = scmp.ne.s32.totalorder %s140_s13, %s181_s14  ;;  %p187_p2 = scmp.lt.s32.totalorder %s181_s14, %s181_s14 }
   0x8   :  { %p188_p3 = por %p187_p2, %p186_p1 }
   0xa   :  { %p189_p4 = pnand %p188_p3, %p182_p0 }
  0xc5   :  { %v88_v6 = vpop.f32.mrf.mxu0 }
  0xc6   :  { %v94_v7 = vsel %vm92_vm2, %v88_v6, -inf  ;;  %93 = vst.msk [vmem:[#allocation2] sm:$0x3] %vm92_vm2, %v88_v6  ;;  %v111_v8 = vsel %vm110_vm3, %v88_v6, 0.0 }
  0xc7   :  { %95 = vmax.xlane.f32.xlu0 %v94_v7  ;;  %v170_v9 = vpop.f32.mrf.mxu0  ;;  %v112_v10 = vsel %vm92_vm2, %v111_v8, 0.0 }
  0xc8   :  { %113 = vadd.xlane.f32.xlu1 %v112_v10 }
 0x150   :  { %v96_v11 = vpop.xlane.xlu0 %95 }
 0x151   :  { %v97_v12 = vsub.f32 %v88_v6, %v96_v11  ;;  %v114_v20 = vpop.xlane.xlu1 %113 }
 0x153   :  { %v98_v13 = vmul.f32 1.442695, %v97_v12 }
 0x155   :  { %177 = vpow2.f32 %v98_v13 }
 0x162   :  { %v178_v14 = vpop.eup %177 }
 0x163   :  { %v100_v15 = vsel %vm92_vm2, %v178_v14, 0.0 }
 0x164   :  { %101 = vadd.xlane.f32.xlu0 %v100_v15 }
 0x1ed   :  { %v102_v16 = vpop.xlane.xlu0 %101 }
 0x1ee   :  { %179 = vlog2.f32 %v102_v16 }
 0x1fb   :  { %v180_v17 = vpop.eup %179 }
 0x1fc   :  { %v104_v18 = vmul.f32 0.6931472, %v180_v17 }
 0x1fe   :  { %v105_v19 = vadd.f32 %v104_v18, %v96_v11 }
 0x200   :  { %v115_v21 = vsub.f32 %v105_v19, %v114_v20 }
 0x202   :  { %v117_v22 = vsel %vm116_vm4, %v115_v21, 0.0 }
 0x203   :  { %118 = vadd.xlane.f32.xlu1 %v117_v22 }
 0x204   :  { %192 = shalt.err (!%p189_p4)
}
 0x205   :  { %142 = dma.vmem_to_hbm [thread:$0]  %s140_s13, 32, %s257_s1, [#allocation3]   ;;  %vm131_vm5 = vcmask 0  }
 0x206   :  { %s228_s17 = smov [#allocation4]  }
 0x207   :  { %s149_s18 = sshll.u32 %s228_s17, 4  ;;  %s150_s18 = int_to_ptr.vmem [resolvable:$true] %s149_s18 }
 0x208   :  { %s201_s21 = scalar_lea.vmem %s150_s18, 16  ;;  %s205_s22 = scalar_lea.vmem %s150_s18, 32 }
 0x209   :  { %p202_p5 = scmp.ne.s32.totalorder %s150_s18, %s201_s21  ;;  %p206_p6 = scmp.lt.s32.totalorder %s150_s18, %s150_s18 }
 0x20a   :  { %p207_p7 = scmp.lt.s32.totalorder %s205_s22, %s201_s21 }
 0x20c   :  { %p208_p8 = por %p207_p7, %p206_p6 }
 0x20e   :  { %p209_p9 = pnand %p208_p8, %p202_p5 }
 0x28c   :  { %v119_v23 = vpop.xlane.xlu1 %118 }
 0x28d   :  { %v120_v24 = vrot.slane %v119_v23, 4 }
 0x28f   :  { %v121_v25 = vadd.f32 %v120_v24, %v119_v23 }
 0x291   :  { %v122_v26 = vrot.slane %v121_v25, 2 }
 0x293   :  { %v123_v27 = vadd.f32 %v122_v26, %v121_v25 }
 0x295   :  { %v124_v28 = vrot.slane %v123_v27, 1 }
 0x297   :  { %v125_v29 = vadd.f32 %v124_v28, %v123_v27 }
 0x299   :  { %171 = vpush %v125_v29 }
 0x2ca   :  { %s172_s19 = spop %171 }
 0x2cb   :  { %s129_s20 = smul.f32 0.5, %s172_s19 }
 0x2cd   :  { %v130_v30 = vstv %s129_s20 }
 0x2ce   :  { %132 = vst.msk [vmem:[#allocation4] sm:$0x1] %vm131_vm5, %v130_v30 }
 0x2cf   :  { %212 = shalt.err (!%p209_p9)
}
 0x2d0   :  { %152 = dma.vmem_to_hbm [thread:$0]  %s150_s18, 16, %s258_s2, [#allocation5]  }
 0x2d1   :  { %221 = dma.done.wait [#allocation3], 32  }
 0x2d2   :  { %222 = vsyncadd [#allocation3], 4294967264 }
 0x2d3   :  { %223 = dma.done.wait [#allocation5], 16  }
 0x2d4   :  { %224 = vsyncadd [#allocation5], 4294967280 }
 0x2d5   :  { %159 = vsyncpa [#allocation3], 1 }
 0x2d6   :  { %160 = vsyncpa [#allocation5], 1 }

// kernel: biencoder_ranker_forward.2
= control target key start
LH: loop header
LB: loop body
LE: loop exit
PB: predicated region body
PF: predicated region fallthrough
CT: control target
= control target key end

     0   :  { %s6924_s0 = inlined_call_operand.vmem [shape: s32[2,16,1], index: 0, kind: input, shape index: {}]   ;;  %s6925_s1 = inlined_call_operand.vmem [shape: f32[2,2,8], index: 1, kind: input, shape index: {}]   ;;  %s6926_s2 = inlined_call_operand.vmem [shape: f32[2,64,32], index: 2, kind: input, shape index: {}]   ;;  %s6927_s3 = inlined_call_operand.vmem [shape: f32[2,16,32], index: 3, kind: input, shape index: {}]   ;;  %s6928_s4 = inlined_call_operand.vmem [shape: f32[2,1,32], index: 4, kind: input, shape index: {}]   ;;  %s6929_s5 = inlined_call_operand.vmem [shape: f32[2,1,32], index: 5, kind: input, shape index: {}]   ;;  %s6930_s6 = inlined_call_operand.vmem [shape: f32[2,2,32,96], index: 6, kind: input, shape index: {}]   ;;  %s6931_s7 = inlined_call_operand.vmem [shape: f32[2,2,1,96], index: 7, kind: input, shape index: {}]   ;;  %s6932_s8 = inlined_call_operand.vmem [shape: f32[2,2,32,32], index: 8, kind: input, shape index: {}]   ;;  %s6933_s9 = inlined_call_operand.vmem [shape: f32[2,2,1,32], index: 9, kind: input, shape index: {}]   ;;  %s6934_s10 = inlined_call_operand.vmem [shape: f32[2,2,1,32], index: 10, kind: input, shape index: {}]   ;;  %s6935_s11 = inlined_call_operand.vmem [shape: f32[2,2,1,32], index: 11, kind: input, shape index: {}]   ;;  %s6936_s12 = inlined_call_operand.vmem [shape: f32[2,2,32,64], index: 12, kind: input, shape index: {}]   ;;  %s6937_s13 = inlined_call_operand.vmem [shape: f32[2,2,1,64], index: 13, kind: input, shape index: {}]   ;;  %s6938_s14 = inlined_call_operand.vmem [shape: f32[2,2,64,32], index: 14, kind: input, shape index: {}]   ;;  %s6939_s15 = inlined_call_operand.vmem [shape: f32[2,2,1,32], index: 15, kind: input, shape index: {}]   ;;  %s6940_s16 = inlined_call_operand.vmem [shape: f32[2,2,1,32], index: 16, kind: input, shape index: {}]   ;;  %s6941_s17 = inlined_call_operand.vmem [shape: f32[2,2,1,32], index: 17, kind: input, shape index: {}]   ;;  %s6942_s18 = inlined_call_operand.vmem [shape: f32[2,32,32], index: 18, kind: input, shape index: {}]   ;;  %s6943_s19 = inlined_call_operand.vmem [shape: f32[2,1,32], index: 19, kind: input, shape index: {}]   ;;  %s6944_s20 = inlined_call_operand.vmem [shape: f32[2,32,32], index: 20, kind: input, shape index: {}]   ;;  %s6945_s21 = inlined_call_operand.vmem [shape: f32[2,1,32], index: 21, kind: input, shape index: {}]   ;;  %s6946_s22 = inlined_call_operand.vmem [shape: f32[2,2,32], index: 22, kind: output, shape index: {}]  }
   0x1   :  { %6975 = sst [smem:[#allocation3_spill]] %s6924_s0 }
   0x2   :  { %6976 = sst [smem:[#allocation4_spill]] %s6925_s1 }
   0x3   :  { %6977 = sst [smem:[#allocation5_spill]] %s6926_s2 }
   0x4   :  { %6978 = sst [smem:[#allocation6_spill]] %s6927_s3  ;;  %s6297_s3 = smov 0  }
   0x5   :  { %6979 = sst [smem:[#allocation7_spill]] %s6928_s4 }
   0x6   :  { %6980 = sst [smem:[#allocation8_spill]] %s6929_s5 }
   0x7   :  { %6981 = sst [smem:[#allocation9_spill]] %s6930_s6 }
   0x8   :  { %6982 = sst [smem:[#allocation10_spill]] %s6931_s7 }
   0x9   :  { %6983 = sst [smem:[#allocation11_spill]] %s6932_s8 }
   0xa   :  { %6984 = sst [smem:[#allocation12_spill]] %s6933_s9 }
   0xb LB: > { %s5428_s28 = sadd.s32 4294967295, %s6162_s3   ;;  %p5432_p0 = scmp.ge.s32.totalorder %s6162_s3, 1  ;;  %s6162_s3 = sphi %s6297_s3, %s32_s3  }
   0xc   : > { %p805_p1 = scmp.lt.s32.totalorder %s6162_s3, 3 }
   0xe   : > { %p806_p2 = pnand %p5432_p0, %p805_p1 }
   0xf   : > { %p954_p3 = scmp.lt.s32.totalorder (!%p806_p2), %s5428_s28, 1  ;;  %s6985_s23 = sld [smem:[#allocation3_spill]] (!%p806_p2) }
  0x10   : > { %809 = sbr.rel (%p806_p2) target bundleno = 8933 (0x22e5), region = 108  ;;  %s6986_s6 = sld [smem:[#allocation5_spill]] (!%p806_p2) }
  0x11   : > { %s6987_s27 = sld [smem:[#allocation6_spill]] (!%p806_p2)  ;;  %s6973_s24 = smov (!%p806_p2), 96  }
  0x12   : > { %s6991_s7 = sld [smem:[#allocation10_spill]] (!%p806_p2)  ;;  %s6967_s0 = smov (!%p806_p2), 120  }
  0x13   : > { %s6992_s26 = sld [smem:[#allocation4_spill]] (!%p806_p2) }
  0x14   : > { %s6993_s8 = sld [smem:[#allocation11_spill]] (!%p806_p2) }
  0x15   : > { %v6164_v0 = vmov 0   ;;  %s7010_s28 = smov (!%p954_p3, %s5428_s28), 1  ;;  %v6165_v11 = vmov 0.0   ;;  %v1053_v12 = vlaneseq  ;;  %vm1077_vm0 = vcmask 523264   ;;  %s6994_s9 = sld [smem:[#allocation12_spill]] }
  0x16   : > { %6061 = vset.pattern.permute.xlu0 %v6164_v0  ;;  %s5581_s29 = sshll.u32 %s7010_s28, 4  ;;  %s6309_s30 = sshll.u32 %s7010_s28, 6  ;;  %vm1161_vm3 = vcmask 261120   ;;  %vm6166_vm4 = vmmov 0   ;;  %vm1330_vm5 = vcmask 64512   ;;  %vm2701_vm6 = vcmask 195584  }
  0x17   : > { %s958_s1 = scalar_lea.vmem %s6985_s23, %s5581_s29  ;;  %s967_s25 = scalar_lea.vmem %s6986_s6, %s6309_s30  ;;  %v1054_v13 = vand.u32 127, %v1053_v12  ;;  %vm2698_vm7 = vcmask 130048   ;;  %vm4974_vm8 = vcmask 1041409   ;;  %vm5133_vm9 = vcmask 254976  }
  0x18   : > { %v1051_v1 = vld [vmem:[%s958_s1] sm:$0xff]  ;;  %v1074_v2 = vld [vmem:[%s967_s25 + $0x38] sm:$0xff]  ;;  %v1073_v3 = vld [vmem:[%s967_s25 + $0x30] sm:$0xff]  ;;  %s972_s4 = scalar_lea.vmem %s6987_s27, %s5581_s29  ;;  %s6988_s23 = sld [smem:[#allocation9_spill]] }
  0x19   : > { %1056 = vperm.xlu0 %6061, %v1051_v1   ;;  %5730 = vmatprep.subr.mxu0 %v1074_v2  ;;  %v1052_v4 = vld [vmem:[%s958_s1 + $0x8] sm:$0xff]  ;;  %v1071_v6 = vld [vmem:[%s967_s25 + $0x20] sm:$0xff]  ;;  %v1070_v7 = vld [vmem:[%s967_s25 + $0x18] sm:$0xff]  ;;  %s6989_s6 = sld [smem:[#allocation7_spill]]  ;;  %s6369_s29 = sshll.u32 %s7010_s28, 1 }
  0x1a   : > { %5731 = vmatpush3.msra.mxu0 %v1074_v2  ;;  %v1072_v5 = vld [vmem:[%s967_s25 + $0x28] sm:$0xff]  ;;  %v1069_v8 = vld [vmem:[%s967_s25 + $0x10] sm:$0xff]  ;;  %v1067_v10 = vld [vmem:[%s967_s25] sm:$0xff]  ;;  %s6990_s27 = sld [smem:[#allocation8_spill]]  ;;  %s6375_s5 = scalar_lea.vmem %s6991_s7, %s6369_s29  ;;  %v6168_v1 = vmov 1966171168  }
  0x1b   : > { %5732 = vmatprep.subr.mxu0 %v1073_v3  ;;  %v1068_v9 = vld [vmem:[%s967_s25 + $0x8] sm:$0xff]  ;;  %v1075_v19 = vld [vmem:[%s972_s4] sm:$0xff]  ;;  %s962_s2 = scalar_lea.vmem %s6992_s26, %s6369_s29  ;;  %v1212_v2 = vunpack.c.l.s4 %v6168_v1  ;;  %s6947_s26 = smov 48  }
  0x1c   : > { %5733 = vmatpush3.msra.mxu0 %v1073_v3  ;;  %v1076_v20 = vld [vmem:[%s972_s4 + $0x8] sm:$0xff]  ;;  %v5467_v59 = vld [vmem:[%s6375_s5] ss:$0 sm:$0xff]  ;;  %s6656_s7 = scalar_lea.vmem %s6940_s16, %s6369_s29 }
  0x1d   : > { %1059 = vperm.xlu0 %6061, %v1052_v4   ;;  %5734 = vmatprep.subr.mxu0 %v1072_v5  ;;  %v1207_v3 = vld [vmem:[%s962_s2] sm:$0x3]  ;;  %s6951_s2 = smov 72  }
  0x1e   : > { %5735 = vmatpush3.msra.mxu0 %v1072_v5  ;;  %s6339_s1 = scalar_lea.vmem %s6988_s23, %s6309_s30  ;;  %v1208_v4 = vsub.f32 1.0, %v1207_v3  ;;  %v1213_v5 = vunpack.c.0.s8 %v1212_v2  ;;  %s6965_s23 = smov 56  }
  0x1f   : > { %5736 = vmatprep.subr.mxu0 %v1071_v6  ;;  %v1238_v36 = vld [vmem:[%s6339_s1 + $0x18] sm:$0xff]  ;;  %v1237_v37 = vld [vmem:[%s6339_s1 + $0x10] sm:$0xff]  ;;  %v1236_v38 = vld [vmem:[%s6339_s1 + $0x8] sm:$0xff]  ;;  %s975_s25 = scalar_lea.vmem %s6989_s6, %s7010_s28  ;;  %s6963_s6 = smov 80  }
  0x20   : > { %5737 = vmatpush3.msra.mxu0 %v1071_v6  ;;  %5749 = vmatprep.subr.mxu1 %v1238_v36  ;;  %v1235_v39 = vld [vmem:[%s6339_s1] sm:$0xff]  ;;  %s978_s4 = scalar_lea.vmem %s6990_s27, %s7010_s28  ;;  %v1215_v6 = vshrl.u32 %v1053_v12, 7  ;;  %s6971_s27 = smov 64  }
  0x21   : > { %5738 = vmatprep.subr.mxu0 %v1070_v7  ;;  %5750 = vmatpush3.msra.mxu1 %v1238_v36  ;;  %v5465_v47 = vld [vmem:[%s975_s25] ss:$0 sm:$0xff]  ;;  %s6953_s25 = smov 112  }
  0x22   : > { %5739 = vmatpush3.msra.mxu0 %v1070_v7  ;;  %5751 = vmatprep.subr.mxu1 %v1237_v37  ;;  %v5466_v49 = vld [vmem:[%s978_s4] ss:$0 sm:$0xff]  ;;  %v1209_v7 = vmul.f32 -10000.0, %v1208_v4  ;;  %s6969_s4 = smov 88  }
  0x23   : > { %5740 = vmatprep.subr.mxu0 %v1069_v8  ;;  %5752 = vmatpush3.msra.mxu1 %v1237_v37 }
  0x24   : > { %5741 = vmatpush3.msra.mxu0 %v1069_v8  ;;  %5753 = vmatprep.subr.mxu1 %v1236_v38  ;;  %v1216_v8 = vsub.s32 %v1213_v5, %v1215_v6 }
  0x25   : > { %5742 = vmatprep.subr.mxu0 %v1068_v9  ;;  %5754 = vmatpush3.msra.mxu1 %v1236_v38 }
  0x26   : > { %5743 = vmatpush3.msra.mxu0 %v1068_v9  ;;  %5755 = vmatprep.subr.mxu1 %v1235_v39  ;;  %v1217_v9 = vrot.slane %v1209_v7, %v1216_v8 }
  0x27   : > { %5744 = vmatprep.subr.mxu0 %v1067_v10  ;;  %5756 = vmatpush3.msra.mxu1 %v1235_v39 }
  0x28   : > { %5745 = vmatpush3.msra.mxu0 %v1067_v10  ;;  %5760 = vmatprep.subr.mxu1 %v6165_v11  ;;  %v1218_v10 = vcombine.high %v1217_v9, %v1217_v9 }
  0x29   : > { %5770 = vmatprep.subr.mxu0 %v6165_v11 }
  0x94   : > { %v1057_v14 = vpop.permute.xlu0 %1056 }
  0x95   : > { %vm1061_vm1 = vcmp.eq.s32.totalorder %v1054_v13, %v1057_v14  ;;  %v1486_v14 = vsub.s32 0, %v1215_v6 }
  0x96   : > { %v5461_v15 = vsel %vm1061_vm1, 1.0, %v6165_v11 }
  0x97   : > { %5746 = vmatprep.mubr.msk.f32.mxu0 %vm1077_vm0, %v5461_v15  ;;  %v1232_v15 = vrot.slane %v1218_v10, %v1216_v8 }
  0x98   : > { %v1060_v16 = vpop.permute.xlu0 %1059 }
  0x99   : > { %vm1062_vm2 = vcmp.eq.s32.totalorder %v1054_v13, %v1060_v16  ;;  %v1225_v13 = vrot.slane %v1217_v9, %v1216_v8 }
  0x9a   : > { %v5462_v17 = vsel %vm1062_vm2, 1.0, %v6165_v11 }
  0x9b   : > { %5747 = vmatmul.mubr.msk.f32.vlgmr.msra.gmra.mxu0 %vm1077_vm0, %v5462_v17  ;;  %v6403_v16 = vrot.slane %v1225_v13, %v1486_v14 }
  0x9c   : > { %5772 = vmatprep.mubr.msk.f32.mxu0 %vm6166_vm4, %v6165_v11 }
 0x15b   : > { %v5748_v18 = vpop.f32.mrf.mxu0 }
 0x15c   : > { %v1156_v23 = vadd.f32 %v5748_v18, %v1076_v20  ;;  %v6405_v20 = vrot.slane %v1232_v15, %v1486_v14 }
 0x15d   : > { %v1150_v21 = vpop.f32.mrf.mxu0 }
 0x15e   : > { %v1151_v22 = vadd.f32 %v1150_v21, %v1075_v19  ;;  %v1165_v25 = vsel %vm1161_vm3, %v1156_v23, 0.0 }
 0x160   : > { %v1162_v24 = vsel %vm1161_vm3, %v1151_v22, 0.0 }
 0x161   : > { %1163 = vadd.xlane.f32.xlu1 %v1162_v24 }
 0x165   : > { %1166 = vadd.xlane.f32.xlu1 %v1165_v25 }
 0x1ea   : > { %v1164_v26 = vpop.xlane.xlu1 %1163 }
 0x1eb   : > { %v1169_v27 = vmul.f32 0.03125, %v1164_v26 }
 0x1ed   : > { %v1171_v28 = vsub.f32 %v1151_v22, %v1169_v27 }
 0x1ee   : > { %v1167_v29 = vpop.xlane.xlu1 %1166 }
 0x1ef   : > { %v1170_v30 = vmul.f32 0.03125, %v1167_v29  ;;  %v1173_v31 = vmul.f32 %v1171_v28, %v1171_v28 }
 0x1f1   : > { %v1172_v32 = vsub.f32 %v1156_v23, %v1170_v30  ;;  %v1175_v33 = vsel %vm1161_vm3, %v1173_v31, 0.0 }
 0x1f2   : > { %1176 = vadd.xlane.f32.xlu0 %v1175_v33 }
 0x1f3   : > { %v1174_v34 = vmul.f32 %v1172_v32, %v1172_v32 }
 0x1f5   : > { %v1178_v35 = vsel %vm1161_vm3, %v1174_v34, 0.0 }
 0x1f6   : > { %1179 = vadd.xlane.f32.xlu1 %v1178_v35 }
 0x27b   : > { %v1177_v40 = vpop.xlane.xlu0 %1176 }
 0x27c   : > { %v1181_v41 = vmul.f32 0.03125, %v1177_v40 }
 0x27e   : > { %v1183_v42 = vadd.f32 1e-12, %v1181_v41 }
 0x27f   : > { %v1180_v43 = vpop.xlane.xlu1 %1179 }
 0x280   : > { %6062 = vrsqrt.f32 %v1183_v42  ;;  %v1182_v44 = vmul.f32 0.03125, %v1180_v43 }
 0x282   : > { %v1184_v45 = vadd.f32 1e-12, %v1182_v44 }
 0x284   : > { %6064 = vrsqrt.f32 %v1184_v45 }
 0x28d   : > { %v6063_v46 = vpop.eup %6062 }
 0x28e   : > { %v1187_v48 = vmul.f32 %v6063_v46, %v1171_v28 }
 0x290   : > { %v1195_v50 = vmul.f32 %v5465_v47, %v1187_v48 }
 0x291   : > { %v6065_v51 = vpop.eup %6064 }
 0x292   : > { %v1203_v52 = vadd.f32 %v5466_v49, %v1195_v50  ;;  %v1188_v53 = vmul.f32 %v6065_v51, %v1172_v32 }
 0x294   : > { %1205 = vst.msk [vmem:[#allocation2] sm:$0xff] %vm1161_vm3, %v1203_v52  ;;  %v1196_v54 = vmul.f32 %v5465_v47, %v1188_v53 }
 0x296   : > { %v1204_v55 = vadd.f32 %v5466_v49, %v1196_v54 }
 0x298   : > { %1206 = vst.msk [vmem:[#allocation2 + $0x8] sm:$0xff] %vm1161_vm3, %v1204_v55 }
 0x29b   : > { %v6356_v56 = vld [vmem:[#allocation2] sm:$0xff] }
 0x29c   : > { %5757 = vmatprep.mubr.msk.f32.mxu1 %vm1161_vm3, %v6356_v56 }
 0x29f   : > { %v6360_v57 = vld [vmem:[#allocation2 + $0x8] sm:$0xff] }
 0x2a0   : > { %5758 = vmatmul.mubr.msk.f32.vlgmr.msra.gmra.mxu1 %vm1161_vm3, %v6360_v57 }
 0x2a1   : > { %5762 = vmatprep.mubr.msk.f32.mxu1 %vm6166_vm4, %v6165_v11 }
 0x360   : > { %v5759_v58 = vpop.f32.mrf.mxu1 }
 0x361   : > { %v6382_v62 = vadd.f32 %v5759_v58, %v5467_v59 }
 0x362   : > { %v1318_v60 = vpop.f32.mrf.mxu1 }
 0x363   : > { %v6378_v61 = vadd.f32 %v5467_v59, %v1318_v60 }
 0x365   : > { %1328 = vrot.lane.b32.xlu1 %v6378_v61, %s6973_s24 }
 0x369   : > { %1406 = vrot.lane.b32.xlu1 %v6382_v62, %s6973_s24  ;;  %s6638_s24 = scalar_lea.vmem %s6939_s15, %s6369_s29 }
 0x3d7   : > { %v1329_v63 = vpop.permute.xlu1 %1328 }
 0x3d8   : > { %5761 = vmatpush3.xpose.msk.msra.mxu1 %vm1330_vm5, %v1329_v63 }
 0x3d9   : > { %5765 = vmatprep.subr.mxu1 %v6165_v11 }
 0x3db   : > { %5763 = vmatmul.mubr.msk.f32.vlgmr.msra.gmra.mxu1 %vm1330_vm5, %v6378_v61  ;;  %v1407_v0 = vpop.permute.xlu1 %1406 }
 0x3dc   : > { %5766 = vmatpush3.xpose.msk.msra.mxu1 %vm1330_vm5, %v1407_v0  ;;  %5767 = vmatprep.mubr.msk.f32.mxu1 %vm6166_vm4, %v6165_v11 }
 0x3dd   : > { %5775 = vmatprep.subr.mxu1 %v6165_v11 }
 0x3df   : > { %5768 = vmatmul.mubr.msk.f32.vlgmr.msra.gmra.mxu1 %vm1330_vm5, %v6382_v62 }
 0x3e0   : > { %5777 = vmatprep.mubr.msk.f32.mxu1 %vm6166_vm4, %v6165_v11 }
 0x49b   : > { %v1401_v17 = vpop.f32.mrf.mxu1 }
 0x49c   : > { %v1482_v18 = vmul.f32 0.35355338, %v1401_v17 }
 0x49d   : > { %v5764_v19 = vpop.f32.mrf.mxu1 }
 0x49e   : > { %v1494_v21 = vadd.f32 %v6403_v16, %v1482_v18 }
 0x49f   : > { %v1478_v22 = vpop.f32.mrf.mxu1 }
 0x4a0   : > { %v1483_v23 = vmul.f32 0.35355338, %v1478_v22  ;;  %v1496_v12 = vsel %vm1330_vm5, %v1494_v21, -inf }
 0x4a1   : > { %1497 = vmax.xlane.f32.xlu1 %v1496_v12  ;;  %v5769_v24 = vpop.f32.mrf.mxu1 }
 0x4a2   : > { %v1495_v25 = vadd.f32 %v6405_v20, %v1483_v23 }
 0x4a4   : > { %v1499_v26 = vsel %vm1330_vm5, %v1495_v25, -inf }
 0x4a5   : > { %1500 = vmax.xlane.f32.xlu0 %v1499_v26 }
 0x4b2   : > { %1594 = vrot.lane.b32.xlu1 %v6382_v62, %s6971_s27 }
 0x4bb   : > { %1518 = vrot.lane.b32.xlu0 %v6378_v61, %s6971_s27  ;;  %s6597_s27 = scalar_lea.vmem %s6935_s11, %s6369_s29 }
 0x4bf   : > { %1672 = vrot.lane.b32.xlu0 %v6378_v61, %s6969_s4 }
 0x4c3   : > { %1750 = vrot.lane.b32.xlu0 %v6382_v62, %s6969_s4  ;;  %s6627_s4 = scalar_lea.vmem %s6937_s13, %s6369_s29 }
 0x52a   : > { %v1498_v27 = vpop.xlane.xlu1 %1497 }
 0x52b   : > { %v1502_v28 = vsub.f32 %v1494_v21, %v1498_v27 }
 0x52d   : > { %v1504_v29 = vmul.f32 1.442695, %v1502_v28 }
 0x52e   : > { %v1501_v30 = vpop.xlane.xlu0 %1500  ;;  %v1595_v31 = vpop.permute.xlu1 %1594 }
 0x52f   : > { %6066 = vpow2.f32 %v1504_v29  ;;  %v1503_v32 = vsub.f32 %v1495_v25, %v1501_v30  ;;  %5776 = vmatpush3.msra.mxu1 %v1595_v31 }
 0x530   : > { %5785 = vmatprep.subr.mxu1 %v6165_v11 }
 0x531   : > { %v1506_v33 = vmul.f32 1.442695, %v1503_v32 }
 0x532   : > { %v1519_v34 = vpop.permute.xlu0 %1518 }
 0x533   : > { %6068 = vpow2.f32 %v1506_v33  ;;  %5771 = vmatpush3.msra.mxu0 %v1519_v34 }
 0x534   : > { %5780 = vmatprep.subr.mxu0 %v6165_v11 }
 0x536   : > { %v1673_v39 = vpop.permute.xlu0 %1672 }
 0x53a   : > { %v1751_v40 = vpop.permute.xlu0 %1750 }
 0x53c   : > { %v6067_v35 = vpop.eup %6066 }
 0x53d   : > { %v1508_v36 = vsel %vm1330_vm5, %v6067_v35, 0.0 }
 0x53e   : > { %1509 = vadd.xlane.f32.xlu0 %v1508_v36 }
 0x540   : > { %v6069_v37 = vpop.eup %6068 }
 0x541   : > { %v1511_v38 = vsel %vm1330_vm5, %v6069_v37, 0.0 }
 0x542   : > { %1512 = vadd.xlane.f32.xlu0 %v1511_v38 }
 0x558   : > { %1670 = vrot.lane.b32.xlu0 %v6378_v61, %s6967_s0 }
 0x55c   : > { %1748 = vrot.lane.b32.xlu0 %v6382_v62, %s6967_s0 }
 0x5c7   : > { %v1510_v41 = vpop.xlane.xlu0 %1509 }
 0x5c8   : > { %6070 = vrcp.f32 %v1510_v41 }
 0x5cb   : > { %v1513_v42 = vpop.xlane.xlu0 %1512 }
 0x5cc   : > { %6072 = vrcp.f32 %v1513_v42 }
 0x5cf   : > { %v1671_v46 = vpop.permute.xlu0 %1670 }
 0x5d3   : > { %v1749_v48 = vpop.permute.xlu0 %1748 }
 0x5d5   : > { %v6071_v43 = vpop.eup %6070 }
 0x5d6   : > { %v1515_v44 = vmul.f32 %v6071_v43, %v6067_v35 }
 0x5d8   : > { %5773 = vmatmul.mubr.msk.f32.vlgmr.msra.gmra.mxu0 %vm1330_vm5, %v1515_v44 }
 0x5d9   : > { %v6073_v45 = vpop.eup %6072  ;;  %5781 = vmatpush3.xpose.msk.msra.mxu0 %vm1330_vm5, %v1673_v39  ;;  %5782 = vmatprep.mubr.msk.f32.mxu0 %vm6166_vm4, %v6165_v11 }
 0x5da   : > { %v1517_v47 = vmul.f32 %v6073_v45, %v6069_v37  ;;  %5790 = vmatprep.subr.mxu0 %v6165_v11 }
 0x5dc   : > { %5778 = vmatmul.mubr.msk.f32.vlgmr.msra.gmra.mxu1 %vm1330_vm5, %v1517_v47  ;;  %5783 = vmatmul.mubr.msk.f32.vlgmr.msra.gmra.mxu0 %vm1330_vm5, %v1671_v46 }
 0x5dd   : > { %5786 = vmatpush3.xpose.msk.msra.mxu1 %vm1330_vm5, %v1751_v40  ;;  %5787 = vmatprep.mubr.msk.f32.mxu1 %vm6166_vm4, %v6165_v11 }
 0x5de   : > { %5795 = vmatprep.subr.mxu1 %v6165_v11  ;;  %5792 = vmatprep.mubr.msk.f32.mxu0 %vm6166_vm4, %v6165_v11 }
 0x5e0   : > { %5788 = vmatmul.mubr.msk.f32.vlgmr.msra.gmra.mxu1 %vm1330_vm5, %v1749_v48 }
 0x5e1   : > { %5797 = vmatprep.mubr.msk.f32.mxu1 %vm6166_vm4, %v6165_v11 }
 0x698   : > { %v6443_v49 = vpop.f32.mrf.mxu0 }
 0x69a   : > { %v5774_v50 = vpop.f32.mrf.mxu0 }
 0x69c   : > { %v6445_v51 = vpop.f32.mrf.mxu1  ;;  %v1744_v52 = vpop.f32.mrf.mxu0 }
 0x69d   : > { %v1826_v53 = vmul.f32 0.35355338, %v1744_v52 }
 0x69e   : > { %v5779_v54 = vpop.f32.mrf.mxu1  ;;  %v5784_v55 = vpop.f32.mrf.mxu0 }
 0x69f   : > { %v1828_v58 = vadd.f32 %v1826_v53, %v6403_v16 }
 0x6a0   : > { %v1822_v59 = vpop.f32.mrf.mxu1 }
 0x6a1   : > { %v1827_v60 = vmul.f32 0.35355338, %v1822_v59  ;;  %v1830_v63 = vsel %vm1330_vm5, %v1828_v58, -inf }
 0x6a2   : > { %1831 = vmax.xlane.f32.xlu1 %v1830_v63  ;;  %v5789_v0 = vpop.f32.mrf.mxu1 }
 0x6a3   : > { %v1829_v1 = vadd.f32 %v1827_v60, %v6405_v20 }
 0x6a5   : > { %v1833_v2 = vsel %vm1330_vm5, %v1829_v1, -inf }
 0x6a6   : > { %1834 = vmax.xlane.f32.xlu0 %v1833_v2 }
 0x6b3   : > { %1928 = vrot.lane.b32.xlu1 %v6382_v62, %s6965_s23 }
 0x6b7   : > { %2006 = vrot.lane.b32.xlu1 %v6378_v61, %s6963_s6 }
 0x6bc   : > { %1852 = vrot.lane.b32.xlu0 %v6378_v61, %s6965_s23  ;;  %s6580_s23 = scalar_lea.vmem %s6936_s12, %s6309_s30 }
 0x72b   : > { %v1832_v3 = vpop.xlane.xlu1 %1831 }
 0x72c   : > { %v1836_v4 = vsub.f32 %v1828_v58, %v1832_v3 }
 0x72e   : > { %v1838_v5 = vmul.f32 1.442695, %v1836_v4 }
 0x72f   : > { %v1835_v6 = vpop.xlane.xlu0 %1834  ;;  %v1929_v7 = vpop.permute.xlu1 %1928 }
 0x730   : > { %6074 = vpow2.f32 %v1838_v5  ;;  %v1837_v8 = vsub.f32 %v1829_v1, %v1835_v6  ;;  %5796 = vmatpush3.msra.mxu1 %v1929_v7 }
 0x731   : > { %5805 = vmatprep.subr.mxu1 %v6165_v11 }
 0x732   : > { %v1840_v9 = vmul.f32 1.442695, %v1837_v8 }
 0x733   : > { %v1853_v10 = vpop.permute.xlu0 %1852  ;;  %v2007_v18 = vpop.permute.xlu1 %2006 }
 0x734   : > { %6076 = vpow2.f32 %v1840_v9  ;;  %5791 = vmatpush3.msra.mxu0 %v1853_v10 }
 0x735   : > { %5800 = vmatprep.subr.mxu0 %v6165_v11 }
 0x73d   : > { %v6075_v13 = vpop.eup %6074 }
 0x73e   : > { %v1842_v14 = vsel %vm1330_vm5, %v6075_v13, 0.0 }
 0x73f   : > { %1843 = vadd.xlane.f32.xlu0 %v1842_v14 }
 0x741   : > { %v6077_v15 = vpop.eup %6076 }
 0x742   : > { %v1845_v17 = vsel %vm1330_vm5, %v6077_v15, 0.0 }
 0x743   : > { %1846 = vadd.xlane.f32.xlu1 %v1845_v17 }
 0x754   : > { %2004 = vrot.lane.b32.xlu1 %v6378_v61, %s6953_s25 }
 0x755   : > { %2084 = vrot.lane.b32.xlu0 %v6382_v62, %s6963_s6  ;;  %s6567_s6 = scalar_lea.vmem %s6994_s9, %s6369_s29  ;;  %s6662_s9 = scalar_lea.vmem %s6941_s17, %s6369_s29 }
 0x759   : > { %2082 = vrot.lane.b32.xlu0 %v6382_v62, %s6953_s25  ;;  %s6959_s25 = smov 16  }
 0x7c8   : > { %v1844_v19 = vpop.xlane.xlu0 %1843 }
 0x7c9   : > { %6078 = vrcp.f32 %v1844_v19 }
 0x7cc   : > { %v1847_v21 = vpop.xlane.xlu1 %1846  ;;  %v2085_v24 = vpop.permute.xlu0 %2084 }
 0x7cd   : > { %6080 = vrcp.f32 %v1847_v21 }
 0x7d0   : > { %v2005_v26 = vpop.permute.xlu1 %2004  ;;  %v2083_v27 = vpop.permute.xlu0 %2082 }
 0x7d6   : > { %v6079_v22 = vpop.eup %6078 }
 0x7d7   : > { %v1849_v23 = vmul.f32 %v6079_v22, %v6075_v13 }
 0x7d9   : > { %5793 = vmatmul.mubr.msk.f32.vlgmr.msra.gmra.mxu0 %vm1330_vm5, %v1849_v23 }
 0x7da   : > { %v6081_v12 = vpop.eup %6080  ;;  %5801 = vmatpush3.xpose.msk.msra.mxu0 %vm1330_vm5, %v2007_v18  ;;  %5802 = vmatprep.mubr.msk.f32.mxu0 %vm6166_vm4, %v6165_v11 }
 0x7db   : > { %v1851_v25 = vmul.f32 %v6081_v12, %v6077_v15  ;;  %5810 = vmatprep.subr.mxu0 %v6165_v11 }
 0x7dd   : > { %5798 = vmatmul.mubr.msk.f32.vlgmr.msra.gmra.mxu1 %vm1330_vm5, %v1851_v25  ;;  %5803 = vmatmul.mubr.msk.f32.vlgmr.msra.gmra.mxu0 %vm1330_vm5, %v2005_v26 }
 0x7de   : > { %5806 = vmatpush3.xpose.msk.msra.mxu1 %vm1330_vm5, %v2085_v24  ;;  %5807 = vmatprep.mubr.msk.f32.mxu1 %vm6166_vm4, %v6165_v11 }
 0x7df   : > { %5815 = vmatprep.subr.mxu1 %v6165_v11  ;;  %5812 = vmatprep.mubr.msk.f32.mxu0 %vm6166_vm4, %v6165_v11 }
 0x7e1   : > { %5808 = vmatmul.mubr.msk.f32.vlgmr.msra.gmra.mxu1 %vm1330_vm5, %v2083_v27 }
 0x7e2   : > { %5817 = vmatprep.mubr.msk.f32.mxu1 %vm6166_vm4, %v6165_v11 }
 0x899   : > { %v6483_v28 = vpop.f32.mrf.mxu0 }
 0x89b   : > { %v5794_v29 = vpop.f32.mrf.mxu0 }
 0x89d   : > { %v6485_v30 = vpop.f32.mrf.mxu1  ;;  %v2078_v31 = vpop.f32.mrf.mxu0 }
 0x89e   : > { %v2160_v32 = vmul.f32 0.35355338, %v2078_v31 }
 0x89f   : > { %v5799_v33 = vpop.f32.mrf.mxu1  ;;  %v5804_v34 = vpop.f32.mrf.mxu0 }
 0x8a0   : > { %v2162_v35 = vadd.f32 %v2160_v32, %v6403_v16 }
 0x8a1   : > { %v2156_v36 = vpop.f32.mrf.mxu1 }
 0x8a2   : > { %v2161_v37 = vmul.f32 0.35355338, %v2156_v36  ;;  %v2164_v38 = vsel %vm1330_vm5, %v2162_v35, -inf }
 0x8a3   : > { %v5809_v39 = vpop.f32.mrf.mxu1  ;;  %2165 = vmax.xlane.f32.xlu1 %v2164_v38 }
 0x8a4   : > { %v2163_v40 = vadd.f32 %v2161_v37, %v6405_v20 }
 0x8a6   : > { %v2167_v41 = vsel %vm1330_vm5, %v2163_v40, -inf }
 0x8a7   : > { %2168 = vmax.xlane.f32.xlu0 %v2167_v41 }
 0x8b4   : > { %2262 = vrot.lane.b32.xlu1 %v6382_v62, %s6947_s26 }
 0x8b8   : > { %2340 = vrot.lane.b32.xlu1 %v6378_v61, %s6951_s2 }
 0x8bd   : > { %2186 = vrot.lane.b32.xlu0 %v6378_v61, %s6947_s26  ;;  %s6949_s26 = smov 104  }
 0x92c   : > { %v2166_v42 = vpop.xlane.xlu1 %2165 }
 0x92d   : > { %v2170_v43 = vsub.f32 %v2162_v35, %v2166_v42 }
 0x92f   : > { %v2172_v44 = vmul.f32 1.442695, %v2170_v43 }
 0x930   : > { %v2169_v45 = vpop.xlane.xlu0 %2168  ;;  %v2263_v46 = vpop.permute.xlu1 %2262 }
 0x931   : > { %6082 = vpow2.f32 %v2172_v44  ;;  %v2171_v47 = vsub.f32 %v2163_v40, %v2169_v45  ;;  %5816 = vmatpush3.msra.mxu1 %v2263_v46 }
 0x932   : > { %5825 = vmatprep.subr.mxu1 %v6165_v11 }
 0x933   : > { %v2174_v48 = vmul.f32 1.442695, %v2171_v47 }
 0x934   : > { %v2187_v50 = vpop.permute.xlu0 %2186  ;;  %v2341_v58 = vpop.permute.xlu1 %2340 }
 0x935   : > { %6084 = vpow2.f32 %v2174_v48  ;;  %5811 = vmatpush3.msra.mxu0 %v2187_v50 }
 0x936   : > { %5820 = vmatprep.subr.mxu0 %v6165_v11 }
 0x93e   : > { %v6083_v52 = vpop.eup %6082 }
 0x93f   : > { %v2176_v53 = vsel %vm1330_vm5, %v6083_v52, 0.0 }
 0x940   : > { %2177 = vadd.xlane.f32.xlu0 %v2176_v53 }
 0x942   : > { %v6085_v54 = vpop.eup %6084 }
 0x943   : > { %v2179_v55 = vsel %vm1330_vm5, %v6085_v54, 0.0 }
 0x944   : > { %2180 = vadd.xlane.f32.xlu1 %v2179_v55 }
 0x955   : > { %2338 = vrot.lane.b32.xlu1 %v6378_v61, %s6949_s26 }
 0x956   : > { %2418 = vrot.lane.b32.xlu0 %v6382_v62, %s6951_s2  ;;  %s6955_s2 = smov 8  }
 0x95a   : > { %2416 = vrot.lane.b32.xlu0 %v6382_v62, %s6949_s26  ;;  %s6957_s26 = smov 40  }
 0x9c9   : > { %v2178_v59 = vpop.xlane.xlu0 %2177 }
 0x9ca   : > { %6086 = vrcp.f32 %v2178_v59 }
 0x9cd   : > { %v2181_v60 = vpop.xlane.xlu1 %2180  ;;  %v2419_v2 = vpop.permute.xlu0 %2418 }
 0x9ce   : > { %6088 = vrcp.f32 %v2181_v60 }
 0x9d1   : > { %v2339_v4 = vpop.permute.xlu1 %2338  ;;  %v2417_v5 = vpop.permute.xlu0 %2416 }
 0x9d7   : > { %v6087_v63 = vpop.eup %6086 }
 0x9d8   : > { %v2183_v0 = vmul.f32 %v6087_v63, %v6083_v52 }
 0x9da   : > { %5813 = vmatmul.mubr.msk.f32.vlgmr.msra.gmra.mxu0 %vm1330_vm5, %v2183_v0 }
 0x9db   : > { %v6089_v1 = vpop.eup %6088  ;;  %5821 = vmatpush3.xpose.msk.msra.mxu0 %vm1330_vm5, %v2341_v58  ;;  %5822 = vmatprep.mubr.msk.f32.mxu0 %vm6166_vm4, %v6165_v11 }
 0x9dc   : > { %v2185_v3 = vmul.f32 %v6089_v1, %v6085_v54  ;;  %5830 = vmatprep.subr.mxu0 %v6165_v11 }
 0x9de   : > { %5818 = vmatmul.mubr.msk.f32.vlgmr.msra.gmra.mxu1 %vm1330_vm5, %v2185_v3  ;;  %5823 = vmatmul.mubr.msk.f32.vlgmr.msra.gmra.mxu0 %vm1330_vm5, %v2339_v4 }
 0x9df   : > { %5826 = vmatpush3.xpose.msk.msra.mxu1 %vm1330_vm5, %v2419_v2  ;;  %5827 = vmatprep.mubr.msk.f32.mxu1 %vm6166_vm4, %v6165_v11 }
 0x9e0   : > { %5835 = vmatprep.subr.mxu1 %v6165_v11  ;;  %5832 = vmatprep.mubr.msk.f32.mxu0 %vm6166_vm4, %v6165_v11 }
 0x9e2   : > { %5828 = vmatmul.mubr.msk.f32.vlgmr.msra.gmra.mxu1 %vm1330_vm5, %v2417_v5 }
 0x9e3   : > { %5837 = vmatprep.mubr.msk.f32.mxu1 %vm6166_vm4, %v6165_v11 }
 0xa9a   : > { %v2258_v6 = vpop.f32.mrf.mxu0 }
 0xa9c   : > { %v5814_v7 = vpop.f32.mrf.mxu0 }
 0xa9e   : > { %v2334_v8 = vpop.f32.mrf.mxu1  ;;  %v2412_v9 = vpop.f32.mrf.mxu0 }
 0xa9f   : > { %v2494_v10 = vmul.f32 0.35355338, %v2412_v9 }
 0xaa0   : > { %v5819_v13 = vpop.f32.mrf.mxu1  ;;  %v5824_v14 = vpop.f32.mrf.mxu0 }
 0xaa1   : > { %v2496_v15 = vadd.f32 %v2494_v10, %v6403_v16 }
 0xaa2   : > { %v2490_v17 = vpop.f32.mrf.mxu1 }
 0xaa3   : > { %v2495_v18 = vmul.f32 0.35355338, %v2490_v17  ;;  %v2498_v19 = vsel %vm1330_vm5, %v2496_v15, -inf }
 0xaa4   : > { %v5829_v21 = vpop.f32.mrf.mxu1  ;;  %2499 = vmax.xlane.f32.xlu1 %v2498_v19 }
 0xaa5   : > { %v2497_v22 = vadd.f32 %v2495_v18, %v6405_v20  ;;  %v2844_v21 = vld [vmem:[%s6580_s23 + $0x10] sm:$0xff] }
 0xaa7   : > { %v2501_v23 = vsel %vm1330_vm5, %v2497_v22, -inf }
 0xaa8   : > { %2502 = vmax.xlane.f32.xlu0 %v2501_v23  ;;  %v2842_v23 = vld [vmem:[%s6580_s23] sm:$0xff] }
 0xb2d   : > { %v2500_v12 = vpop.xlane.xlu1 %2499 }
 0xb2e   : > { %v2504_v24 = vsub.f32 %v2496_v15, %v2500_v12 }
 0xb30   : > { %v2506_v25 = vmul.f32 1.442695, %v2504_v24 }
 0xb31   : > { %v2503_v26 = vpop.xlane.xlu0 %2502 }
 0xb32   : > { %6090 = vpow2.f32 %v2506_v25  ;;  %v2505_v27 = vsub.f32 %v2497_v22, %v2503_v26  ;;  %v2843_v22 = vld [vmem:[%s6580_s23 + $0x8] sm:$0xff] }
 0xb34   : > { %v2508_v29 = vmul.f32 1.442695, %v2505_v27 }
 0xb36   : > { %6092 = vpow2.f32 %v2508_v29 }
 0xb3f   : > { %v6091_v31 = vpop.eup %6090 }
 0xb40   : > { %v2510_v32 = vsel %vm1330_vm5, %v6091_v31, 0.0 }
 0xb41   : > { %2511 = vadd.xlane.f32.xlu0 %v2510_v32 }
 0xb43   : > { %v6093_v33 = vpop.eup %6092 }
 0xb44   : > { %v2513_v34 = vsel %vm1330_vm5, %v6093_v33, 0.0 }
 0xb45   : > { %2514 = vadd.xlane.f32.xlu1 %v2513_v34 }
 0xb56   : > { %2596 = vrot.lane.b32.xlu1 %v6382_v62, %s6957_s26 }
 0xb57   : > { %2520 = vrot.lane.b32.xlu0 %v6378_v61, %s6957_s26  ;;  %s6961_s26 = smov 24  }
 0xb5a   : > { %2674 = vrot.lane.b32.xlu1 %v6483_v28, %s6955_s2 }
 0xb5b   : > { %2676 = vrot.lane.b32.xlu0 %v6485_v30, %s6955_s2  ;;  %s6590_s2 = scalar_lea.vmem %s6934_s10, %s6369_s29 }
 0xb5c   : > { %v5497_v32 = vld [vmem:[%s6590_s2] ss:$0 sm:$0xff] }
 0xb5e   : > { %2682 = vrot.lane.b32.xlu1 %v2258_v6, %s6959_s25 }
 0xb5f   : > { %2684 = vrot.lane.b32.xlu0 %v2334_v8, %s6959_s25  ;;  %s6545_s25 = scalar_lea.vmem %s6993_s8, %s6309_s30  ;;  %s5587_s30 = sshll.u32 %s7010_s28, 7 }
 0xb60   : > { %v2707_v39 = vld [vmem:[%s6545_s25 + $0x18] sm:$0xff]  ;;  %v2706_v40 = vld [vmem:[%s6545_s25 + $0x10] sm:$0xff]  ;;  %v2705_v41 = vld [vmem:[%s6545_s25 + $0x8] sm:$0xff]  ;;  %s6612_s0 = scalar_lea.vmem %s6938_s14, %s5587_s30  ;;  %s6995_s8 = smov 96  }
 0xb61   : > { %v2704_v42 = vld [vmem:[%s6545_s25] sm:$0xff]  ;;  %s6997_s30 = smov 88  }
 0xbca   : > { %v2512_v35 = vpop.xlane.xlu0 %2511 }
 0xbcb   : > { %6094 = vrcp.f32 %v2512_v35 }
 0xbce   : > { %v2521_v36 = vpop.permute.xlu0 %2520  ;;  %v2515_v62 = vpop.xlane.xlu1 %2514 }
 0xbcf   : > { %6096 = vrcp.f32 %v2515_v62  ;;  %5831 = vmatpush3.msra.mxu0 %v2521_v36  ;;  %v5498_v62 = vld [vmem:[%s6597_s27] ss:$0 sm:$0xff] }
 0xbd0   : > { %5840 = vmatprep.subr.mxu0 %v2707_v39 }
 0xbd2   : > { %v2597_v61 = vpop.permute.xlu1 %2596  ;;  %v2677_v48 = vpop.permute.xlu0 %2676 }
 0xbd3   : > { %5836 = vmatpush3.msra.mxu1 %v2597_v61  ;;  %v2697_v59 = vsel %vm1330_vm5, %v6445_v51, %v2677_v48 }
 0xbd6   : > { %v2675_v47 = vpop.permute.xlu1 %2674  ;;  %v2685_v53 = vpop.permute.xlu0 %2684 }
 0xbd7   : > { %v2696_v52 = vsel %vm1330_vm5, %v6443_v49, %v2675_v47  ;;  %v2700_v60 = vsel %vm2698_vm7, %v2697_v59, %v2685_v53  ;;  %v5494_v49 = vld [vmem:[%s6567_s6] ss:$0 sm:$0xff] }
 0xbd8   : > { %v6095_v37 = vpop.eup %6094 }
 0xbd9   : > { %v2517_v38 = vmul.f32 %v6095_v37, %v6091_v31 }
 0xbda   : > { %v2683_v50 = vpop.permute.xlu1 %2682 }
 0xbdb   : > { %5833 = vmatmul.mubr.msk.f32.vlgmr.msra.gmra.mxu0 %vm1330_vm5, %v2517_v38  ;;  %v2699_v54 = vsel %vm2698_vm7, %v2696_v52, %v2683_v50 }
 0xbdc   : > { %v6097_v28 = vpop.eup %6096  ;;  %5841 = vmatpush3.msra.mxu0 %v2707_v39  ;;  %v2957_v39 = vld [vmem:[%s6612_s0 + $0x28] sm:$0xff] }
 0xbdd   : > { %v2519_v30 = vmul.f32 %v6097_v28, %v6093_v33  ;;  %5842 = vmatprep.subr.mxu0 %v2706_v40  ;;  %v2959_v28 = vld [vmem:[%s6612_s0 + $0x38] sm:$0xff] }
 0xbde   : > { %5843 = vmatpush3.msra.mxu0 %v2706_v40  ;;  %v2956_v40 = vld [vmem:[%s6612_s0 + $0x20] sm:$0xff] }
 0xbdf   : > { %5838 = vmatmul.mubr.msk.f32.vlgmr.msra.gmra.mxu1 %vm1330_vm5, %v2519_v30  ;;  %5844 = vmatprep.subr.mxu0 %v2705_v41  ;;  %v2958_v30 = vld [vmem:[%s6612_s0 + $0x30] sm:$0xff] }
 0xbe0   : > { %5845 = vmatpush3.msra.mxu0 %v2705_v41  ;;  %v2955_v41 = vld [vmem:[%s6612_s0 + $0x18] sm:$0xff] }
 0xbe1   : > { %5846 = vmatprep.subr.mxu0 %v2704_v42 }
 0xbe2   : > { %5847 = vmatpush3.msra.mxu0 %v2704_v42  ;;  %v2954_v42 = vld [vmem:[%s6612_s0 + $0x10] sm:$0xff] }
 0xbe3   : > { %5862 = vmatprep.subr.mxu0 %v2959_v28 }
 0xc9b   : > { %v2592_v43 = vpop.f32.mrf.mxu0 }
 0xc9c   : > { %2690 = vrot.lane.b32.xlu1 %v2592_v43, %s6961_s26  ;;  %v2953_v43 = vld [vmem:[%s6612_s0 + $0x8] sm:$0xff] }
 0xc9d   : > { %v5834_v44 = vpop.f32.mrf.mxu0 }
 0xc9e   : > { %v2952_v44 = vld [vmem:[%s6612_s0] sm:$0xff] }
 0xc9f   : > { %v2668_v45 = vpop.f32.mrf.mxu1 }
 0xca0   : > { %2692 = vrot.lane.b32.xlu0 %v2668_v45, %s6961_s26  ;;  %v5499_v45 = vld [vmem:[%s6627_s4] ss:$0 sm:$0xff]  ;;  %s6998_s26 = smov 120  }
 0xca1   : > { %v5839_v46 = vpop.f32.mrf.mxu1 }
 0xd0e   : > { %v2691_v55 = vpop.permute.xlu1 %2690 }
 0xd0f   : > { %v2702_v58 = vsel %vm2701_vm6, %v2699_v54, %v2691_v55 }
 0xd10   : > { %5848 = vmatprep.mubr.msk.f32.mxu0 %vm1161_vm3, %v2702_v58 }
 0xd12   : > { %v2693_v63 = vpop.permute.xlu0 %2692 }
 0xd13   : > { %v2703_v0 = vsel %vm2701_vm6, %v2700_v60, %v2693_v63 }
 0xd14   : > { %5849 = vmatmul.mubr.msk.f32.vlgmr.msra.gmra.mxu0 %vm1161_vm3, %v2703_v0 }
 0xd15   : > { %5863 = vmatpush3.msra.mxu0 %v2959_v28  ;;  %v5505_v28 = vld [vmem:[%s6656_s7] ss:$0 sm:$0xff] }
 0xd16   : > { %5864 = vmatprep.subr.mxu0 %v2958_v30 }
 0xd17   : > { %5865 = vmatpush3.msra.mxu0 %v2958_v30 }
 0xd18   : > { %5866 = vmatprep.subr.mxu0 %v2957_v39 }
 0xd19   : > { %5867 = vmatpush3.msra.mxu0 %v2957_v39 }
 0xd1a   : > { %5868 = vmatprep.subr.mxu0 %v2956_v40 }
 0xd1b   : > { %5869 = vmatpush3.msra.mxu0 %v2956_v40  ;;  %v5506_v40 = vld [vmem:[%s6662_s9] ss:$0 sm:$0xff] }
 0xd1c   : > { %5870 = vmatprep.subr.mxu0 %v2955_v41 }
 0xd1d   : > { %5871 = vmatpush3.msra.mxu0 %v2955_v41 }
 0xd1e   : > { %5872 = vmatprep.subr.mxu0 %v2954_v42 }
 0xd1f   : > { %5873 = vmatpush3.msra.mxu0 %v2954_v42 }
 0xd20   : > { %5874 = vmatprep.subr.mxu0 %v2953_v43 }
 0xd21   : > { %5875 = vmatpush3.msra.mxu0 %v2953_v43 }
 0xd22   : > { %5876 = vmatprep.subr.mxu0 %v2952_v44 }
 0xd23   : > { %5877 = vmatpush3.msra.mxu0 %v2952_v44 }
 0xd24   : > { %5902 = vmatprep.subr.mxu0 %v6165_v11 }
 0xdd4   : > { %v5850_v1 = vpop.f32.mrf.mxu0 }
 0xdd5   : > { %v2793_v2 = vadd.f32 %v5850_v1, %v5494_v49 }
 0xdd6   : > { %v2787_v3 = vpop.f32.mrf.mxu0 }
 0xdd7   : > { %v2788_v4 = vadd.f32 %v5494_v49, %v2787_v3  ;;  %v2797_v51 = vadd.f32 %v2793_v2, %v6360_v57 }
 0xdd9   : > { %v2803_v5 = vsel %vm1161_vm3, %v2797_v51, 0.0  ;;  %v2796_v6 = vadd.f32 %v2788_v4, %v6356_v56  ;;  %v2845_v56 = vld [vmem:[%s6580_s23 + $0x18] sm:$0xff] }
 0xdda   : > { %2804 = vadd.xlane.f32.xlu0 %v2803_v5  ;;  %5851 = vmatprep.subr.mxu1 %v2845_v56 }
 0xddb   : > { %v2800_v7 = vsel %vm1161_vm3, %v2796_v6, 0.0  ;;  %5852 = vmatpush3.msra.mxu1 %v2845_v56 }
 0xddc   : > { %2801 = vadd.xlane.f32.xlu1 %v2800_v7  ;;  %5853 = vmatprep.subr.mxu1 %v2844_v21 }
 0xddd   : > { %5854 = vmatpush3.msra.mxu1 %v2844_v21 }
 0xdde   : > { %5855 = vmatprep.subr.mxu1 %v2843_v22 }
 0xddf   : > { %5856 = vmatpush3.msra.mxu1 %v2843_v22 }
 0xde0   : > { %5857 = vmatprep.subr.mxu1 %v2842_v23 }
 0xde1   : > { %5858 = vmatpush3.msra.mxu1 %v2842_v23 }
 0xe63   : > { %v2805_v8 = vpop.xlane.xlu0 %2804 }
 0xe64   : > { %v2807_v9 = vmul.f32 0.03125, %v2805_v8  ;;  %v5502_v8 = vld [vmem:[%s6638_s24] ss:$0 sm:$0xff] }
 0xe65   : > { %v2802_v10 = vpop.xlane.xlu1 %2801 }
 0xe66   : > { %v2809_v13 = vsub.f32 %v2797_v51, %v2807_v9  ;;  %v2806_v14 = vmul.f32 0.03125, %v2802_v10 }
 0xe68   : > { %v2808_v15 = vsub.f32 %v2796_v6, %v2806_v14  ;;  %v2811_v17 = vmul.f32 %v2809_v13, %v2809_v13 }
 0xe6a   : > { %v2815_v18 = vsel %vm1161_vm3, %v2811_v17, 0.0  ;;  %v2810_v19 = vmul.f32 %v2808_v15, %v2808_v15 }
 0xe6b   : > { %2816 = vadd.xlane.f32.xlu1 %v2815_v18 }
 0xe6c   : > { %v2812_v57 = vsel %vm1161_vm3, %v2810_v19, 0.0 }
 0xe6d   : > { %2813 = vadd.xlane.f32.xlu0 %v2812_v57 }
 0xef4   : > { %v2817_v12 = vpop.xlane.xlu1 %2816 }
 0xef5   : > { %v2819_v24 = vmul.f32 0.03125, %v2817_v12 }
 0xef6   : > { %v2814_v25 = vpop.xlane.xlu0 %2813 }
 0xef7   : > { %v2821_v26 = vadd.f32 1e-12, %v2819_v24  ;;  %v2818_v27 = vmul.f32 0.03125, %v2814_v25 }
 0xef9   : > { %6098 = vrsqrt.f32 %v2821_v26  ;;  %v2820_v29 = vadd.f32 1e-12, %v2818_v27 }
 0xefb   : > { %6100 = vrsqrt.f32 %v2820_v29  ;;  %v5510_v29 = vld [vmem:[%s6339_s1 + $0x38] sm:$0xff] }
 0xefc   : > { %5881 = vmatprep.subr.mxu1 %v5510_v29 }
 0xf06   : > { %v6099_v31 = vpop.eup %6098 }
 0xf07   : > { %v2825_v33 = vmul.f32 %v6099_v31, %v2809_v13  ;;  %v5509_v31 = vld [vmem:[%s6339_s1 + $0x30] sm:$0xff] }
 0xf08   : > { %v6101_v34 = vpop.eup %6100 }
 0xf09   : > { %v2824_v35 = vmul.f32 %v6101_v34, %v2808_v15  ;;  %v2833_v36 = vmul.f32 %v5497_v32, %v2825_v33  ;;  %v5507_v33 = vld [vmem:[%s6339_s1 + $0x20] sm:$0xff] }
 0xf0b   : > { %v2832_v61 = vmul.f32 %v5497_v32, %v2824_v35  ;;  %v6602_v38 = vadd.f32 %v5498_v62, %v2833_v36  ;;  %v5508_v32 = vld [vmem:[%s6339_s1 + $0x28] sm:$0xff]  ;;  %s6999_s1 = smov 56  }
 0xf0d   : > { %v6600_v37 = vadd.f32 %v5498_v62, %v2832_v61 }
 0xf0f   : > { %5859 = vmatprep.mubr.msk.f32.mxu1 %vm1161_vm3, %v6600_v37 }
 0xf10   : > { %5860 = vmatmul.mubr.msk.f32.vlgmr.msra.gmra.mxu1 %vm1161_vm3, %v6602_v38 }
 0xf11   : > { %5882 = vmatpush3.msra.mxu1 %v5510_v29 }
 0xf12   : > { %5883 = vmatprep.subr.mxu1 %v5509_v31 }
 0xf13   : > { %5884 = vmatpush3.msra.mxu1 %v5509_v31 }
 0xf14   : > { %5885 = vmatprep.subr.mxu1 %v5508_v32 }
 0xf15   : > { %5886 = vmatpush3.msra.mxu1 %v5508_v32 }
 0xf16   : > { %5887 = vmatprep.subr.mxu1 %v5507_v33 }
 0xf17   : > { %5888 = vmatpush3.msra.mxu1 %v5507_v33 }
 0xf18   : > { %5892 = vmatprep.subr.mxu1 %v6165_v11 }
 0xfd0   : > { %v5861_v46 = vpop.f32.mrf.mxu1 }
 0xfd1   : > { %v2931_v47 = vadd.f32 %v5861_v46, %v5499_v45 }
 0xfd2   : > { %v2925_v48 = vpop.f32.mrf.mxu1 }
 0xfd3   : > { %v2935_v50 = vmul.f32 %v2931_v47, %v2931_v47  ;;  %v2926_v52 = vadd.f32 %v5499_v45, %v2925_v48  ;;  %v5512_v48 = vld [vmem:[%s6375_s5 + $0x1] ss:$0 sm:$0xff]  ;;  %s6996_s5 = smov 64  }
 0xfd5   : > { %v2937_v53 = vmul.f32 %v2935_v50, %v2931_v47  ;;  %v2934_v54 = vmul.f32 %v2926_v52, %v2926_v52 }
 0xfd7   : > { %v2939_v55 = vmul.f32 0.044715, %v2937_v53  ;;  %v2936_v58 = vmul.f32 %v2934_v54, %v2926_v52 }
 0xfd9   : > { %v2941_v59 = vadd.f32 %v2939_v55, %v2931_v47  ;;  %v2938_v60 = vmul.f32 0.044715, %v2936_v58 }
 0xfdb   : > { %v2943_v63 = vmul.f32 0.7978846, %v2941_v59  ;;  %v2940_v0 = vadd.f32 %v2938_v60, %v2926_v52 }
 0xfdd   : > { %6102 = vtanh.f32 %v2943_v63  ;;  %v2942_v49 = vmul.f32 0.7978846, %v2940_v0 }
 0xfdf   : > { %6104 = vtanh.f32 %v2942_v49 }
 0xfea   : > { %v6103_v1 = vpop.eup %6102 }
 0xfeb   : > { %v2947_v2 = vadd.f32 1.0, %v6103_v1 }
 0xfec   : > { %v6105_v3 = vpop.eup %6104 }
 0xfed   : > { %v2946_v4 = vadd.f32 1.0, %v6105_v3  ;;  %v2949_v51 = vmul.f32 0.5, %v2947_v2 }
 0xfef   : > { %v2948_v5 = vmul.f32 0.5, %v2946_v4  ;;  %v2951_v7 = vmul.f32 %v2949_v51, %v2931_v47 }
 0xff1   : > { %v2950_v6 = vmul.f32 %v2948_v5, %v2926_v52 }
 0xff3   : > { %5878 = vmatprep.mubr.msk.f32.mxu0 %vm1077_vm0, %v2950_v6 }
 0xff4   : > { %5879 = vmatmul.mubr.msk.f32.vlgmr.msra.gmra.mxu0 %vm1077_vm0, %v2951_v7 }
 0xff5   : > { %5904 = vmatprep.mubr.msk.f32.mxu0 %vm6166_vm4, %v6165_v11 }
0x10b4   : > { %v5880_v9 = vpop.f32.mrf.mxu0 }
0x10b5   : > { %v3045_v10 = vadd.f32 %v5880_v9, %v5502_v8 }
0x10b6   : > { %v3039_v13 = vpop.f32.mrf.mxu0 }
0x10b7   : > { %v3040_v14 = vadd.f32 %v5502_v8, %v3039_v13  ;;  %v3049_v15 = vadd.f32 %v3045_v10, %v6602_v38 }
0x10b9   : > { %v3055_v17 = vsel %vm1161_vm3, %v3049_v15, 0.0  ;;  %v3048_v18 = vadd.f32 %v3040_v14, %v6600_v37 }
0x10ba   : > { %3056 = vadd.xlane.f32.xlu1 %v3055_v17 }
0x10bb   : > { %v3052_v19 = vsel %vm1161_vm3, %v3048_v18, 0.0 }
0x10bc   : > { %3053 = vadd.xlane.f32.xlu0 %v3052_v19 }
0x1143   : > { %v3057_v57 = vpop.xlane.xlu1 %3056 }
0x1144   : > { %v3059_v56 = vmul.f32 0.03125, %v3057_v57 }
0x1145   : > { %v3054_v21 = vpop.xlane.xlu0 %3053 }
0x1146   : > { %v3061_v22 = vsub.f32 %v3049_v15, %v3059_v56  ;;  %v3058_v23 = vmul.f32 0.03125, %v3054_v21 }
0x1148   : > { %v3060_v12 = vsub.f32 %v3048_v18, %v3058_v23  ;;  %v3063_v24 = vmul.f32 %v3061_v22, %v3061_v22 }
0x114a   : > { %v3067_v25 = vsel %vm1161_vm3, %v3063_v24, 0.0  ;;  %v3062_v26 = vmul.f32 %v3060_v12, %v3060_v12 }
0x114b   : > { %3068 = vadd.xlane.f32.xlu1 %v3067_v25 }
0x114c   : > { %v3064_v27 = vsel %vm1161_vm3, %v3062_v26, 0.0 }
0x114d   : > { %3065 = vadd.xlane.f32.xlu0 %v3064_v27 }
0x11d4   : > { %v3069_v34 = vpop.xlane.xlu1 %3068 }
0x11d5   : > { %v3071_v35 = vmul.f32 0.03125, %v3069_v34 }
0x11d6   : > { %v3066_v36 = vpop.xlane.xlu0 %3065 }
0x11d7   : > { %v3073_v62 = vadd.f32 1e-12, %v3071_v35  ;;  %v3070_v61 = vmul.f32 0.03125, %v3066_v36 }
0x11d9   : > { %6106 = vrsqrt.f32 %v3073_v62  ;;  %v3072_v37 = vadd.f32 1e-12, %v3070_v61 }
0x11db   : > { %6108 = vrsqrt.f32 %v3072_v37 }
0x11e6   : > { %v6107_v38 = vpop.eup %6106 }
0x11e7   : > { %v3077_v30 = vmul.f32 %v6107_v38, %v3061_v22 }
0x11e8   : > { %v6109_v39 = vpop.eup %6108 }
0x11e9   : > { %v3085_v41 = vmul.f32 %v5505_v28, %v3077_v30  ;;  %v3076_v42 = vmul.f32 %v6109_v39, %v3060_v12 }
0x11eb   : > { %v3093_v43 = vadd.f32 %v5506_v40, %v3085_v41  ;;  %v3084_v44 = vmul.f32 %v5505_v28, %v3076_v42 }
0x11ed   : > { %3095 = vst.msk [vmem:[#allocation2 + $0x8] sm:$0xff] %vm1161_vm3, %v3093_v43  ;;  %v3092_v45 = vadd.f32 %v5506_v40, %v3084_v44 }
0x11ef   : > { %3094 = vst.msk [vmem:[#allocation2] sm:$0xff] %vm1161_vm3, %v3092_v45 }
0x11f4   : > { %v6672_v47 = vld [vmem:[#allocation2 + $0x8] sm:$0xff] }
0x11f6   : > { %v6668_v46 = vld [vmem:[#allocation2] sm:$0xff] }
0x11f7   : > { %5889 = vmatprep.mubr.msk.f32.mxu1 %vm1161_vm3, %v6668_v46 }
0x11f8   : > { %5890 = vmatmul.mubr.msk.f32.vlgmr.msra.gmra.mxu1 %vm1161_vm3, %v6672_v47 }
0x11f9   : > { %5894 = vmatprep.mubr.msk.f32.mxu1 %vm6166_vm4, %v6165_v11 }
0x12b8   : > { %v5891_v50 = vpop.f32.mrf.mxu1 }
0x12b9   : > { %v6679_v52 = vadd.f32 %v5891_v50, %v5512_v48 }
0x12ba   : > { %v3183_v53 = vpop.f32.mrf.mxu1 }
0x12bb   : > { %v6681_v54 = vadd.f32 %v5512_v48, %v3183_v53  ;;  %3270 = vrot.lane.b32.xlu1 %v6679_v52, %s6995_s8 }
0x12bd   : > { %3193 = vrot.lane.b32.xlu0 %v6681_v54, %s6995_s8  ;;  %s7000_s8 = smov 80  }
0x132d   : > { %v3271_v58 = vpop.permute.xlu1 %3270 }
0x132f   : > { %v3194_v55 = vpop.permute.xlu0 %3193 }
0x1330   : > { %5893 = vmatpush3.xpose.msk.msra.mxu1 %vm1330_vm5, %v3194_v55 }
0x1331   : > { %5897 = vmatprep.subr.mxu1 %v6165_v11 }
0x1333   : > { %5895 = vmatmul.mubr.msk.f32.vlgmr.msra.gmra.mxu1 %vm1330_vm5, %v6681_v54 }
0x1334   : > { %5898 = vmatpush3.xpose.msk.msra.mxu1 %vm1330_vm5, %v3271_v58  ;;  %5899 = vmatprep.mubr.msk.f32.mxu1 %vm6166_vm4, %v6165_v11 }
0x1335   : > { %5907 = vmatprep.subr.mxu1 %v6165_v11 }
0x1337   : > { %5900 = vmatmul.mubr.msk.f32.vlgmr.msra.gmra.mxu1 %vm1330_vm5, %v6679_v52 }
0x1338   : > { %5909 = vmatprep.mubr.msk.f32.mxu1 %vm6166_vm4, %v6165_v11 }
0x13f3   : > { %v3265_v59 = vpop.f32.mrf.mxu1 }
0x13f4   : > { %v3346_v60 = vmul.f32 0.35355338, %v3265_v59 }
0x13f5   : > { %v5896_v63 = vpop.f32.mrf.mxu1 }
0x13f6   : > { %v3348_v0 = vadd.f32 %v3346_v60, %v6403_v16 }
0x13f7   : > { %v3342_v49 = vpop.f32.mrf.mxu1 }
0x13f8   : > { %v3347_v1 = vmul.f32 0.35355338, %v3342_v49  ;;  %v3350_v2 = vsel %vm1330_vm5, %v3348_v0, -inf }
0x13f9   : > { %3351 = vmax.xlane.f32.xlu1 %v3350_v2  ;;  %v5901_v3 = vpop.f32.mrf.mxu1 }
0x13fa   : > { %v3349_v4 = vadd.f32 %v3347_v1, %v6405_v20 }
0x13fc   : > { %v3353_v51 = vsel %vm1330_vm5, %v3349_v4, -inf }
0x13fd   : > { %3354 = vmax.xlane.f32.xlu0 %v3353_v51 }
0x140a   : > { %3448 = vrot.lane.b32.xlu1 %v6679_v52, %s6996_s5 }
0x140e   : > { %3526 = vrot.lane.b32.xlu1 %v6681_v54, %s6997_s30 }
0x1413   : > { %3372 = vrot.lane.b32.xlu0 %v6681_v54, %s6996_s5  ;;  %s7001_s5 = smov 112  }
0x1482   : > { %v3352_v5 = vpop.xlane.xlu1 %3351 }
0x1483   : > { %v3356_v6 = vsub.f32 %v3348_v0, %v3352_v5 }
0x1485   : > { %v3358_v7 = vmul.f32 1.442695, %v3356_v6 }
0x1486   : > { %v3449_v8 = vpop.permute.xlu1 %3448  ;;  %v3355_v9 = vpop.xlane.xlu0 %3354 }
0x1487   : > { %6110 = vpow2.f32 %v3358_v7  ;;  %v3357_v10 = vsub.f32 %v3349_v4, %v3355_v9  ;;  %5908 = vmatpush3.msra.mxu1 %v3449_v8 }
0x1488   : > { %5917 = vmatprep.subr.mxu1 %v6165_v11 }
0x1489   : > { %v3360_v13 = vmul.f32 1.442695, %v3357_v10 }
0x148a   : > { %v3373_v14 = vpop.permute.xlu0 %3372  ;;  %v3527_v57 = vpop.permute.xlu1 %3526 }
0x148b   : > { %6112 = vpow2.f32 %v3360_v13  ;;  %5903 = vmatpush3.msra.mxu0 %v3373_v14 }
0x148c   : > { %5912 = vmatprep.subr.mxu0 %v6165_v11 }
0x1494   : > { %v6111_v15 = vpop.eup %6110 }
0x1495   : > { %v3362_v17 = vsel %vm1330_vm5, %v6111_v15, 0.0 }
0x1496   : > { %3363 = vadd.xlane.f32.xlu0 %v3362_v17 }
0x1498   : > { %v6113_v18 = vpop.eup %6112 }
0x1499   : > { %v3365_v19 = vsel %vm1330_vm5, %v6113_v18, 0.0 }
0x149a   : > { %3366 = vadd.xlane.f32.xlu1 %v3365_v19 }
0x14ab   : > { %3524 = vrot.lane.b32.xlu1 %v6681_v54, %s6998_s26 }
0x14ac   : > { %3604 = vrot.lane.b32.xlu0 %v6679_v52, %s6997_s30  ;;  %s7002_s30 = smov 48  }
0x14b0   : > { %3602 = vrot.lane.b32.xlu0 %v6679_v52, %s6998_s26  ;;  %s7003_s26 = smov 72  }
0x151f   : > { %v3364_v56 = vpop.xlane.xlu0 %3363 }
0x1520   : > { %6114 = vrcp.f32 %v3364_v56 }
0x1523   : > { %v3367_v21 = vpop.xlane.xlu1 %3366  ;;  %v3605_v24 = vpop.permute.xlu0 %3604 }
0x1524   : > { %6116 = vrcp.f32 %v3367_v21 }
0x1527   : > { %v3525_v26 = vpop.permute.xlu1 %3524  ;;  %v3603_v27 = vpop.permute.xlu0 %3602 }
0x152d   : > { %v6115_v22 = vpop.eup %6114 }
0x152e   : > { %v3369_v23 = vmul.f32 %v6115_v22, %v6111_v15 }
0x1530   : > { %5905 = vmatmul.mubr.msk.f32.vlgmr.msra.gmra.mxu0 %vm1330_vm5, %v3369_v23 }
0x1531   : > { %v6117_v12 = vpop.eup %6116  ;;  %5913 = vmatpush3.xpose.msk.msra.mxu0 %vm1330_vm5, %v3527_v57  ;;  %5914 = vmatprep.mubr.msk.f32.mxu0 %vm6166_vm4, %v6165_v11 }
0x1532   : > { %v3371_v25 = vmul.f32 %v6117_v12, %v6113_v18  ;;  %5922 = vmatprep.subr.mxu0 %v6165_v11 }
0x1534   : > { %5910 = vmatmul.mubr.msk.f32.vlgmr.msra.gmra.mxu1 %vm1330_vm5, %v3371_v25  ;;  %5915 = vmatmul.mubr.msk.f32.vlgmr.msra.gmra.mxu0 %vm1330_vm5, %v3525_v26 }
0x1535   : > { %5918 = vmatpush3.xpose.msk.msra.mxu1 %vm1330_vm5, %v3605_v24  ;;  %5919 = vmatprep.mubr.msk.f32.mxu1 %vm6166_vm4, %v6165_v11 }
0x1536   : > { %5927 = vmatprep.subr.mxu1 %v6165_v11  ;;  %5924 = vmatprep.mubr.msk.f32.mxu0 %vm6166_vm4, %v6165_v11 }
0x1538   : > { %5920 = vmatmul.mubr.msk.f32.vlgmr.msra.gmra.mxu1 %vm1330_vm5, %v3603_v27 }
0x1539   : > { %5929 = vmatprep.mubr.msk.f32.mxu1 %vm6166_vm4, %v6165_v11 }
0x15f0   : > { %v6735_v29 = vpop.f32.mrf.mxu0 }
0x15f2   : > { %v5906_v31 = vpop.f32.mrf.mxu0 }
0x15f4   : > { %v6737_v32 = vpop.f32.mrf.mxu1  ;;  %v3598_v33 = vpop.f32.mrf.mxu0 }
0x15f5   : > { %v3680_v34 = vmul.f32 0.35355338, %v3598_v33 }
0x15f6   : > { %v5911_v35 = vpop.f32.mrf.mxu1  ;;  %v5916_v36 = vpop.f32.mrf.mxu0 }
0x15f7   : > { %v3682_v62 = vadd.f32 %v3680_v34, %v6403_v16 }
0x15f8   : > { %v3676_v61 = vpop.f32.mrf.mxu1 }
0x15f9   : > { %v3681_v37 = vmul.f32 0.35355338, %v3676_v61  ;;  %v3684_v38 = vsel %vm1330_vm5, %v3682_v62, -inf }
0x15fa   : > { %3685 = vmax.xlane.f32.xlu1 %v3684_v38  ;;  %v5921_v28 = vpop.f32.mrf.mxu1 }
0x15fb   : > { %v3683_v30 = vadd.f32 %v3681_v37, %v6405_v20 }
0x15fd   : > { %v3687_v39 = vsel %vm1330_vm5, %v3683_v30, -inf }
0x15fe   : > { %3688 = vmax.xlane.f32.xlu0 %v3687_v39 }
0x160b   : > { %3782 = vrot.lane.b32.xlu1 %v6679_v52, %s6999_s1 }
0x160f   : > { %3860 = vrot.lane.b32.xlu1 %v6681_v54, %s7000_s8 }
0x1614   : > { %3706 = vrot.lane.b32.xlu0 %v6681_v54, %s6999_s1  ;;  %s7004_s1 = smov 104  }
0x1683   : > { %v3686_v40 = vpop.xlane.xlu1 %3685 }
0x1684   : > { %v3690_v41 = vsub.f32 %v3682_v62, %v3686_v40 }
0x1686   : > { %v3692_v42 = vmul.f32 1.442695, %v3690_v41 }
0x1687   : > { %v3783_v43 = vpop.permute.xlu1 %3782  ;;  %v3689_v44 = vpop.xlane.xlu0 %3688 }
0x1688   : > { %6118 = vpow2.f32 %v3692_v42  ;;  %v3691_v45 = vsub.f32 %v3683_v30, %v3689_v44  ;;  %5928 = vmatpush3.msra.mxu1 %v3783_v43 }
0x1689   : > { %5937 = vmatprep.subr.mxu1 %v6165_v11 }
0x168a   : > { %v3694_v48 = vmul.f32 1.442695, %v3691_v45 }
0x168b   : > { %v3707_v50 = vpop.permute.xlu0 %3706  ;;  %v3861_v60 = vpop.permute.xlu1 %3860 }
0x168c   : > { %6120 = vpow2.f32 %v3694_v48  ;;  %5923 = vmatpush3.msra.mxu0 %v3707_v50 }
0x168d   : > { %5932 = vmatprep.subr.mxu0 %v6165_v11 }
0x1695   : > { %v6119_v53 = vpop.eup %6118 }
0x1696   : > { %v3696_v55 = vsel %vm1330_vm5, %v6119_v53, 0.0 }
0x1697   : > { %3697 = vadd.xlane.f32.xlu0 %v3696_v55 }
0x1699   : > { %v6121_v58 = vpop.eup %6120 }
0x169a   : > { %v3699_v59 = vsel %vm1330_vm5, %v6121_v58, 0.0 }
0x169b   : > { %3700 = vadd.xlane.f32.xlu1 %v3699_v59 }
0x16ac   : > { %3858 = vrot.lane.b32.xlu1 %v6681_v54, %s7001_s5 }
0x16ad   : > { %3938 = vrot.lane.b32.xlu0 %v6679_v52, %s7000_s8  ;;  %s7005_s8 = smov 40  }
0x16b1   : > { %3936 = vrot.lane.b32.xlu0 %v6679_v52, %s7001_s5  ;;  %s7006_s5 = smov 8  }
0x1720   : > { %v3698_v63 = vpop.xlane.xlu0 %3697 }
0x1721   : > { %6122 = vrcp.f32 %v3698_v63 }
0x1724   : > { %v3701_v0 = vpop.xlane.xlu1 %3700  ;;  %v3939_v3 = vpop.permute.xlu0 %3938 }
0x1725   : > { %6124 = vrcp.f32 %v3701_v0 }
0x1728   : > { %v3859_v51 = vpop.permute.xlu1 %3858  ;;  %v3937_v5 = vpop.permute.xlu0 %3936 }
0x172e   : > { %v6123_v49 = vpop.eup %6122 }
0x172f   : > { %v3703_v1 = vmul.f32 %v6123_v49, %v6119_v53 }
0x1731   : > { %5925 = vmatmul.mubr.msk.f32.vlgmr.msra.gmra.mxu0 %vm1330_vm5, %v3703_v1 }
0x1732   : > { %v6125_v2 = vpop.eup %6124  ;;  %5933 = vmatpush3.xpose.msk.msra.mxu0 %vm1330_vm5, %v3861_v60  ;;  %5934 = vmatprep.mubr.msk.f32.mxu0 %vm6166_vm4, %v6165_v11 }
0x1733   : > { %v3705_v4 = vmul.f32 %v6125_v2, %v6121_v58  ;;  %5942 = vmatprep.subr.mxu0 %v6165_v11 }
0x1735   : > { %5930 = vmatmul.mubr.msk.f32.vlgmr.msra.gmra.mxu1 %vm1330_vm5, %v3705_v4  ;;  %5935 = vmatmul.mubr.msk.f32.vlgmr.msra.gmra.mxu0 %vm1330_vm5, %v3859_v51 }
0x1736   : > { %5938 = vmatpush3.xpose.msk.msra.mxu1 %vm1330_vm5, %v3939_v3  ;;  %5939 = vmatprep.mubr.msk.f32.mxu1 %vm6166_vm4, %v6165_v11 }
0x1737   : > { %5947 = vmatprep.subr.mxu1 %v6165_v11  ;;  %5944 = vmatprep.mubr.msk.f32.mxu0 %vm6166_vm4, %v6165_v11 }
0x1739   : > { %5940 = vmatmul.mubr.msk.f32.vlgmr.msra.gmra.mxu1 %vm1330_vm5, %v3937_v5 }
0x173a   : > { %5949 = vmatprep.mubr.msk.f32.mxu1 %vm6166_vm4, %v6165_v11 }
0x17f1   : > { %v6775_v6 = vpop.f32.mrf.mxu0 }
0x17f3   : > { %v5926_v7 = vpop.f32.mrf.mxu0 }
0x17f5   : > { %v6777_v8 = vpop.f32.mrf.mxu1  ;;  %v3932_v9 = vpop.f32.mrf.mxu0 }
0x17f6   : > { %v4014_v10 = vmul.f32 0.35355338, %v3932_v9 }
0x17f7   : > { %v5931_v13 = vpop.f32.mrf.mxu1  ;;  %v5936_v14 = vpop.f32.mrf.mxu0 }
0x17f8   : > { %v4016_v15 = vadd.f32 %v4014_v10, %v6403_v16 }
0x17f9   : > { %v4010_v17 = vpop.f32.mrf.mxu1 }
0x17fa   : > { %v4015_v18 = vmul.f32 0.35355338, %v4010_v17  ;;  %v4018_v19 = vsel %vm1330_vm5, %v4016_v15, -inf }
0x17fb   : > { %4019 = vmax.xlane.f32.xlu1 %v4018_v19  ;;  %v5941_v57 = vpop.f32.mrf.mxu1  ;;  %v5541_v19 = vld [vmem:[%s6545_s25 + $0x30] sm:$0xff] }
0x17fc   : > { %v4017_v56 = vadd.f32 %v4015_v18, %v6405_v20  ;;  %v5542_v18 = vld [vmem:[%s6545_s25 + $0x38] sm:$0xff]  ;;  %v5540_v57 = vld [vmem:[%s6545_s25 + $0x28] sm:$0xff] }
0x17fe   : > { %v4021_v21 = vsel %vm1330_vm5, %v4017_v56, -inf }
0x17ff   : > { %4022 = vmax.xlane.f32.xlu0 %v4021_v21 }
0x180c   : > { %4116 = vrot.lane.b32.xlu1 %v6679_v52, %s7002_s30 }
0x1810   : > { %4194 = vrot.lane.b32.xlu1 %v6681_v54, %s7003_s26 }
0x1815   : > { %4040 = vrot.lane.b32.xlu0 %v6681_v54, %s7002_s30  ;;  %s7007_s30 = smov 16  }
0x1884   : > { %v4020_v22 = vpop.xlane.xlu1 %4019 }
0x1885   : > { %v4024_v23 = vsub.f32 %v4016_v15, %v4020_v22 }
0x1887   : > { %v4026_v12 = vmul.f32 1.442695, %v4024_v23 }
0x1888   : > { %v4117_v24 = vpop.permute.xlu1 %4116  ;;  %v4023_v25 = vpop.xlane.xlu0 %4022 }
0x1889   : > { %6126 = vpow2.f32 %v4026_v12  ;;  %v4025_v26 = vsub.f32 %v4017_v56, %v4023_v25  ;;  %5948 = vmatpush3.msra.mxu1 %v4117_v24  ;;  %v5539_v56 = vld [vmem:[%s6545_s25 + $0x20] sm:$0xff] }
0x188a   : > { %5957 = vmatprep.subr.mxu1 %v6165_v11 }
0x188b   : > { %v4028_v27 = vmul.f32 1.442695, %v4025_v26 }
0x188c   : > { %v4041_v31 = vpop.permute.xlu0 %4040  ;;  %v4195_v62 = vpop.permute.xlu1 %4194 }
0x188d   : > { %6128 = vpow2.f32 %v4028_v27  ;;  %5943 = vmatpush3.msra.mxu0 %v4041_v31 }
0x188e   : > { %5952 = vmatprep.subr.mxu0 %v6165_v11 }
0x1896   : > { %v6127_v33 = vpop.eup %6126 }
0x1897   : > { %v4030_v34 = vsel %vm1330_vm5, %v6127_v33, 0.0 }
0x1898   : > { %4031 = vadd.xlane.f32.xlu0 %v4030_v34 }
0x189a   : > { %v6129_v35 = vpop.eup %6128 }
0x189b   : > { %v4033_v36 = vsel %vm1330_vm5, %v6129_v35, 0.0 }
0x189c   : > { %4034 = vadd.xlane.f32.xlu1 %v4033_v36 }
0x18ad   : > { %4192 = vrot.lane.b32.xlu1 %v6681_v54, %s7004_s1 }
0x18ae   : > { %4272 = vrot.lane.b32.xlu0 %v6679_v52, %s7003_s26  ;;  %s7008_s26 = smov 24  }
0x18b2   : > { %4270 = vrot.lane.b32.xlu0 %v6679_v52, %s7004_s1 }
0x1921   : > { %v4032_v61 = vpop.xlane.xlu0 %4031 }
0x1922   : > { %6130 = vrcp.f32 %v4032_v61 }
0x1925   : > { %v4035_v37 = vpop.xlane.xlu1 %4034  ;;  %v4273_v39 = vpop.permute.xlu0 %4272 }
0x1926   : > { %6132 = vrcp.f32 %v4035_v37 }
0x1929   : > { %v4193_v41 = vpop.permute.xlu1 %4192  ;;  %v4271_v42 = vpop.permute.xlu0 %4270 }
0x192f   : > { %v6131_v38 = vpop.eup %6130 }
0x1930   : > { %v4037_v28 = vmul.f32 %v6131_v38, %v6127_v33  ;;  %v5544_v38 = vld [vmem:[%s6567_s6 + $0x1] ss:$0 sm:$0xff] }
0x1932   : > { %5945 = vmatmul.mubr.msk.f32.vlgmr.msra.gmra.mxu0 %vm1330_vm5, %v4037_v28 }
0x1933   : > { %v6133_v30 = vpop.eup %6132  ;;  %5953 = vmatpush3.xpose.msk.msra.mxu0 %vm1330_vm5, %v4195_v62  ;;  %5954 = vmatprep.mubr.msk.f32.mxu0 %vm6166_vm4, %v6165_v11 }
0x1934   : > { %v4039_v40 = vmul.f32 %v6133_v30, %v6129_v35  ;;  %5962 = vmatprep.subr.mxu0 %v6165_v11 }
0x1936   : > { %5950 = vmatmul.mubr.msk.f32.vlgmr.msra.gmra.mxu1 %vm1330_vm5, %v4039_v40  ;;  %5955 = vmatmul.mubr.msk.f32.vlgmr.msra.gmra.mxu0 %vm1330_vm5, %v4193_v41 }
0x1937   : > { %5958 = vmatpush3.xpose.msk.msra.mxu1 %vm1330_vm5, %v4273_v39  ;;  %5959 = vmatprep.mubr.msk.f32.mxu1 %vm6166_vm4, %v6165_v11 }
0x1938   : > { %5967 = vmatprep.subr.mxu1 %v6165_v11  ;;  %5964 = vmatprep.mubr.msk.f32.mxu0 %vm6166_vm4, %v6165_v11 }
0x193a   : > { %5960 = vmatmul.mubr.msk.f32.vlgmr.msra.gmra.mxu1 %vm1330_vm5, %v4271_v42 }
0x193b   : > { %5969 = vmatprep.mubr.msk.f32.mxu1 %vm6166_vm4, %v6165_v11 }
0x19f2   : > { %v4112_v43 = vpop.f32.mrf.mxu0 }
0x19f4   : > { %v5946_v44 = vpop.f32.mrf.mxu0 }
0x19f6   : > { %v4188_v45 = vpop.f32.mrf.mxu1  ;;  %v4266_v48 = vpop.f32.mrf.mxu0 }
0x19f7   : > { %v4348_v50 = vmul.f32 0.35355338, %v4266_v48 }
0x19f8   : > { %v5951_v53 = vpop.f32.mrf.mxu1  ;;  %v5956_v55 = vpop.f32.mrf.mxu0 }
0x19f9   : > { %v4350_v58 = vadd.f32 %v4348_v50, %v6403_v16 }
0x19fa   : > { %v4344_v59 = vpop.f32.mrf.mxu1 }
0x19fb   : > { %v4349_v60 = vmul.f32 0.35355338, %v4344_v59  ;;  %v4352_v63 = vsel %vm1330_vm5, %v4350_v58, -inf  ;;  %v5554_v59 = vld [vmem:[%s6580_s23 + $0x38] sm:$0xff] }
0x19fc   : > { %4353 = vmax.xlane.f32.xlu1 %v4352_v63  ;;  %v5961_v0 = vpop.f32.mrf.mxu1  ;;  %v5552_v63 = vld [vmem:[%s6580_s23 + $0x28] sm:$0xff] }
0x19fd   : > { %v4351_v49 = vadd.f32 %v4349_v60, %v6405_v20  ;;  %v5553_v60 = vld [vmem:[%s6580_s23 + $0x30] sm:$0xff]  ;;  %v5551_v0 = vld [vmem:[%s6580_s23 + $0x20] sm:$0xff] }
0x19ff   : > { %v4355_v1 = vsel %vm1330_vm5, %v4351_v49, -inf }
0x1a00   : > { %4356 = vmax.xlane.f32.xlu0 %v4355_v1 }
0x1a85   : > { %v4354_v2 = vpop.xlane.xlu1 %4353 }
0x1a86   : > { %v4358_v3 = vsub.f32 %v4350_v58, %v4354_v2 }
0x1a88   : > { %v4360_v4 = vmul.f32 1.442695, %v4358_v3 }
0x1a89   : > { %v4357_v51 = vpop.xlane.xlu0 %4356 }
0x1a8a   : > { %6134 = vpow2.f32 %v4360_v4  ;;  %v4359_v5 = vsub.f32 %v4351_v49, %v4357_v51 }
0x1a8c   : > { %v4362_v7 = vmul.f32 1.442695, %v4359_v5 }
0x1a8e   : > { %6136 = vpow2.f32 %v4362_v7  ;;  %v5549_v7 = vld [vmem:[%s6590_s2 + $0x1] ss:$0 sm:$0xff] }
0x1a97   : > { %v6135_v16 = vpop.eup %6134 }
0x1a98   : > { %v4364_v9 = vsel %vm1330_vm5, %v6135_v16, 0.0 }
0x1a99   : > { %4365 = vadd.xlane.f32.xlu0 %v4364_v9 }
0x1a9b   : > { %v6137_v10 = vpop.eup %6136 }
0x1a9c   : > { %v4367_v13 = vsel %vm1330_vm5, %v6137_v10, 0.0 }
0x1a9d   : > { %4368 = vadd.xlane.f32.xlu1 %v4367_v13 }
0x1aae   : > { %4450 = vrot.lane.b32.xlu1 %v6679_v52, %s7005_s8 }
0x1aaf   : > { %4374 = vrot.lane.b32.xlu0 %v6681_v54, %s7005_s8 }
0x1ab2   : > { %4528 = vrot.lane.b32.xlu1 %v6775_v6, %s7006_s5 }
0x1ab3   : > { %4530 = vrot.lane.b32.xlu0 %v6777_v8, %s7006_s5  ;;  %s1046_s5 = scalar_lea.vmem %s6945_s21, %s7010_s28 }
0x1ab6   : > { %4536 = vrot.lane.b32.xlu1 %v4112_v43, %s7007_s30 }
0x1ab7   : > { %4538 = vrot.lane.b32.xlu0 %v4188_v45, %s7007_s30 }
0x1b22   : > { %v4366_v20 = vpop.xlane.xlu0 %4365 }
0x1b23   : > { %6138 = vrcp.f32 %v4366_v20  ;;  %v5550_v20 = vld [vmem:[%s6597_s27 + $0x1] ss:$0 sm:$0xff] }
0x1b26   : > { %v4369_v14 = vpop.xlane.xlu1 %4368  ;;  %v4375_v15 = vpop.permute.xlu0 %4374 }
0x1b27   : > { %6140 = vrcp.f32 %v4369_v14  ;;  %5963 = vmatpush3.msra.mxu0 %v4375_v15 }
0x1b28   : > { %5972 = vmatprep.subr.mxu0 %v5542_v18 }
0x1b2a   : > { %v4451_v52 = vpop.permute.xlu1 %4450  ;;  %v4531_v25 = vpop.permute.xlu0 %4530 }
0x1b2b   : > { %5968 = vmatpush3.msra.mxu1 %v4451_v52  ;;  %v4551_v36 = vsel %vm1330_vm5, %v6737_v32, %v4531_v25 }
0x1b2c   : > { %5983 = vmatprep.subr.mxu1 %v5554_v59 }
0x1b2e   : > { %v4529_v24 = vpop.permute.xlu1 %4528  ;;  %v4539_v31 = vpop.permute.xlu0 %4538 }
0x1b2f   : > { %v4550_v27 = vsel %vm1330_vm5, %v6735_v29, %v4529_v24  ;;  %v4553_v62 = vsel %vm2698_vm7, %v4551_v36, %v4539_v31 }
0x1b30   : > { %v6139_v54 = vpop.eup %6138 }
0x1b31   : > { %v4371_v6 = vmul.f32 %v6139_v54, %v6135_v16  ;;  %v5566_v54 = vld [vmem:[%s6612_s0 + $0x78] sm:$0xff] }
0x1b32   : > { %v4537_v26 = vpop.permute.xlu1 %4536 }
0x1b33   : > { %5965 = vmatmul.mubr.msk.f32.vlgmr.msra.gmra.mxu0 %vm1330_vm5, %v4371_v6  ;;  %v4552_v33 = vsel %vm2698_vm7, %v4550_v27, %v4537_v26  ;;  %v5565_v6 = vld [vmem:[%s6612_s0 + $0x70] sm:$0xff] }
0x1b34   : > { %v6141_v8 = vpop.eup %6140  ;;  %5973 = vmatpush3.msra.mxu0 %v5542_v18  ;;  %v5562_v18 = vld [vmem:[%s6612_s0 + $0x58] sm:$0xff] }
0x1b35   : > { %v4373_v17 = vmul.f32 %v6141_v8, %v6137_v10  ;;  %5974 = vmatprep.subr.mxu0 %v5541_v19  ;;  %v5564_v8 = vld [vmem:[%s6612_s0 + $0x68] sm:$0xff] }
0x1b36   : > { %5975 = vmatpush3.msra.mxu0 %v5541_v19  ;;  %v5561_v19 = vld [vmem:[%s6612_s0 + $0x50] sm:$0xff] }
0x1b37   : > { %5970 = vmatmul.mubr.msk.f32.vlgmr.msra.gmra.mxu1 %vm1330_vm5, %v4373_v17  ;;  %5976 = vmatprep.subr.mxu0 %v5540_v57  ;;  %v5563_v17 = vld [vmem:[%s6612_s0 + $0x60] sm:$0xff] }
0x1b38   : > { %5977 = vmatpush3.msra.mxu0 %v5540_v57  ;;  %5984 = vmatpush3.msra.mxu1 %v5554_v59  ;;  %v5560_v57 = vld [vmem:[%s6612_s0 + $0x48] sm:$0xff] }
0x1b39   : > { %5978 = vmatprep.subr.mxu0 %v5539_v56  ;;  %5985 = vmatprep.subr.mxu1 %v5553_v60 }
0x1b3a   : > { %5979 = vmatpush3.msra.mxu0 %v5539_v56  ;;  %5986 = vmatpush3.msra.mxu1 %v5553_v60  ;;  %v5559_v56 = vld [vmem:[%s6612_s0 + $0x40] sm:$0xff] }
0x1b3b   : > { %5987 = vmatprep.subr.mxu1 %v5552_v63  ;;  %5994 = vmatprep.subr.mxu0 %v5566_v54 }
0x1b3c   : > { %5988 = vmatpush3.msra.mxu1 %v5552_v63 }
0x1b3d   : > { %5989 = vmatprep.subr.mxu1 %v5551_v0 }
0x1b3e   : > { %5990 = vmatpush3.msra.mxu1 %v5551_v0 }
0x1b3f   : > { %6013 = vmatprep.subr.mxu1 %v6165_v11 }
0x1bf3   : > { %v4446_v21 = vpop.f32.mrf.mxu0 }
0x1bf4   : > { %4544 = vrot.lane.b32.xlu1 %v4446_v21, %s7008_s26  ;;  %v5556_v21 = vld [vmem:[%s6627_s4 + $0x1] ss:$0 sm:$0xff]  ;;  %s1038_s4 = scalar_lea.vmem %s6943_s19, %s7010_s28 }
0x1bf5   : > { %v5966_v22 = vpop.f32.mrf.mxu0 }
0x1bf7   : > { %v4522_v23 = vpop.f32.mrf.mxu1 }
0x1bf8   : > { %4546 = vrot.lane.b32.xlu0 %v4522_v23, %s7008_s26 }
0x1bf9   : > { %v5971_v12 = vpop.f32.mrf.mxu1 }
0x1c66   : > { %v4545_v34 = vpop.permute.xlu1 %4544 }
0x1c67   : > { %v4554_v35 = vsel %vm2701_vm6, %v4552_v33, %v4545_v34 }
0x1c68   : > { %5980 = vmatprep.mubr.msk.f32.mxu0 %vm1161_vm3, %v4554_v35 }
0x1c6a   : > { %v4547_v61 = vpop.permute.xlu0 %4546 }
0x1c6b   : > { %v4555_v37 = vsel %vm2701_vm6, %v4553_v62, %v4547_v61 }
0x1c6c   : > { %5981 = vmatmul.mubr.msk.f32.vlgmr.msra.gmra.mxu0 %vm1161_vm3, %v4555_v37 }
0x1c6d   : > { %5995 = vmatpush3.msra.mxu0 %v5566_v54 }
0x1c6e   : > { %5996 = vmatprep.subr.mxu0 %v5565_v6 }
0x1c6f   : > { %5997 = vmatpush3.msra.mxu0 %v5565_v6  ;;  %v5574_v6 = vld [vmem:[%s6662_s9 + $0x1] ss:$0 sm:$0xff] }
0x1c70   : > { %5998 = vmatprep.subr.mxu0 %v5564_v8 }
0x1c71   : > { %5999 = vmatpush3.msra.mxu0 %v5564_v8 }
0x1c72   : > { %6000 = vmatprep.subr.mxu0 %v5563_v17 }
0x1c73   : > { %6001 = vmatpush3.msra.mxu0 %v5563_v17 }
0x1c74   : > { %6002 = vmatprep.subr.mxu0 %v5562_v18 }
0x1c75   : > { %6003 = vmatpush3.msra.mxu0 %v5562_v18 }
0x1c76   : > { %6004 = vmatprep.subr.mxu0 %v5561_v19 }
0x1c77   : > { %6005 = vmatpush3.msra.mxu0 %v5561_v19 }
0x1c78   : > { %6006 = vmatprep.subr.mxu0 %v5560_v57 }
0x1c79   : > { %6007 = vmatpush3.msra.mxu0 %v5560_v57 }
0x1c7a   : > { %6008 = vmatprep.subr.mxu0 %v5559_v56 }
0x1c7b   : > { %6009 = vmatpush3.msra.mxu0 %v5559_v56 }
0x1d2c   : > { %v5982_v29 = vpop.f32.mrf.mxu0 }
0x1d2d   : > { %v4647_v28 = vadd.f32 %v5982_v29, %v5544_v38 }
0x1d2e   : > { %v4641_v30 = vpop.f32.mrf.mxu0 }
0x1d2f   : > { %v4651_v39 = vadd.f32 %v4647_v28, %v6672_v47  ;;  %v4642_v40 = vadd.f32 %v5544_v38, %v4641_v30 }
0x1d31   : > { %v4650_v41 = vadd.f32 %v4642_v40, %v6668_v46  ;;  %v4659_v42 = vsel %vm1161_vm3, %v4651_v39, 0.0 }
0x1d32   : > { %4660 = vadd.xlane.f32.xlu0 %v4659_v42  ;;  %v5568_v42 = vld [vmem:[%s6638_s24 + $0x1] ss:$0 sm:$0xff]  ;;  %s5588_s24 = sshll.u32 %s7010_s28, 5 }
0x1d33   : > { %v4656_v32 = vsel %vm1161_vm3, %v4650_v41, 0.0  ;;  %s1035_s6 = scalar_lea.vmem %s6942_s18, %s5588_s24  ;;  %s1043_s25 = scalar_lea.vmem %s6944_s20, %s5588_s24 }
0x1d34   : > { %4657 = vadd.xlane.f32.xlu1 %v4656_v32  ;;  %s1050_s24 = scalar_lea.vmem %s6946_s22, %s6369_s29 }
0x1dbb   : > { %v4661_v43 = vpop.xlane.xlu0 %4660 }
0x1dbc   : > { %v4663_v44 = vmul.f32 0.03125, %v4661_v43 }
0x1dbd   : > { %v4658_v45 = vpop.xlane.xlu1 %4657 }
0x1dbe   : > { %v4665_v48 = vsub.f32 %v4651_v39, %v4663_v44  ;;  %v4662_v50 = vmul.f32 0.03125, %v4658_v45 }
0x1dc0   : > { %v4664_v53 = vsub.f32 %v4650_v41, %v4662_v50  ;;  %v4667_v47 = vmul.f32 %v4665_v48, %v4665_v48 }
0x1dc2   : > { %v4671_v55 = vsel %vm1161_vm3, %v4667_v47, 0.0  ;;  %v4666_v46 = vmul.f32 %v4664_v53, %v4664_v53 }
0x1dc3   : > { %4672 = vadd.xlane.f32.xlu1 %v4671_v55 }
0x1dc4   : > { %v4668_v58 = vsel %vm1161_vm3, %v4666_v46, 0.0 }
0x1dc5   : > { %4669 = vadd.xlane.f32.xlu0 %v4668_v58 }
0x1e4c   : > { %v4673_v49 = vpop.xlane.xlu1 %4672 }
0x1e4d   : > { %v4675_v1 = vmul.f32 0.03125, %v4673_v49 }
0x1e4e   : > { %v4670_v2 = vpop.xlane.xlu0 %4669 }
0x1e4f   : > { %v4677_v3 = vadd.f32 1e-12, %v4675_v1  ;;  %v4674_v4 = vmul.f32 0.03125, %v4670_v2 }
0x1e51   : > { %6142 = vrsqrt.f32 %v4677_v3  ;;  %v4676_v51 = vadd.f32 1e-12, %v4674_v4  ;;  %v4963_v3 = vld [vmem:[%s1035_s6 + $0x18] sm:$0xff]  ;;  %v4962_v4 = vld [vmem:[%s1035_s6 + $0x10] sm:$0xff] }
0x1e53   : > { %6144 = vrsqrt.f32 %v4676_v51  ;;  %v4961_v51 = vld [vmem:[%s1035_s6 + $0x8] sm:$0xff] }
0x1e5e   : > { %v6143_v5 = vpop.eup %6142 }
0x1e5f   : > { %v4681_v16 = vmul.f32 %v6143_v5, %v4665_v48  ;;  %v4960_v5 = vld [vmem:[%s1035_s6] sm:$0xff] }
0x1e60   : > { %v6145_v9 = vpop.eup %6144 }
0x1e61   : > { %v4680_v10 = vmul.f32 %v6145_v9, %v4664_v53  ;;  %v4689_v13 = vmul.f32 %v5549_v7, %v4681_v16 }
0x1e63   : > { %v4688_v14 = vmul.f32 %v5549_v7, %v4680_v10  ;;  %v4697_v52 = vadd.f32 %v5550_v20, %v4689_v13 }
0x1e65   : > { %v4696_v15 = vadd.f32 %v5550_v20, %v4688_v14 }
0x1e67   : > { %5991 = vmatprep.mubr.msk.f32.mxu1 %vm1161_vm3, %v4696_v15 }
0x1e68   : > { %5992 = vmatmul.mubr.msk.f32.vlgmr.msra.gmra.mxu1 %vm1161_vm3, %v4697_v52 }
0x1e69   : > { %6021 = vmatprep.mubr.msk.f32.mxu1 %vm6166_vm4, %v6165_v11  ;;  %6014 = vmatpush3.msra.mxu1 %v4963_v3 }
0x1e6a   : > { %6015 = vmatprep.subr.mxu1 %v6165_v11 }
0x1e6b   : > { %6016 = vmatpush3.msra.mxu1 %v4962_v4 }
0x1e6c   : > { %6017 = vmatprep.subr.mxu1 %v6165_v11 }
0x1e6d   : > { %6018 = vmatpush3.msra.mxu1 %v4961_v51 }
0x1e6e   : > { %6019 = vmatprep.subr.mxu1 %v6165_v11 }
0x1e6f   : > { %6020 = vmatpush3.msra.mxu1 %v4960_v5 }
0x1e70   : > { %6024 = vmatprep.subr.mxu1 %v6165_v11 }
0x1f28   : > { %v5993_v22 = vpop.f32.mrf.mxu1 }
0x1f29   : > { %v4789_v23 = vadd.f32 %v5993_v22, %v5556_v21 }
0x1f2a   : > { %v4783_v12 = vpop.f32.mrf.mxu1 }
0x1f2b   : > { %v4793_v24 = vmul.f32 %v4789_v23, %v4789_v23  ;;  %v4784_v25 = vadd.f32 %v5556_v21, %v4783_v12  ;;  %v5052_v12 = vld [vmem:[%s1043_s25 + $0x18] sm:$0xff] }
0x1f2d   : > { %v4795_v26 = vmul.f32 %v4793_v24, %v4789_v23  ;;  %v4792_v27 = vmul.f32 %v4784_v25, %v4784_v25  ;;  %v5051_v24 = vld [vmem:[%s1043_s25 + $0x10] sm:$0xff] }
0x1f2f   : > { %v4797_v31 = vmul.f32 0.044715, %v4795_v26  ;;  %v4794_v33 = vmul.f32 %v4792_v27, %v4784_v25  ;;  %v5049_v26 = vld [vmem:[%s1043_s25] sm:$0xff] }
0x1f30   : > { %v5575_v27 = vld [vmem:[%s1038_s4] ss:$0 sm:$0xff] }
0x1f31   : > { %v4799_v34 = vadd.f32 %v4797_v31, %v4789_v23  ;;  %v4796_v35 = vmul.f32 0.044715, %v4794_v33 }
0x1f33   : > { %v4801_v36 = vmul.f32 0.7978846, %v4799_v34  ;;  %v4798_v62 = vadd.f32 %v4796_v35, %v4784_v25 }
0x1f35   : > { %6146 = vtanh.f32 %v4801_v36  ;;  %v4800_v61 = vmul.f32 0.7978846, %v4798_v62  ;;  %v5577_v36 = vld [vmem:[%s1046_s5] ss:$0 sm:$0xff] }
0x1f37   : > { %6148 = vtanh.f32 %v4800_v61 }
0x1f42   : > { %v6147_v37 = vpop.eup %6146 }
0x1f43   : > { %v4805_v38 = vadd.f32 1.0, %v6147_v37 }
0x1f44   : > { %v6149_v29 = vpop.eup %6148 }
0x1f45   : > { %v4804_v28 = vadd.f32 1.0, %v6149_v29  ;;  %v4807_v30 = vmul.f32 0.5, %v4805_v38 }
0x1f47   : > { %v4806_v39 = vmul.f32 0.5, %v4804_v28  ;;  %v4809_v41 = vmul.f32 %v4807_v30, %v4789_v23 }
0x1f49   : > { %v4808_v40 = vmul.f32 %v4806_v39, %v4784_v25  ;;  %v5050_v25 = vld [vmem:[%s1043_s25 + $0x8] sm:$0xff] }
0x1f4b   : > { %6010 = vmatprep.mubr.msk.f32.mxu0 %vm1077_vm0, %v4808_v40 }
0x1f4c   : > { %6011 = vmatmul.mubr.msk.f32.vlgmr.msra.gmra.mxu0 %vm1077_vm0, %v4809_v41 }
0x200c   : > { %v6012_v32 = vpop.f32.mrf.mxu0 }
0x200d   : > { %v4905_v43 = vadd.f32 %v6012_v32, %v5568_v42 }
0x200e   : > { %v4899_v44 = vpop.f32.mrf.mxu0 }
0x200f   : > { %v4909_v45 = vadd.f32 %v4905_v43, %v4697_v52  ;;  %v4900_v48 = vadd.f32 %v5568_v42, %v4899_v44 }
0x2011   : > { %v4908_v50 = vadd.f32 %v4900_v48, %v4696_v15  ;;  %v4917_v53 = vsel %vm1161_vm3, %v4909_v45, 0.0  ;;  %v5573_v15 = vld [vmem:[%s6656_s7 + $0x1] ss:$0 sm:$0xff] }
0x2012   : > { %4918 = vadd.xlane.f32.xlu0 %v4917_v53 }
0x2013   : > { %v4914_v47 = vsel %vm1161_vm3, %v4908_v50, 0.0 }
0x2014   : > { %4915 = vadd.xlane.f32.xlu1 %v4914_v47 }
0x209b   : > { %v4919_v55 = vpop.xlane.xlu0 %4918 }
0x209c   : > { %v4921_v46 = vmul.f32 0.03125, %v4919_v55 }
0x209d   : > { %v4916_v58 = vpop.xlane.xlu1 %4915 }
0x209e   : > { %v4923_v59 = vsub.f32 %v4909_v45, %v4921_v46  ;;  %v4920_v60 = vmul.f32 0.03125, %v4916_v58 }
0x20a0   : > { %v4922_v63 = vsub.f32 %v4908_v50, %v4920_v60  ;;  %v4925_v0 = vmul.f32 %v4923_v59, %v4923_v59 }
0x20a2   : > { %v4929_v49 = vsel %vm1161_vm3, %v4925_v0, 0.0  ;;  %v4924_v1 = vmul.f32 %v4922_v63, %v4922_v63 }
0x20a3   : > { %4930 = vadd.xlane.f32.xlu0 %v4929_v49 }
0x20a4   : > { %v4926_v2 = vsel %vm1161_vm3, %v4924_v1, 0.0 }
0x20a5   : > { %4927 = vadd.xlane.f32.xlu1 %v4926_v2 }
0x212c   : > { %v4931_v7 = vpop.xlane.xlu0 %4930 }
0x212d   : > { %v4933_v16 = vmul.f32 0.03125, %v4931_v7 }
0x212e   : > { %v4928_v9 = vpop.xlane.xlu1 %4927 }
0x212f   : > { %v4935_v10 = vadd.f32 1e-12, %v4933_v16  ;;  %v4932_v13 = vmul.f32 0.03125, %v4928_v9 }
0x2131   : > { %6150 = vrsqrt.f32 %v4935_v10  ;;  %v4934_v20 = vadd.f32 1e-12, %v4932_v13 }
0x2133   : > { %6152 = vrsqrt.f32 %v4934_v20 }
0x213e   : > { %v6151_v14 = vpop.eup %6150 }
0x213f   : > { %v4939_v52 = vmul.f32 %v6151_v14, %v4923_v59 }
0x2140   : > { %v6153_v54 = vpop.eup %6152 }
0x2141   : > { %v4947_v8 = vmul.f32 %v5573_v15, %v4939_v52  ;;  %v4938_v17 = vmul.f32 %v6153_v54, %v4922_v63 }
0x2143   : > { %v4955_v18 = vadd.f32 %v5574_v6, %v4947_v8  ;;  %v4946_v19 = vmul.f32 %v5573_v15, %v4938_v17 }
0x2145   : > { %4957 = vst.msk [vmem:[#allocation2 + $0x8] sm:$0xff] %vm1161_vm3, %v4955_v18  ;;  %v4954_v57 = vadd.f32 %v5574_v6, %v4946_v19 }
0x2147   : > { %4956 = vst.msk [vmem:[#allocation2] sm:$0xff] %vm1161_vm3, %v4954_v57 }
0x214c   : > { %v4959_v56 = vld [vmem:[#allocation2 + $0x8] sm:$0xff] }
0x214d   : > { %v4973_v21 = vrot.slane %v4959_v56, 7 }
0x214e   : > { %v4958_v22 = vld [vmem:[#allocation2] sm:$0xff] }
0x214f   : > { %v4975_v23 = vsel %vm4974_vm8, %v4973_v21, %v4958_v22 }
0x2150   : > { %6022 = vmatmul.mubr.msk.f32.vlgmr.msra.gmra.mxu1 %vm1161_vm3, %v4975_v23 }
0x2151   : > { %6032 = vmatprep.mubr.msk.f32.mxu1 %vm6166_vm4, %v6165_v11  ;;  %6025 = vmatpush3.msra.mxu1 %v5052_v12 }
0x2152   : > { %6026 = vmatprep.subr.mxu1 %v6165_v11 }
0x2153   : > { %6027 = vmatpush3.msra.mxu1 %v5051_v24 }
0x2154   : > { %6028 = vmatprep.subr.mxu1 %v6165_v11 }
0x2155   : > { %6029 = vmatpush3.msra.mxu1 %v5050_v25 }
0x2156   : > { %6030 = vmatprep.subr.mxu1 %v6165_v11 }
0x2157   : > { %6031 = vmatpush3.msra.mxu1 %v5049_v26 }
0x2210   : > { %v5044_v31 = vpop.f32.mrf.mxu1 }
0x2211   : > { %v5045_v33 = vadd.f32 %v5575_v27, %v5044_v31 }
0x2212   : > { %v6023_v34 = vpop.f32.mrf.mxu1 }
0x2213   : > { %6154 = vtanh.f32 %v5045_v33 }
0x2220   : > { %v6155_v35 = vpop.eup %6154 }
0x2221   : > { %6033 = vmatmul.mubr.msk.f32.vlgmr.msra.gmra.mxu1 %vm1161_vm3, %v6155_v35 }
0x22e1   : > { %v5129_v11 = vpop.f32.mrf.mxu1 }
0x22e2   : > { %v5130_v62 = vadd.f32 %v5577_v36, %v5129_v11 }
0x22e3   : > { %v6034_v61 = vpop.f32.mrf.mxu1 }
0x22e4   : > { %5134 = vst.msk [vmem:[%s1050_s24] sm:$0x3] %vm5133_vm9, %v5130_v62 }
0x22e5 PF: > { %s32_s3 = sadd.s32 1, %s6162_s3  }
0x22e6   : > { %p29_p4 = scmp.ge.s32.totalorder %s32_s3, 4  }
0x22e8   :  { %31 = sbr.rel (!%p29_p4) target bundleno = 11 (0xb), region = 213 }

</bundles_post_ra>
